<compile_context>
chip_gen: v7x
topology: tpu7x:2x2x1
jax: 0.10.0
libtpu: 0.0.40
codegen_flags: <defaults>
</compile_context>

<pallas_src>
import math
import jax
import jax.numpy as jnp
from jax import lax
from jax.experimental import pallas as pl
from jax.experimental.pallas import tpu as pltpu

# ----------------------------- config (small) -------------------------------
LAT_SIZE, LON_SIZE, SOG_SIZE, COG_SIZE = 16, 16, 8, 8
FULL_SIZE = LAT_SIZE + LON_SIZE + SOG_SIZE + COG_SIZE          # 48
N_LAT_E, N_LON_E, N_SOG_E, N_COG_E = 8, 8, 8, 8
N_EMBD = N_LAT_E + N_LON_E + N_SOG_E + N_COG_E                 # 32
N_HEAD = 4
HEAD_DIM = N_EMBD // N_HEAD                                    # 8
N_LAYER = 2
MAX_SEQLEN = 16
LN_EPS = 1e-5                                                  # nn.LayerNorm default

EMB_ROWS_PAD = 128     # padded #rows of the fused embedding table (>= FULL_SIZE), lane-dense one-hot
HEAD_PAD = 128         # padded head output lanes (>= FULL_SIZE), lane-dense stores

ATT_SIZES = (LAT_SIZE, LON_SIZE, SOG_SIZE, COG_SIZE)
ATT_OFFS = (0, LAT_SIZE, LAT_SIZE + LON_SIZE, LAT_SIZE + LON_SIZE + SOG_SIZE)


# ------------------------------ kernel helpers -------------------------------
def _layernorm(x, w, b):
    mu = jnp.mean(x, axis=-1, keepdims=True)
    var = jnp.mean((x - mu) ** 2, axis=-1, keepdims=True)
    return (x - mu) * lax.rsqrt(var + LN_EPS) * w + b


def _gelu(x):
    # TODO(synk): PyTorch nn.GELU() defaults to exact erf-GELU; using the tanh
    # approximation since erf lowering is not guaranteed in Mosaic (~1e-3 diff).
    c = math.sqrt(2.0 / math.pi)
    return 0.5 * x * (1.0 + jnp.tanh(c * (x + 0.044715 * x * x * x)))


# --------------------------- fully fused forward kernel ----------------------
def fused_forward_kernel(x_ref, emb_ref, pos_ref, wqkv_ref, wproj_ref,
                         wfc1_ref, wfc2_ref, bias_ref, ln_ref, lnf_ref,
                         whead_ref, out_ref):
    """x_ref: (BB, T, 4) raw trajectory features; out_ref: (BB, T, HEAD_PAD) bf16 logits."""
    BB, T, _ = x_ref.shape
    C = N_EMBD
    D = HEAD_DIM
    N = BB * T

    # ----- to_indexes (mode='uniform') + embedding gathers + concat, as a
    #       single lane-dense one-hot (OR-chain, single cast) bf16 matmul
    #       against the padded block-diagonal fused table. Indices are clamped
    #       to [0, size-1] so x == 1.0 / rounding overflow cannot leak into the
    #       next attribute's rows.
    xf = x_ref[...].reshape(N, 4)                                  # (N, 4)
    lane = lax.broadcasted_iota(jnp.int32, (N, EMB_ROWS_PAD), 1)   # (N, 128)
    hit = None
    for d in range(4):
        idx = (xf[:, d:d + 1] * float(ATT_SIZES[d])).astype(jnp.int32)
        idx = jnp.clip(idx, 0, ATT_SIZES[d] - 1) + ATT_OFFS[d]
        eq = lane == idx
        hit = eq if hit is None else jnp.logical_or(hit, eq)
    onehot = jnp.where(hit, 1.0, 0.0).astype(jnp.bfloat16)          # (N, 128)
    tok = jnp.dot(onehot, emb_ref[...], preferred_element_type=jnp.float32)  # (N, C) f32

    # positional embedding add (drop() is identity in eval)
    fea = (tok.reshape(BB, T, C) + pos_ref[...][None, :, :]).reshape(N, C)

    # ----- causal additive bias: built + broadcast once, reused by all layers/heads
    row = lax.broadcasted_iota(jnp.int32, (T, T), 0)
    col = lax.broadcasted_iota(jnp.int32, (T, T), 1)
    att_bias = jnp.broadcast_to(
        jnp.where(row >= col, 0.0, -1e30).astype(jnp.float32)[None, :, :],
        (BB, T, T))                                                 # (BB, T, T)

    x2 = fea
    for l in range(N_LAYER):                       # tiny, unrolled at trace time
        lnp = ln_ref[l]                            # (4, C): ln1w, ln1b, ln2w, ln2b
        bl = bias_ref[l]                           # (4, 128) padded bias blob
        b_qkv = bl[0, :3 * C]
        b_proj = bl[1, :C]
        b_fc1 = bl[2, :]
        b_fc2 = bl[3, :C]

        # ----- x = x + attn(ln1(x)) -----
        xn = _layernorm(x2, lnp[0], lnp[1]).astype(jnp.bfloat16)
        qkv = jnp.dot(xn, wqkv_ref[l],
                      preferred_element_type=jnp.float32) + b_qkv   # (N, 3C) f32
        qkv_b = qkv.astype(jnp.bfloat16)

        # per-head attention on lane slices (no axis-0 concat / relayouts);
        # 1/sqrt(D) is already folded into the Q columns of wqkv.
        y_heads = []
        for h in range(N_HEAD):
            q_h = qkv_b[:, h * D:(h + 1) * D].reshape(BB, T, D)
            k_h = qkv_b[:, C + h * D:C + (h + 1) * D].reshape(BB, T, D)
            v_h = qkv_b[:, 2 * C + h * D:2 * C + (h + 1) * D].reshape(BB, T, D)
            att = jnp.einsum('btd,bsd->bts', q_h, k_h,
                             preferred_element_type=jnp.float32)    # (BB, T, T)
            att = att + att_bias
            att = att - jnp.max(att, axis=-1, keepdims=True)
            p = jnp.exp(att)
            # TODO(synk): approx EUP reciprocal (~1e-4 rel err vs exact divide).
            p = p * pl.reciprocal(jnp.sum(p, axis=-1, keepdims=True), approx=True)
            y_heads.append(jnp.einsum('bts,bsd->btd', p.astype(jnp.bfloat16), v_h,
                                      preferred_element_type=jnp.float32))
        # head-major lane concat, matching torch's transpose(1,2).view(B,T,C)
        y = jnp.concatenate(y_heads, axis=-1).reshape(N, C)
        y = jnp.dot(y.astype(jnp.bfloat16), wproj_ref[l],
                    preferred_element_type=jnp.float32) + b_proj
        x2 = x2 + y

        # ----- x = x + mlp(ln2(x)) -----
        xn2 = _layernorm(x2, lnp[2], lnp[3]).astype(jnp.bfloat16)
        h1 = _gelu(jnp.dot(xn2, wfc1_ref[l],
                           preferred_element_type=jnp.float32) + b_fc1)
        x2 = x2 + jnp.dot(h1.astype(jnp.bfloat16), wfc2_ref[l],
                          preferred_element_type=jnp.float32) + b_fc2

    # ----- final LayerNorm + head (zero-padded to 128 lanes, bf16 lane-dense store)
    xn_f = _layernorm(x2, lnf_ref[0], lnf_ref[1]).astype(jnp.bfloat16)
    logits = jnp.dot(xn_f, whead_ref[...], preferred_element_type=jnp.float32)  # (N, HEAD_PAD)
    out_ref[...] = logits.reshape(BB, T, HEAD_PAD).astype(jnp.bfloat16)


# ------------------------------ wrapper --------------------------------------
def _rep_spec(a):
    nd = a.ndim
    return pl.BlockSpec(a.shape, lambda i, _nd=nd: (0,) * _nd)


def traisformer_forward(x, params, bb=None):
    """x: (B, T, 4) floats in [0,1).  Returns (logits, loss) with loss=None."""
    B, T, _ = x.shape
    assert T <= MAX_SEQLEN

    # Block of many sequences per grid step. Sweep 128/256/512 for large B on
    # v5e/v6e; capped at 256 so the live footprint stays well inside v7x's
    # 64 MiB VMEM with double-buffer headroom.
    BB = min(B, 256) if bb is None else bb
    n_blk = (B + BB - 1) // BB
    B_pad = n_blk * BB
    if B_pad != B:
        x = jnp.pad(x, ((0, B_pad - B), (0, 0), (0, 0)))

    pos = params["pos_emb"][0, :T, :]              # (T, C), static slice

    args = [x, params["emb_table"], pos,
            params["w_qkv"], params["w_proj"], params["w_fc1"], params["w_fc2"],
            params["biases"], params["ln"], params["lnf"], params["w_head"]]

    in_specs = [pl.BlockSpec((BB, T, 4), lambda i: (i, 0, 0))] + \
               [_rep_spec(a) for a in args[1:]]

    out = pl.pallas_call(
        fused_forward_kernel,
        out_shape=jax.ShapeDtypeStruct((B_pad, T, HEAD_PAD), jnp.bfloat16),
        grid=(n_blk,),
        in_specs=in_specs,
        out_specs=pl.BlockSpec((BB, T, HEAD_PAD), lambda i: (i, 0, 0)),
        compiler_params=pltpu.CompilerParams(
            # blocks are fully independent -> shard across v7x's two TensorCores
            dimension_semantics=("parallel",),
            # raise scoped VMEM above the 16/32 MiB defaults; 48 MiB is safe on
            # v5e/v6e (128 MiB) and leaves headroom on v7x (64 MiB physical)
            vmem_limit_bytes=48 * 1024 * 1024),
    )(*args)

    # slice padded lanes / rows away, restore f32 logits (kernel stores bf16)
    logits = out[:B, :, :FULL_SIZE].astype(jnp.float32)
    # with_targets=False -> targets is None -> loss is None (blur branch untouched)
    return logits, None


# --------------------------- parameter construction ---------------------------
def init_params(key):
    ks = iter(jax.random.split(key, 32))
    std = 0.02
    C = N_EMBD

    def nrm(shape):
        return jax.random.normal(next(ks), shape, jnp.float32) * std

    # fused block-diagonal embedding table, row-padded to 128 (lane-dense one-hot), bf16
    emb_table = jnp.zeros((EMB_ROWS_PAD, C), jnp.float32)
    r0, c0 = 0, 0
    for size, width in ((LAT_SIZE, N_LAT_E), (LON_SIZE, N_LON_E),
                        (SOG_SIZE, N_SOG_E), (COG_SIZE, N_COG_E)):
        emb_table = emb_table.at[r0:r0 + size, c0:c0 + width].set(nrm((size, width)))
        r0 += size
        c0 += width
    emb_table = emb_table.astype(jnp.bfloat16)

    # head (bias=False), zero-padded to 128 output lanes for lane-dense stores, bf16
    w_head = jnp.zeros((C, HEAD_PAD), jnp.float32)
    w_head = w_head.at[:, :FULL_SIZE].set(nrm((C, FULL_SIZE))).astype(jnp.bfloat16)

    # stacked per-layer weights (stored transposed: y = x @ W + b), bf16
    q_scale = 1.0 / math.sqrt(HEAD_DIM)
    w_qkv, w_proj, w_fc1, w_fc2 = [], [], [], []
    for _ in range(N_LAYER):
        w = nrm((C, 3 * C))
        w = w.at[:, :C].multiply(q_scale)          # fold attention scale into Q columns
        w_qkv.append(w)
        w_proj.append(nrm((C, C)))
        w_fc1.append(nrm((C, 4 * C)))
        w_fc2.append(nrm((4 * C, C)))
    w_qkv = jnp.stack(w_qkv).astype(jnp.bfloat16)     # (L, C, 3C)
    w_proj = jnp.stack(w_proj).astype(jnp.bfloat16)   # (L, C, C)
    w_fc1 = jnp.stack(w_fc1).astype(jnp.bfloat16)     # (L, C, 4C)
    w_fc2 = jnp.stack(w_fc2).astype(jnp.bfloat16)     # (L, 4C, C)

    # bias blob (L, 4, 128): row0=qkv(3C), row1=proj(C), row2=fc1(4C), row3=fc2(C).
    # PyTorch init zeroes all Linear biases. (If loading trained weights, the Q
    # part of row 0 must also be multiplied by q_scale to match the fold above.)
    biases = jnp.zeros((N_LAYER, 4, 128), jnp.float32)

    # LN blob (L, 4, C): ln1w, ln1b, ln2w, ln2b  (weights=1, biases=0)
    ln_row = jnp.stack([jnp.ones(C), jnp.zeros(C), jnp.ones(C), jnp.zeros(C)]).astype(jnp.float32)
    ln = jnp.tile(ln_row[None], (N_LAYER, 1, 1))

    # final LN (2, C): weight, bias
    lnf = jnp.stack([jnp.ones(C), jnp.zeros(C)]).astype(jnp.float32)

    return {
        "emb_table": emb_table,
        "pos_emb": jnp.zeros((1, MAX_SEQLEN, C), jnp.float32),   # nn.Parameter(zeros)
        "w_qkv": w_qkv, "w_proj": w_proj, "w_fc1": w_fc1, "w_fc2": w_fc2,
        "biases": biases, "ln": ln, "lnf": lnf,
        "w_head": w_head,
    }


# ---------------------------------- main ---------------------------------------
if __name__ == "__main__":
    key = jax.random.PRNGKey(0)
    k_param, k_x = jax.random.split(key)

    B, T = 2, 16
    x = jax.random.uniform(k_x, (B, T, 4), dtype=jnp.float32)   # truncated to [0,1)

    params = init_params(k_param)
    fwd = jax.jit(traisformer_forward)
    logits, loss = fwd(x, params)
    logits = jax.block_until_ready(logits)

    assert logits.shape == (B, T, FULL_SIZE)
    assert logits.dtype == jnp.float32
    assert loss is None
    print("KERNEL_OK")
</pallas_src>

<mosaic_0001>
module attributes {stable_mosaic.version = 11 : i64} {
  func.func @fused_forward_kernel(%arg0: i32, %arg1: memref<2x16x4xf32, #tpu.memory_space<vmem>>, %arg2: memref<128x32xbf16, #tpu.memory_space<vmem>>, %arg3: memref<16x32xf32, #tpu.memory_space<vmem>>, %arg4: memref<2x32x96xbf16, #tpu.memory_space<vmem>>, %arg5: memref<2x32x32xbf16, #tpu.memory_space<vmem>>, %arg6: memref<2x32x128xbf16, #tpu.memory_space<vmem>>, %arg7: memref<2x128x32xbf16, #tpu.memory_space<vmem>>, %arg8: memref<2x4x128xf32, #tpu.memory_space<vmem>>, %arg9: memref<2x4x32xf32, #tpu.memory_space<vmem>>, %arg10: memref<2x32xf32, #tpu.memory_space<vmem>>, %arg11: memref<32x128xbf16, #tpu.memory_space<vmem>>, %arg12: memref<2x16x128xbf16, #tpu.memory_space<vmem>>) attributes {dimension_semantics = [#tpu.dimension_semantics<parallel>], iteration_bounds = array<i64: 1>, scalar_prefetch = 0 : i64, scratch_operands = 0 : i64, tpu.core_type = #tpu.core_type<tc>, window_params = [{transform_indices = @transform_0, window_bounds = array<i64: 2, 16, 4>}, {pipeline_mode = #tpu.pipeline_mode<synchronous>, transform_indices = @transform_1, window_bounds = array<i64: 128, 32>}, {pipeline_mode = #tpu.pipeline_mode<synchronous>, transform_indices = @transform_2, window_bounds = array<i64: 16, 32>}, {pipeline_mode = #tpu.pipeline_mode<synchronous>, transform_indices = @transform_3, window_bounds = array<i64: 2, 32, 96>}, {pipeline_mode = #tpu.pipeline_mode<synchronous>, transform_indices = @transform_4, window_bounds = array<i64: 2, 32, 32>}, {pipeline_mode = #tpu.pipeline_mode<synchronous>, transform_indices = @transform_5, window_bounds = array<i64: 2, 32, 128>}, {pipeline_mode = #tpu.pipeline_mode<synchronous>, transform_indices = @transform_6, window_bounds = array<i64: 2, 128, 32>}, {pipeline_mode = #tpu.pipeline_mode<synchronous>, transform_indices = @transform_7, window_bounds = array<i64: 2, 4, 128>}, {pipeline_mode = #tpu.pipeline_mode<synchronous>, transform_indices = @transform_8, window_bounds = array<i64: 2, 4, 32>}, {pipeline_mode = #tpu.pipeline_mode<synchronous>, transform_indices = @transform_9, window_bounds = array<i64: 2, 32>}, {pipeline_mode = #tpu.pipeline_mode<synchronous>, transform_indices = @transform_10, window_bounds = array<i64: 32, 128>}, {transform_indices = @transform_11, window_bounds = array<i64: 2, 16, 128>}]} {
    %c0 = arith.constant 0 : index
    %c0_0 = arith.constant 0 : index
    %c0_1 = arith.constant 0 : index
    %0 = vector.load %arg1[%c0, %c0_0, %c0_1] : memref<2x16x4xf32, #tpu.memory_space<vmem>>, vector<2x16x4xf32>
    %1 = vector.shape_cast %0 : vector<2x16x4xf32> to vector<32x4xf32>
    %2 = tpu.iota {dimensions = array<i32: 1>} : vector<32x128xi32>
    %3 = vector.extract_strided_slice %1 {offsets = [0, 0], sizes = [32, 1], strides = [1, 1]} : vector<32x4xf32> to vector<32x1xf32>
    %cst = arith.constant 1.600000e+01 : f32
    %4 = vector.broadcast %cst : f32 to vector<32x1xf32>
    %5 = arith.mulf %3, %4 : vector<32x1xf32>
    %6 = arith.fptosi %5 : vector<32x1xf32> to vector<32x1xi32>
    %c0_i32 = arith.constant 0 : i32
    %c15_i32 = arith.constant 15 : i32
    %7 = vector.broadcast %c0_i32 : i32 to vector<32x1xi32>
    %8 = arith.maxsi %7, %6 : vector<32x1xi32>
    %9 = vector.broadcast %c15_i32 : i32 to vector<32x1xi32>
    %10 = arith.minsi %9, %8 : vector<32x1xi32>
    %c0_i32_2 = arith.constant 0 : i32
    %11 = vector.broadcast %c0_i32_2 : i32 to vector<32x1xi32>
    %12 = arith.addi %10, %11 : vector<32x1xi32>
    %13 = vector.broadcast %12 : vector<32x1xi32> to vector<32x128xi32>
    %14 = arith.cmpi eq, %2, %13 : vector<32x128xi32>
    %15 = vector.extract_strided_slice %1 {offsets = [0, 1], sizes = [32, 1], strides = [1, 1]} : vector<32x4xf32> to vector<32x1xf32>
    %cst_3 = arith.constant 1.600000e+01 : f32
    %16 = vector.broadcast %cst_3 : f32 to vector<32x1xf32>
    %17 = arith.mulf %15, %16 : vector<32x1xf32>
    %18 = arith.fptosi %17 : vector<32x1xf32> to vector<32x1xi32>
    %c0_i32_4 = arith.constant 0 : i32
    %c15_i32_5 = arith.constant 15 : i32
    %19 = vector.broadcast %c0_i32_4 : i32 to vector<32x1xi32>
    %20 = arith.maxsi %19, %18 : vector<32x1xi32>
    %21 = vector.broadcast %c15_i32_5 : i32 to vector<32x1xi32>
    %22 = arith.minsi %21, %20 : vector<32x1xi32>
    %c16_i32 = arith.constant 16 : i32
    %23 = vector.broadcast %c16_i32 : i32 to vector<32x1xi32>
    %24 = arith.addi %22, %23 : vector<32x1xi32>
    %25 = vector.broadcast %24 : vector<32x1xi32> to vector<32x128xi32>
    %26 = arith.cmpi eq, %2, %25 : vector<32x128xi32>
    %27 = arith.ori %14, %26 : vector<32x128xi1>
    %28 = vector.extract_strided_slice %1 {offsets = [0, 2], sizes = [32, 1], strides = [1, 1]} : vector<32x4xf32> to vector<32x1xf32>
    %cst_6 = arith.constant 8.000000e+00 : f32
    %29 = vector.broadcast %cst_6 : f32 to vector<32x1xf32>
    %30 = arith.mulf %28, %29 : vector<32x1xf32>
    %31 = arith.fptosi %30 : vector<32x1xf32> to vector<32x1xi32>
    %c0_i32_7 = arith.constant 0 : i32
    %c7_i32 = arith.constant 7 : i32
    %32 = vector.broadcast %c0_i32_7 : i32 to vector<32x1xi32>
    %33 = arith.maxsi %32, %31 : vector<32x1xi32>
    %34 = vector.broadcast %c7_i32 : i32 to vector<32x1xi32>
    %35 = arith.minsi %34, %33 : vector<32x1xi32>
    %c32_i32 = arith.constant 32 : i32
    %36 = vector.broadcast %c32_i32 : i32 to vector<32x1xi32>
    %37 = arith.addi %35, %36 : vector<32x1xi32>
    %38 = vector.broadcast %37 : vector<32x1xi32> to vector<32x128xi32>
    %39 = arith.cmpi eq, %2, %38 : vector<32x128xi32>
    %40 = arith.ori %27, %39 : vector<32x128xi1>
    %41 = vector.extract_strided_slice %1 {offsets = [0, 3], sizes = [32, 1], strides = [1, 1]} : vector<32x4xf32> to vector<32x1xf32>
    %cst_8 = arith.constant 8.000000e+00 : f32
    %42 = vector.broadcast %cst_8 : f32 to vector<32x1xf32>
    %43 = arith.mulf %41, %42 : vector<32x1xf32>
    %44 = arith.fptosi %43 : vector<32x1xf32> to vector<32x1xi32>
    %c0_i32_9 = arith.constant 0 : i32
    %c7_i32_10 = arith.constant 7 : i32
    %45 = vector.broadcast %c0_i32_9 : i32 to vector<32x1xi32>
    %46 = arith.maxsi %45, %44 : vector<32x1xi32>
    %47 = vector.broadcast %c7_i32_10 : i32 to vector<32x1xi32>
    %48 = arith.minsi %47, %46 : vector<32x1xi32>
    %c40_i32 = arith.constant 40 : i32
    %49 = vector.broadcast %c40_i32 : i32 to vector<32x1xi32>
    %50 = arith.addi %48, %49 : vector<32x1xi32>
    %51 = vector.broadcast %50 : vector<32x1xi32> to vector<32x128xi32>
    %52 = arith.cmpi eq, %2, %51 : vector<32x128xi32>
    %53 = arith.ori %40, %52 : vector<32x128xi1>
    %cst_11 = arith.constant 1.000000e+00 : f32
    %cst_12 = arith.constant 0.000000e+00 : f32
    %54 = vector.broadcast %cst_11 : f32 to vector<32x128xf32>
    %55 = vector.broadcast %cst_12 : f32 to vector<32x128xf32>
    %56 = arith.select %53, %54, %55 : vector<32x128xi1>, vector<32x128xf32>
    %57 = arith.truncf %56 : vector<32x128xf32> to vector<32x128xbf16>
    %c0_13 = arith.constant 0 : index
    %c0_14 = arith.constant 0 : index
    %58 = vector.load %arg2[%c0_13, %c0_14] : memref<128x32xbf16, #tpu.memory_space<vmem>>, vector<128x32xbf16>
    %cst_15 = arith.constant dense<0.000000e+00> : vector<32x32xf32>
    %59 = tpu.matmul %57, %58, %cst_15 {dimension_numbers = #tpu.dot_dimension_numbers<[1], [0], [0], [1], [0, 0, 1, 1], [], []>} : vector<32x128xbf16>, vector<128x32xbf16>, vector<32x32xf32> -> vector<32x32xf32>
    %60 = vector.shape_cast %59 : vector<32x32xf32> to vector<2x16x32xf32>
    %c0_16 = arith.constant 0 : index
    %c0_17 = arith.constant 0 : index
    %61 = vector.load %arg3[%c0_16, %c0_17] : memref<16x32xf32, #tpu.memory_space<vmem>>, vector<16x32xf32>
    %62 = vector.shape_cast %61 : vector<16x32xf32> to vector<1x16x32xf32>
    %63 = vector.broadcast %62 : vector<1x16x32xf32> to vector<2x16x32xf32>
    %64 = arith.addf %60, %63 : vector<2x16x32xf32>
    %65 = vector.shape_cast %64 : vector<2x16x32xf32> to vector<32x32xf32>
    %66 = tpu.iota {dimensions = array<i32: 0>} : vector<16x16xi32>
    %67 = tpu.iota {dimensions = array<i32: 1>} : vector<16x16xi32>
    %68 = arith.cmpi sge, %66, %67 : vector<16x16xi32>
    %cst_18 = arith.constant 0.000000e+00 : f32
    %cst_19 = arith.constant -1.000000e+30 : f32
    %69 = vector.broadcast %cst_18 : f32 to vector<16x16xf32>
    %70 = vector.broadcast %cst_19 : f32 to vector<16x16xf32>
    %71 = arith.select %68, %69, %70 : vector<16x16xi1>, vector<16x16xf32>
    %72 = vector.shape_cast %71 : vector<16x16xf32> to vector<1x16x16xf32>
    %73 = vector.shape_cast %72 : vector<1x16x16xf32> to vector<1x16x16xf32>
    %74 = vector.broadcast %73 : vector<1x16x16xf32> to vector<2x16x16xf32>
    %c0_20 = arith.constant 0 : index
    %c0_21 = arith.constant 0 : index
    %c0_22 = arith.constant 0 : index
    %75 = vector.load %arg9[%c0_20, %c0_21, %c0_22] : memref<2x4x32xf32, #tpu.memory_space<vmem>>, vector<1x4x32xf32>
    %76 = vector.shape_cast %75 : vector<1x4x32xf32> to vector<4x32xf32>
    %c0_23 = arith.constant 0 : index
    %c0_24 = arith.constant 0 : index
    %c0_25 = arith.constant 0 : index
    %77 = vector.load %arg8[%c0_23, %c0_24, %c0_25] : memref<2x4x128xf32, #tpu.memory_space<vmem>>, vector<1x4x128xf32>
    %78 = vector.shape_cast %77 : vector<1x4x128xf32> to vector<4x128xf32>
    %79 = vector.extract_strided_slice %78 {offsets = [0, 0], sizes = [1, 96], strides = [1, 1]} : vector<4x128xf32> to vector<1x96xf32>
    %80 = vector.shape_cast %79 : vector<1x96xf32> to vector<96xf32>
    %81 = vector.extract_strided_slice %78 {offsets = [1, 0], sizes = [1, 32], strides = [1, 1]} : vector<4x128xf32> to vector<1x32xf32>
    %82 = vector.shape_cast %81 : vector<1x32xf32> to vector<32xf32>
    %83 = vector.extract_strided_slice %78 {offsets = [2, 0], sizes = [1, 128], strides = [1, 1]} : vector<4x128xf32> to vector<1x128xf32>
    %84 = vector.shape_cast %83 : vector<1x128xf32> to vector<128xf32>
    %85 = vector.extract_strided_slice %78 {offsets = [3, 0], sizes = [1, 32], strides = [1, 1]} : vector<4x128xf32> to vector<1x32xf32>
    %86 = vector.shape_cast %85 : vector<1x32xf32> to vector<32xf32>
    %87 = vector.extract_strided_slice %76 {offsets = [0, 0], sizes = [1, 32], strides = [1, 1]} : vector<4x32xf32> to vector<1x32xf32>
    %88 = vector.shape_cast %87 : vector<1x32xf32> to vector<32xf32>
    %89 = vector.extract_strided_slice %76 {offsets = [1, 0], sizes = [1, 32], strides = [1, 1]} : vector<4x32xf32> to vector<1x32xf32>
    %90 = vector.shape_cast %89 : vector<1x32xf32> to vector<32xf32>
    %cst_26 = arith.constant dense<0.000000e+00> : vector<32xf32>
    %91 = vector.multi_reduction <add>, %65, %cst_26 [1] : vector<32x32xf32> to vector<32xf32>
    %92 = vector.shape_cast %91 : vector<32xf32> to vector<32x1xf32>
    %cst_27 = arith.constant 3.200000e+01 : f32
    %93 = vector.broadcast %cst_27 : f32 to vector<32x1xf32>
    %94 = arith.divf %92, %93 : vector<32x1xf32>
    %95 = vector.broadcast %94 : vector<32x1xf32> to vector<32x32xf32>
    %96 = arith.subf %65, %95 : vector<32x32xf32>
    %97 = arith.mulf %96, %96 : vector<32x32xf32>
    %cst_28 = arith.constant dense<0.000000e+00> : vector<32xf32>
    %98 = vector.multi_reduction <add>, %97, %cst_28 [1] : vector<32x32xf32> to vector<32xf32>
    %99 = vector.shape_cast %98 : vector<32xf32> to vector<32x1xf32>
    %cst_29 = arith.constant 3.200000e+01 : f32
    %100 = vector.broadcast %cst_29 : f32 to vector<32x1xf32>
    %101 = arith.divf %99, %100 : vector<32x1xf32>
    %102 = vector.broadcast %94 : vector<32x1xf32> to vector<32x32xf32>
    %103 = arith.subf %65, %102 : vector<32x32xf32>
    %cst_30 = arith.constant 9.99999974E-6 : f32
    %104 = vector.broadcast %cst_30 : f32 to vector<32x1xf32>
    %105 = arith.addf %101, %104 : vector<32x1xf32>
    %106 = math.rsqrt %105 : vector<32x1xf32>
    %107 = vector.broadcast %106 : vector<32x1xf32> to vector<32x32xf32>
    %108 = arith.mulf %103, %107 : vector<32x32xf32>
    %109 = vector.shape_cast %88 : vector<32xf32> to vector<1x32xf32>
    %110 = vector.broadcast %109 : vector<1x32xf32> to vector<32x32xf32>
    %111 = arith.mulf %108, %110 : vector<32x32xf32>
    %112 = vector.shape_cast %90 : vector<32xf32> to vector<1x32xf32>
    %113 = vector.broadcast %112 : vector<1x32xf32> to vector<32x32xf32>
    %114 = arith.addf %111, %113 : vector<32x32xf32>
    %115 = arith.truncf %114 : vector<32x32xf32> to vector<32x32xbf16>
    %c0_31 = arith.constant 0 : index
    %c0_32 = arith.constant 0 : index
    %c0_33 = arith.constant 0 : index
    %116 = vector.load %arg4[%c0_31, %c0_32, %c0_33] : memref<2x32x96xbf16, #tpu.memory_space<vmem>>, vector<1x32x96xbf16>
    %117 = vector.shape_cast %116 : vector<1x32x96xbf16> to vector<32x96xbf16>
    %cst_34 = arith.constant dense<0.000000e+00> : vector<32x96xf32>
    %118 = tpu.matmul %115, %117, %cst_34 {dimension_numbers = #tpu.dot_dimension_numbers<[1], [0], [0], [1], [0, 0, 1, 1], [], []>} : vector<32x32xbf16>, vector<32x96xbf16>, vector<32x96xf32> -> vector<32x96xf32>
    %119 = vector.shape_cast %80 : vector<96xf32> to vector<1x96xf32>
    %120 = vector.broadcast %119 : vector<1x96xf32> to vector<32x96xf32>
    %121 = arith.addf %118, %120 : vector<32x96xf32>
    %122 = arith.truncf %121 : vector<32x96xf32> to vector<32x96xbf16>
    %123 = vector.extract_strided_slice %122 {offsets = [0, 0], sizes = [32, 8], strides = [1, 1]} : vector<32x96xbf16> to vector<32x8xbf16>
    %124 = vector.shape_cast %123 : vector<32x8xbf16> to vector<2x16x8xbf16>
    %125 = vector.extract_strided_slice %122 {offsets = [0, 32], sizes = [32, 8], strides = [1, 1]} : vector<32x96xbf16> to vector<32x8xbf16>
    %126 = vector.shape_cast %125 : vector<32x8xbf16> to vector<2x16x8xbf16>
    %127 = vector.extract_strided_slice %122 {offsets = [0, 64], sizes = [32, 8], strides = [1, 1]} : vector<32x96xbf16> to vector<32x8xbf16>
    %128 = vector.shape_cast %127 : vector<32x8xbf16> to vector<2x16x8xbf16>
    "tpu.trace_start"() <{level = 10 : i32, message = "btd,bsd->bts"}> : () -> ()
    %cst_35 = arith.constant dense<0.000000e+00> : vector<2x16x16xf32>
    %129 = tpu.matmul %124, %126, %cst_35 {dimension_numbers = #tpu.dot_dimension_numbers<[2], [2], [1], [1], [0, 0, 0, 1, 1, 1], [0], [0]>} : vector<2x16x8xbf16>, vector<2x16x8xbf16>, vector<2x16x16xf32> -> vector<2x16x16xf32>
    "tpu.trace_stop"() : () -> ()
    %130 = arith.addf %129, %74 : vector<2x16x16xf32>
    %cst_36 = arith.constant dense<0xFF800000> : vector<2x16xf32>
    %131 = vector.multi_reduction <maximumf>, %130, %cst_36 [2] : vector<2x16x16xf32> to vector<2x16xf32>
    %132 = vector.shape_cast %131 : vector<2x16xf32> to vector<2x16x1xf32>
    %133 = vector.broadcast %132 : vector<2x16x1xf32> to vector<2x16x16xf32>
    %134 = arith.subf %130, %133 : vector<2x16x16xf32>
    %135 = math.exp %134 : vector<2x16x16xf32>
    %cst_37 = arith.constant dense<0.000000e+00> : vector<2x16xf32>
    %136 = vector.multi_reduction <add>, %135, %cst_37 [2] : vector<2x16x16xf32> to vector<2x16xf32>
    %137 = vector.shape_cast %136 : vector<2x16xf32> to vector<2x16x1xf32>
    %138 = tpu.reciprocal %137 {approx = true} : vector<2x16x1xf32> -> vector<2x16x1xf32>
    %139 = vector.broadcast %138 : vector<2x16x1xf32> to vector<2x16x16xf32>
    %140 = arith.mulf %135, %139 : vector<2x16x16xf32>
    %141 = arith.truncf %140 : vector<2x16x16xf32> to vector<2x16x16xbf16>
    "tpu.trace_start"() <{level = 10 : i32, message = "bts,bsd->btd"}> : () -> ()
    %cst_38 = arith.constant dense<0.000000e+00> : vector<2x16x8xf32>
    %142 = tpu.matmul %141, %128, %cst_38 {dimension_numbers = #tpu.dot_dimension_numbers<[2], [1], [1], [2], [0, 0, 0, 1, 1, 2], [0], [0]>} : vector<2x16x16xbf16>, vector<2x16x8xbf16>, vector<2x16x8xf32> -> vector<2x16x8xf32>
    "tpu.trace_stop"() : () -> ()
    %143 = vector.extract_strided_slice %122 {offsets = [0, 8], sizes = [32, 8], strides = [1, 1]} : vector<32x96xbf16> to vector<32x8xbf16>
    %144 = vector.shape_cast %143 : vector<32x8xbf16> to vector<2x16x8xbf16>
    %145 = vector.extract_strided_slice %122 {offsets = [0, 40], sizes = [32, 8], strides = [1, 1]} : vector<32x96xbf16> to vector<32x8xbf16>
    %146 = vector.shape_cast %145 : vector<32x8xbf16> to vector<2x16x8xbf16>
    %147 = vector.extract_strided_slice %122 {offsets = [0, 72], sizes = [32, 8], strides = [1, 1]} : vector<32x96xbf16> to vector<32x8xbf16>
    %148 = vector.shape_cast %147 : vector<32x8xbf16> to vector<2x16x8xbf16>
    "tpu.trace_start"() <{level = 10 : i32, message = "btd,bsd->bts"}> : () -> ()
    %cst_39 = arith.constant dense<0.000000e+00> : vector<2x16x16xf32>
    %149 = tpu.matmul %144, %146, %cst_39 {dimension_numbers = #tpu.dot_dimension_numbers<[2], [2], [1], [1], [0, 0, 0, 1, 1, 1], [0], [0]>} : vector<2x16x8xbf16>, vector<2x16x8xbf16>, vector<2x16x16xf32> -> vector<2x16x16xf32>
    "tpu.trace_stop"() : () -> ()
    %150 = arith.addf %149, %74 : vector<2x16x16xf32>
    %cst_40 = arith.constant dense<0xFF800000> : vector<2x16xf32>
    %151 = vector.multi_reduction <maximumf>, %150, %cst_40 [2] : vector<2x16x16xf32> to vector<2x16xf32>
    %152 = vector.shape_cast %151 : vector<2x16xf32> to vector<2x16x1xf32>
    %153 = vector.broadcast %152 : vector<2x16x1xf32> to vector<2x16x16xf32>
    %154 = arith.subf %150, %153 : vector<2x16x16xf32>
    %155 = math.exp %154 : vector<2x16x16xf32>
    %cst_41 = arith.constant dense<0.000000e+00> : vector<2x16xf32>
    %156 = vector.multi_reduction <add>, %155, %cst_41 [2] : vector<2x16x16xf32> to vector<2x16xf32>
    %157 = vector.shape_cast %156 : vector<2x16xf32> to vector<2x16x1xf32>
    %158 = tpu.reciprocal %157 {approx = true} : vector<2x16x1xf32> -> vector<2x16x1xf32>
    %159 = vector.broadcast %158 : vector<2x16x1xf32> to vector<2x16x16xf32>
    %160 = arith.mulf %155, %159 : vector<2x16x16xf32>
    %161 = arith.truncf %160 : vector<2x16x16xf32> to vector<2x16x16xbf16>
    "tpu.trace_start"() <{level = 10 : i32, message = "bts,bsd->btd"}> : () -> ()
    %cst_42 = arith.constant dense<0.000000e+00> : vector<2x16x8xf32>
    %162 = tpu.matmul %161, %148, %cst_42 {dimension_numbers = #tpu.dot_dimension_numbers<[2], [1], [1], [2], [0, 0, 0, 1, 1, 2], [0], [0]>} : vector<2x16x16xbf16>, vector<2x16x8xbf16>, vector<2x16x8xf32> -> vector<2x16x8xf32>
    "tpu.trace_stop"() : () -> ()
    %163 = vector.extract_strided_slice %122 {offsets = [0, 16], sizes = [32, 8], strides = [1, 1]} : vector<32x96xbf16> to vector<32x8xbf16>
    %164 = vector.shape_cast %163 : vector<32x8xbf16> to vector<2x16x8xbf16>
    %165 = vector.extract_strided_slice %122 {offsets = [0, 48], sizes = [32, 8], strides = [1, 1]} : vector<32x96xbf16> to vector<32x8xbf16>
    %166 = vector.shape_cast %165 : vector<32x8xbf16> to vector<2x16x8xbf16>
    %167 = vector.extract_strided_slice %122 {offsets = [0, 80], sizes = [32, 8], strides = [1, 1]} : vector<32x96xbf16> to vector<32x8xbf16>
    %168 = vector.shape_cast %167 : vector<32x8xbf16> to vector<2x16x8xbf16>
    "tpu.trace_start"() <{level = 10 : i32, message = "btd,bsd->bts"}> : () -> ()
    %cst_43 = arith.constant dense<0.000000e+00> : vector<2x16x16xf32>
    %169 = tpu.matmul %164, %166, %cst_43 {dimension_numbers = #tpu.dot_dimension_numbers<[2], [2], [1], [1], [0, 0, 0, 1, 1, 1], [0], [0]>} : vector<2x16x8xbf16>, vector<2x16x8xbf16>, vector<2x16x16xf32> -> vector<2x16x16xf32>
    "tpu.trace_stop"() : () -> ()
    %170 = arith.addf %169, %74 : vector<2x16x16xf32>
    %cst_44 = arith.constant dense<0xFF800000> : vector<2x16xf32>
    %171 = vector.multi_reduction <maximumf>, %170, %cst_44 [2] : vector<2x16x16xf32> to vector<2x16xf32>
    %172 = vector.shape_cast %171 : vector<2x16xf32> to vector<2x16x1xf32>
    %173 = vector.broadcast %172 : vector<2x16x1xf32> to vector<2x16x16xf32>
    %174 = arith.subf %170, %173 : vector<2x16x16xf32>
    %175 = math.exp %174 : vector<2x16x16xf32>
    %cst_45 = arith.constant dense<0.000000e+00> : vector<2x16xf32>
    %176 = vector.multi_reduction <add>, %175, %cst_45 [2] : vector<2x16x16xf32> to vector<2x16xf32>
    %177 = vector.shape_cast %176 : vector<2x16xf32> to vector<2x16x1xf32>
    %178 = tpu.reciprocal %177 {approx = true} : vector<2x16x1xf32> -> vector<2x16x1xf32>
    %179 = vector.broadcast %178 : vector<2x16x1xf32> to vector<2x16x16xf32>
    %180 = arith.mulf %175, %179 : vector<2x16x16xf32>
    %181 = arith.truncf %180 : vector<2x16x16xf32> to vector<2x16x16xbf16>
    "tpu.trace_start"() <{level = 10 : i32, message = "bts,bsd->btd"}> : () -> ()
    %cst_46 = arith.constant dense<0.000000e+00> : vector<2x16x8xf32>
    %182 = tpu.matmul %181, %168, %cst_46 {dimension_numbers = #tpu.dot_dimension_numbers<[2], [1], [1], [2], [0, 0, 0, 1, 1, 2], [0], [0]>} : vector<2x16x16xbf16>, vector<2x16x8xbf16>, vector<2x16x8xf32> -> vector<2x16x8xf32>
    "tpu.trace_stop"() : () -> ()
    %183 = vector.extract_strided_slice %122 {offsets = [0, 24], sizes = [32, 8], strides = [1, 1]} : vector<32x96xbf16> to vector<32x8xbf16>
    %184 = vector.shape_cast %183 : vector<32x8xbf16> to vector<2x16x8xbf16>
    %185 = vector.extract_strided_slice %122 {offsets = [0, 56], sizes = [32, 8], strides = [1, 1]} : vector<32x96xbf16> to vector<32x8xbf16>
    %186 = vector.shape_cast %185 : vector<32x8xbf16> to vector<2x16x8xbf16>
    %187 = vector.extract_strided_slice %122 {offsets = [0, 88], sizes = [32, 8], strides = [1, 1]} : vector<32x96xbf16> to vector<32x8xbf16>
    %188 = vector.shape_cast %187 : vector<32x8xbf16> to vector<2x16x8xbf16>
    "tpu.trace_start"() <{level = 10 : i32, message = "btd,bsd->bts"}> : () -> ()
    %cst_47 = arith.constant dense<0.000000e+00> : vector<2x16x16xf32>
    %189 = tpu.matmul %184, %186, %cst_47 {dimension_numbers = #tpu.dot_dimension_numbers<[2], [2], [1], [1], [0, 0, 0, 1, 1, 1], [0], [0]>} : vector<2x16x8xbf16>, vector<2x16x8xbf16>, vector<2x16x16xf32> -> vector<2x16x16xf32>
    "tpu.trace_stop"() : () -> ()
    %190 = arith.addf %189, %74 : vector<2x16x16xf32>
    %cst_48 = arith.constant dense<0xFF800000> : vector<2x16xf32>
    %191 = vector.multi_reduction <maximumf>, %190, %cst_48 [2] : vector<2x16x16xf32> to vector<2x16xf32>
    %192 = vector.shape_cast %191 : vector<2x16xf32> to vector<2x16x1xf32>
    %193 = vector.broadcast %192 : vector<2x16x1xf32> to vector<2x16x16xf32>
    %194 = arith.subf %190, %193 : vector<2x16x16xf32>
    %195 = math.exp %194 : vector<2x16x16xf32>
    %cst_49 = arith.constant dense<0.000000e+00> : vector<2x16xf32>
    %196 = vector.multi_reduction <add>, %195, %cst_49 [2] : vector<2x16x16xf32> to vector<2x16xf32>
    %197 = vector.shape_cast %196 : vector<2x16xf32> to vector<2x16x1xf32>
    %198 = tpu.reciprocal %197 {approx = true} : vector<2x16x1xf32> -> vector<2x16x1xf32>
    %199 = vector.broadcast %198 : vector<2x16x1xf32> to vector<2x16x16xf32>
    %200 = arith.mulf %195, %199 : vector<2x16x16xf32>
    %201 = arith.truncf %200 : vector<2x16x16xf32> to vector<2x16x16xbf16>
    "tpu.trace_start"() <{level = 10 : i32, message = "bts,bsd->btd"}> : () -> ()
    %cst_50 = arith.constant dense<0.000000e+00> : vector<2x16x8xf32>
    %202 = tpu.matmul %201, %188, %cst_50 {dimension_numbers = #tpu.dot_dimension_numbers<[2], [1], [1], [2], [0, 0, 0, 1, 1, 2], [0], [0]>} : vector<2x16x16xbf16>, vector<2x16x8xbf16>, vector<2x16x8xf32> -> vector<2x16x8xf32>
    "tpu.trace_stop"() : () -> ()
    %203 = tpu.concatenate %142, %162, %182, %202 in 2 : vector<2x16x8xf32>, vector<2x16x8xf32>, vector<2x16x8xf32>, vector<2x16x8xf32> -> vector<2x16x32xf32>
    %204 = vector.shape_cast %203 : vector<2x16x32xf32> to vector<32x32xf32>
    %205 = arith.truncf %204 : vector<32x32xf32> to vector<32x32xbf16>
    %c0_51 = arith.constant 0 : index
    %c0_52 = arith.constant 0 : index
    %c0_53 = arith.constant 0 : index
    %206 = vector.load %arg5[%c0_51, %c0_52, %c0_53] : memref<2x32x32xbf16, #tpu.memory_space<vmem>>, vector<1x32x32xbf16>
    %207 = vector.shape_cast %206 : vector<1x32x32xbf16> to vector<32x32xbf16>
    %cst_54 = arith.constant dense<0.000000e+00> : vector<32x32xf32>
    %208 = tpu.matmul %205, %207, %cst_54 {dimension_numbers = #tpu.dot_dimension_numbers<[1], [0], [0], [1], [0, 0, 1, 1], [], []>} : vector<32x32xbf16>, vector<32x32xbf16>, vector<32x32xf32> -> vector<32x32xf32>
    %209 = vector.shape_cast %82 : vector<32xf32> to vector<1x32xf32>
    %210 = vector.broadcast %209 : vector<1x32xf32> to vector<32x32xf32>
    %211 = arith.addf %208, %210 : vector<32x32xf32>
    %212 = arith.addf %65, %211 : vector<32x32xf32>
    %213 = vector.extract_strided_slice %76 {offsets = [2, 0], sizes = [1, 32], strides = [1, 1]} : vector<4x32xf32> to vector<1x32xf32>
    %214 = vector.shape_cast %213 : vector<1x32xf32> to vector<32xf32>
    %215 = vector.extract_strided_slice %76 {offsets = [3, 0], sizes = [1, 32], strides = [1, 1]} : vector<4x32xf32> to vector<1x32xf32>
    %216 = vector.shape_cast %215 : vector<1x32xf32> to vector<32xf32>
    %cst_55 = arith.constant dense<0.000000e+00> : vector<32xf32>
    %217 = vector.multi_reduction <add>, %212, %cst_55 [1] : vector<32x32xf32> to vector<32xf32>
    %218 = vector.shape_cast %217 : vector<32xf32> to vector<32x1xf32>
    %cst_56 = arith.constant 3.200000e+01 : f32
    %219 = vector.broadcast %cst_56 : f32 to vector<32x1xf32>
    %220 = arith.divf %218, %219 : vector<32x1xf32>
    %221 = vector.broadcast %220 : vector<32x1xf32> to vector<32x32xf32>
    %222 = arith.subf %212, %221 : vector<32x32xf32>
    %223 = arith.mulf %222, %222 : vector<32x32xf32>
    %cst_57 = arith.constant dense<0.000000e+00> : vector<32xf32>
    %224 = vector.multi_reduction <add>, %223, %cst_57 [1] : vector<32x32xf32> to vector<32xf32>
    %225 = vector.shape_cast %224 : vector<32xf32> to vector<32x1xf32>
    %cst_58 = arith.constant 3.200000e+01 : f32
    %226 = vector.broadcast %cst_58 : f32 to vector<32x1xf32>
    %227 = arith.divf %225, %226 : vector<32x1xf32>
    %228 = vector.broadcast %220 : vector<32x1xf32> to vector<32x32xf32>
    %229 = arith.subf %212, %228 : vector<32x32xf32>
    %cst_59 = arith.constant 9.99999974E-6 : f32
    %230 = vector.broadcast %cst_59 : f32 to vector<32x1xf32>
    %231 = arith.addf %227, %230 : vector<32x1xf32>
    %232 = math.rsqrt %231 : vector<32x1xf32>
    %233 = vector.broadcast %232 : vector<32x1xf32> to vector<32x32xf32>
    %234 = arith.mulf %229, %233 : vector<32x32xf32>
    %235 = vector.shape_cast %214 : vector<32xf32> to vector<1x32xf32>
    %236 = vector.broadcast %235 : vector<1x32xf32> to vector<32x32xf32>
    %237 = arith.mulf %234, %236 : vector<32x32xf32>
    %238 = vector.shape_cast %216 : vector<32xf32> to vector<1x32xf32>
    %239 = vector.broadcast %238 : vector<1x32xf32> to vector<32x32xf32>
    %240 = arith.addf %237, %239 : vector<32x32xf32>
    %241 = arith.truncf %240 : vector<32x32xf32> to vector<32x32xbf16>
    %c0_60 = arith.constant 0 : index
    %c0_61 = arith.constant 0 : index
    %c0_62 = arith.constant 0 : index
    %242 = vector.load %arg6[%c0_60, %c0_61, %c0_62] : memref<2x32x128xbf16, #tpu.memory_space<vmem>>, vector<1x32x128xbf16>
    %243 = vector.shape_cast %242 : vector<1x32x128xbf16> to vector<32x128xbf16>
    %cst_63 = arith.constant dense<0.000000e+00> : vector<32x128xf32>
    %244 = tpu.matmul %241, %243, %cst_63 {dimension_numbers = #tpu.dot_dimension_numbers<[1], [0], [0], [1], [0, 0, 1, 1], [], []>} : vector<32x32xbf16>, vector<32x128xbf16>, vector<32x128xf32> -> vector<32x128xf32>
    %245 = vector.shape_cast %84 : vector<128xf32> to vector<1x128xf32>
    %246 = vector.broadcast %245 : vector<1x128xf32> to vector<32x128xf32>
    %247 = arith.addf %244, %246 : vector<32x128xf32>
    %cst_64 = arith.constant 5.000000e-01 : f32
    %248 = vector.broadcast %cst_64 : f32 to vector<32x128xf32>
    %249 = arith.mulf %248, %247 : vector<32x128xf32>
    %cst_65 = arith.constant 4.471500e-02 : f32
    %250 = vector.broadcast %cst_65 : f32 to vector<32x128xf32>
    %251 = arith.mulf %250, %247 : vector<32x128xf32>
    %252 = arith.mulf %251, %247 : vector<32x128xf32>
    %253 = arith.mulf %252, %247 : vector<32x128xf32>
    %254 = arith.addf %247, %253 : vector<32x128xf32>
    %cst_66 = arith.constant 0.797884583 : f32
    %255 = vector.broadcast %cst_66 : f32 to vector<32x128xf32>
    %256 = arith.mulf %255, %254 : vector<32x128xf32>
    %257 = math.tanh %256 : vector<32x128xf32>
    %cst_67 = arith.constant 1.000000e+00 : f32
    %258 = vector.broadcast %cst_67 : f32 to vector<32x128xf32>
    %259 = arith.addf %258, %257 : vector<32x128xf32>
    %260 = arith.mulf %249, %259 : vector<32x128xf32>
    %261 = arith.truncf %260 : vector<32x128xf32> to vector<32x128xbf16>
    %c0_68 = arith.constant 0 : index
    %c0_69 = arith.constant 0 : index
    %c0_70 = arith.constant 0 : index
    %262 = vector.load %arg7[%c0_68, %c0_69, %c0_70] : memref<2x128x32xbf16, #tpu.memory_space<vmem>>, vector<1x128x32xbf16>
    %263 = vector.shape_cast %262 : vector<1x128x32xbf16> to vector<128x32xbf16>
    %cst_71 = arith.constant dense<0.000000e+00> : vector<32x32xf32>
    %264 = tpu.matmul %261, %263, %cst_71 {dimension_numbers = #tpu.dot_dimension_numbers<[1], [0], [0], [1], [0, 0, 1, 1], [], []>} : vector<32x128xbf16>, vector<128x32xbf16>, vector<32x32xf32> -> vector<32x32xf32>
    %265 = arith.addf %212, %264 : vector<32x32xf32>
    %266 = vector.shape_cast %86 : vector<32xf32> to vector<1x32xf32>
    %267 = vector.broadcast %266 : vector<1x32xf32> to vector<32x32xf32>
    %268 = arith.addf %265, %267 : vector<32x32xf32>
    %c1 = arith.constant 1 : index
    %c0_72 = arith.constant 0 : index
    %c0_73 = arith.constant 0 : index
    %269 = vector.load %arg9[%c1, %c0_72, %c0_73] : memref<2x4x32xf32, #tpu.memory_space<vmem>>, vector<1x4x32xf32>
    %270 = vector.shape_cast %269 : vector<1x4x32xf32> to vector<4x32xf32>
    %c1_74 = arith.constant 1 : index
    %c0_75 = arith.constant 0 : index
    %c0_76 = arith.constant 0 : index
    %271 = vector.load %arg8[%c1_74, %c0_75, %c0_76] : memref<2x4x128xf32, #tpu.memory_space<vmem>>, vector<1x4x128xf32>
    %272 = vector.shape_cast %271 : vector<1x4x128xf32> to vector<4x128xf32>
    %273 = vector.extract_strided_slice %272 {offsets = [0, 0], sizes = [1, 96], strides = [1, 1]} : vector<4x128xf32> to vector<1x96xf32>
    %274 = vector.shape_cast %273 : vector<1x96xf32> to vector<96xf32>
    %275 = vector.extract_strided_slice %272 {offsets = [1, 0], sizes = [1, 32], strides = [1, 1]} : vector<4x128xf32> to vector<1x32xf32>
    %276 = vector.shape_cast %275 : vector<1x32xf32> to vector<32xf32>
    %277 = vector.extract_strided_slice %272 {offsets = [2, 0], sizes = [1, 128], strides = [1, 1]} : vector<4x128xf32> to vector<1x128xf32>
    %278 = vector.shape_cast %277 : vector<1x128xf32> to vector<128xf32>
    %279 = vector.extract_strided_slice %272 {offsets = [3, 0], sizes = [1, 32], strides = [1, 1]} : vector<4x128xf32> to vector<1x32xf32>
    %280 = vector.shape_cast %279 : vector<1x32xf32> to vector<32xf32>
    %281 = vector.extract_strided_slice %270 {offsets = [0, 0], sizes = [1, 32], strides = [1, 1]} : vector<4x32xf32> to vector<1x32xf32>
    %282 = vector.shape_cast %281 : vector<1x32xf32> to vector<32xf32>
    %283 = vector.extract_strided_slice %270 {offsets = [1, 0], sizes = [1, 32], strides = [1, 1]} : vector<4x32xf32> to vector<1x32xf32>
    %284 = vector.shape_cast %283 : vector<1x32xf32> to vector<32xf32>
    %cst_77 = arith.constant dense<0.000000e+00> : vector<32xf32>
    %285 = vector.multi_reduction <add>, %268, %cst_77 [1] : vector<32x32xf32> to vector<32xf32>
    %286 = vector.shape_cast %285 : vector<32xf32> to vector<32x1xf32>
    %cst_78 = arith.constant 3.200000e+01 : f32
    %287 = vector.broadcast %cst_78 : f32 to vector<32x1xf32>
    %288 = arith.divf %286, %287 : vector<32x1xf32>
    %289 = vector.broadcast %288 : vector<32x1xf32> to vector<32x32xf32>
    %290 = arith.subf %268, %289 : vector<32x32xf32>
    %291 = arith.mulf %290, %290 : vector<32x32xf32>
    %cst_79 = arith.constant dense<0.000000e+00> : vector<32xf32>
    %292 = vector.multi_reduction <add>, %291, %cst_79 [1] : vector<32x32xf32> to vector<32xf32>
    %293 = vector.shape_cast %292 : vector<32xf32> to vector<32x1xf32>
    %cst_80 = arith.constant 3.200000e+01 : f32
    %294 = vector.broadcast %cst_80 : f32 to vector<32x1xf32>
    %295 = arith.divf %293, %294 : vector<32x1xf32>
    %296 = vector.broadcast %288 : vector<32x1xf32> to vector<32x32xf32>
    %297 = arith.subf %268, %296 : vector<32x32xf32>
    %cst_81 = arith.constant 9.99999974E-6 : f32
    %298 = vector.broadcast %cst_81 : f32 to vector<32x1xf32>
    %299 = arith.addf %295, %298 : vector<32x1xf32>
    %300 = math.rsqrt %299 : vector<32x1xf32>
    %301 = vector.broadcast %300 : vector<32x1xf32> to vector<32x32xf32>
    %302 = arith.mulf %297, %301 : vector<32x32xf32>
    %303 = vector.shape_cast %282 : vector<32xf32> to vector<1x32xf32>
    %304 = vector.broadcast %303 : vector<1x32xf32> to vector<32x32xf32>
    %305 = arith.mulf %302, %304 : vector<32x32xf32>
    %306 = vector.shape_cast %284 : vector<32xf32> to vector<1x32xf32>
    %307 = vector.broadcast %306 : vector<1x32xf32> to vector<32x32xf32>
    %308 = arith.addf %305, %307 : vector<32x32xf32>
    %309 = arith.truncf %308 : vector<32x32xf32> to vector<32x32xbf16>
    %c1_82 = arith.constant 1 : index
    %c0_83 = arith.constant 0 : index
    %c0_84 = arith.constant 0 : index
    %310 = vector.load %arg4[%c1_82, %c0_83, %c0_84] : memref<2x32x96xbf16, #tpu.memory_space<vmem>>, vector<1x32x96xbf16>
    %311 = vector.shape_cast %310 : vector<1x32x96xbf16> to vector<32x96xbf16>
    %cst_85 = arith.constant dense<0.000000e+00> : vector<32x96xf32>
    %312 = tpu.matmul %309, %311, %cst_85 {dimension_numbers = #tpu.dot_dimension_numbers<[1], [0], [0], [1], [0, 0, 1, 1], [], []>} : vector<32x32xbf16>, vector<32x96xbf16>, vector<32x96xf32> -> vector<32x96xf32>
    %313 = vector.shape_cast %274 : vector<96xf32> to vector<1x96xf32>
    %314 = vector.broadcast %313 : vector<1x96xf32> to vector<32x96xf32>
    %315 = arith.addf %312, %314 : vector<32x96xf32>
    %316 = arith.truncf %315 : vector<32x96xf32> to vector<32x96xbf16>
    %317 = vector.extract_strided_slice %316 {offsets = [0, 0], sizes = [32, 8], strides = [1, 1]} : vector<32x96xbf16> to vector<32x8xbf16>
    %318 = vector.shape_cast %317 : vector<32x8xbf16> to vector<2x16x8xbf16>
    %319 = vector.extract_strided_slice %316 {offsets = [0, 32], sizes = [32, 8], strides = [1, 1]} : vector<32x96xbf16> to vector<32x8xbf16>
    %320 = vector.shape_cast %319 : vector<32x8xbf16> to vector<2x16x8xbf16>
    %321 = vector.extract_strided_slice %316 {offsets = [0, 64], sizes = [32, 8], strides = [1, 1]} : vector<32x96xbf16> to vector<32x8xbf16>
    %322 = vector.shape_cast %321 : vector<32x8xbf16> to vector<2x16x8xbf16>
    "tpu.trace_start"() <{level = 10 : i32, message = "btd,bsd->bts"}> : () -> ()
    %cst_86 = arith.constant dense<0.000000e+00> : vector<2x16x16xf32>
    %323 = tpu.matmul %318, %320, %cst_86 {dimension_numbers = #tpu.dot_dimension_numbers<[2], [2], [1], [1], [0, 0, 0, 1, 1, 1], [0], [0]>} : vector<2x16x8xbf16>, vector<2x16x8xbf16>, vector<2x16x16xf32> -> vector<2x16x16xf32>
    "tpu.trace_stop"() : () -> ()
    %324 = arith.addf %323, %74 : vector<2x16x16xf32>
    %cst_87 = arith.constant dense<0xFF800000> : vector<2x16xf32>
    %325 = vector.multi_reduction <maximumf>, %324, %cst_87 [2] : vector<2x16x16xf32> to vector<2x16xf32>
    %326 = vector.shape_cast %325 : vector<2x16xf32> to vector<2x16x1xf32>
    %327 = vector.broadcast %326 : vector<2x16x1xf32> to vector<2x16x16xf32>
    %328 = arith.subf %324, %327 : vector<2x16x16xf32>
    %329 = math.exp %328 : vector<2x16x16xf32>
    %cst_88 = arith.constant dense<0.000000e+00> : vector<2x16xf32>
    %330 = vector.multi_reduction <add>, %329, %cst_88 [2] : vector<2x16x16xf32> to vector<2x16xf32>
    %331 = vector.shape_cast %330 : vector<2x16xf32> to vector<2x16x1xf32>
    %332 = tpu.reciprocal %331 {approx = true} : vector<2x16x1xf32> -> vector<2x16x1xf32>
    %333 = vector.broadcast %332 : vector<2x16x1xf32> to vector<2x16x16xf32>
    %334 = arith.mulf %329, %333 : vector<2x16x16xf32>
    %335 = arith.truncf %334 : vector<2x16x16xf32> to vector<2x16x16xbf16>
    "tpu.trace_start"() <{level = 10 : i32, message = "bts,bsd->btd"}> : () -> ()
    %cst_89 = arith.constant dense<0.000000e+00> : vector<2x16x8xf32>
    %336 = tpu.matmul %335, %322, %cst_89 {dimension_numbers = #tpu.dot_dimension_numbers<[2], [1], [1], [2], [0, 0, 0, 1, 1, 2], [0], [0]>} : vector<2x16x16xbf16>, vector<2x16x8xbf16>, vector<2x16x8xf32> -> vector<2x16x8xf32>
    "tpu.trace_stop"() : () -> ()
    %337 = vector.extract_strided_slice %316 {offsets = [0, 8], sizes = [32, 8], strides = [1, 1]} : vector<32x96xbf16> to vector<32x8xbf16>
    %338 = vector.shape_cast %337 : vector<32x8xbf16> to vector<2x16x8xbf16>
    %339 = vector.extract_strided_slice %316 {offsets = [0, 40], sizes = [32, 8], strides = [1, 1]} : vector<32x96xbf16> to vector<32x8xbf16>
    %340 = vector.shape_cast %339 : vector<32x8xbf16> to vector<2x16x8xbf16>
    %341 = vector.extract_strided_slice %316 {offsets = [0, 72], sizes = [32, 8], strides = [1, 1]} : vector<32x96xbf16> to vector<32x8xbf16>
    %342 = vector.shape_cast %341 : vector<32x8xbf16> to vector<2x16x8xbf16>
    "tpu.trace_start"() <{level = 10 : i32, message = "btd,bsd->bts"}> : () -> ()
    %cst_90 = arith.constant dense<0.000000e+00> : vector<2x16x16xf32>
    %343 = tpu.matmul %338, %340, %cst_90 {dimension_numbers = #tpu.dot_dimension_numbers<[2], [2], [1], [1], [0, 0, 0, 1, 1, 1], [0], [0]>} : vector<2x16x8xbf16>, vector<2x16x8xbf16>, vector<2x16x16xf32> -> vector<2x16x16xf32>
    "tpu.trace_stop"() : () -> ()
    %344 = arith.addf %343, %74 : vector<2x16x16xf32>
    %cst_91 = arith.constant dense<0xFF800000> : vector<2x16xf32>
    %345 = vector.multi_reduction <maximumf>, %344, %cst_91 [2] : vector<2x16x16xf32> to vector<2x16xf32>
    %346 = vector.shape_cast %345 : vector<2x16xf32> to vector<2x16x1xf32>
    %347 = vector.broadcast %346 : vector<2x16x1xf32> to vector<2x16x16xf32>
    %348 = arith.subf %344, %347 : vector<2x16x16xf32>
    %349 = math.exp %348 : vector<2x16x16xf32>
    %cst_92 = arith.constant dense<0.000000e+00> : vector<2x16xf32>
    %350 = vector.multi_reduction <add>, %349, %cst_92 [2] : vector<2x16x16xf32> to vector<2x16xf32>
    %351 = vector.shape_cast %350 : vector<2x16xf32> to vector<2x16x1xf32>
    %352 = tpu.reciprocal %351 {approx = true} : vector<2x16x1xf32> -> vector<2x16x1xf32>
    %353 = vector.broadcast %352 : vector<2x16x1xf32> to vector<2x16x16xf32>
    %354 = arith.mulf %349, %353 : vector<2x16x16xf32>
    %355 = arith.truncf %354 : vector<2x16x16xf32> to vector<2x16x16xbf16>
    "tpu.trace_start"() <{level = 10 : i32, message = "bts,bsd->btd"}> : () -> ()
    %cst_93 = arith.constant dense<0.000000e+00> : vector<2x16x8xf32>
    %356 = tpu.matmul %355, %342, %cst_93 {dimension_numbers = #tpu.dot_dimension_numbers<[2], [1], [1], [2], [0, 0, 0, 1, 1, 2], [0], [0]>} : vector<2x16x16xbf16>, vector<2x16x8xbf16>, vector<2x16x8xf32> -> vector<2x16x8xf32>
    "tpu.trace_stop"() : () -> ()
    %357 = vector.extract_strided_slice %316 {offsets = [0, 16], sizes = [32, 8], strides = [1, 1]} : vector<32x96xbf16> to vector<32x8xbf16>
    %358 = vector.shape_cast %357 : vector<32x8xbf16> to vector<2x16x8xbf16>
    %359 = vector.extract_strided_slice %316 {offsets = [0, 48], sizes = [32, 8], strides = [1, 1]} : vector<32x96xbf16> to vector<32x8xbf16>
    %360 = vector.shape_cast %359 : vector<32x8xbf16> to vector<2x16x8xbf16>
    %361 = vector.extract_strided_slice %316 {offsets = [0, 80], sizes = [32, 8], strides = [1, 1]} : vector<32x96xbf16> to vector<32x8xbf16>
    %362 = vector.shape_cast %361 : vector<32x8xbf16> to vector<2x16x8xbf16>
    "tpu.trace_start"() <{level = 10 : i32, message = "btd,bsd->bts"}> : () -> ()
    %cst_94 = arith.constant dense<0.000000e+00> : vector<2x16x16xf32>
    %363 = tpu.matmul %358, %360, %cst_94 {dimension_numbers = #tpu.dot_dimension_numbers<[2], [2], [1], [1], [0, 0, 0, 1, 1, 1], [0], [0]>} : vector<2x16x8xbf16>, vector<2x16x8xbf16>, vector<2x16x16xf32> -> vector<2x16x16xf32>
    "tpu.trace_stop"() : () -> ()
    %364 = arith.addf %363, %74 : vector<2x16x16xf32>
    %cst_95 = arith.constant dense<0xFF800000> : vector<2x16xf32>
    %365 = vector.multi_reduction <maximumf>, %364, %cst_95 [2] : vector<2x16x16xf32> to vector<2x16xf32>
    %366 = vector.shape_cast %365 : vector<2x16xf32> to vector<2x16x1xf32>
    %367 = vector.broadcast %366 : vector<2x16x1xf32> to vector<2x16x16xf32>
    %368 = arith.subf %364, %367 : vector<2x16x16xf32>
    %369 = math.exp %368 : vector<2x16x16xf32>
    %cst_96 = arith.constant dense<0.000000e+00> : vector<2x16xf32>
    %370 = vector.multi_reduction <add>, %369, %cst_96 [2] : vector<2x16x16xf32> to vector<2x16xf32>
    %371 = vector.shape_cast %370 : vector<2x16xf32> to vector<2x16x1xf32>
    %372 = tpu.reciprocal %371 {approx = true} : vector<2x16x1xf32> -> vector<2x16x1xf32>
    %373 = vector.broadcast %372 : vector<2x16x1xf32> to vector<2x16x16xf32>
    %374 = arith.mulf %369, %373 : vector<2x16x16xf32>
    %375 = arith.truncf %374 : vector<2x16x16xf32> to vector<2x16x16xbf16>
    "tpu.trace_start"() <{level = 10 : i32, message = "bts,bsd->btd"}> : () -> ()
    %cst_97 = arith.constant dense<0.000000e+00> : vector<2x16x8xf32>
    %376 = tpu.matmul %375, %362, %cst_97 {dimension_numbers = #tpu.dot_dimension_numbers<[2], [1], [1], [2], [0, 0, 0, 1, 1, 2], [0], [0]>} : vector<2x16x16xbf16>, vector<2x16x8xbf16>, vector<2x16x8xf32> -> vector<2x16x8xf32>
    "tpu.trace_stop"() : () -> ()
    %377 = vector.extract_strided_slice %316 {offsets = [0, 24], sizes = [32, 8], strides = [1, 1]} : vector<32x96xbf16> to vector<32x8xbf16>
    %378 = vector.shape_cast %377 : vector<32x8xbf16> to vector<2x16x8xbf16>
    %379 = vector.extract_strided_slice %316 {offsets = [0, 56], sizes = [32, 8], strides = [1, 1]} : vector<32x96xbf16> to vector<32x8xbf16>
    %380 = vector.shape_cast %379 : vector<32x8xbf16> to vector<2x16x8xbf16>
    %381 = vector.extract_strided_slice %316 {offsets = [0, 88], sizes = [32, 8], strides = [1, 1]} : vector<32x96xbf16> to vector<32x8xbf16>
    %382 = vector.shape_cast %381 : vector<32x8xbf16> to vector<2x16x8xbf16>
    "tpu.trace_start"() <{level = 10 : i32, message = "btd,bsd->bts"}> : () -> ()
    %cst_98 = arith.constant dense<0.000000e+00> : vector<2x16x16xf32>
    %383 = tpu.matmul %378, %380, %cst_98 {dimension_numbers = #tpu.dot_dimension_numbers<[2], [2], [1], [1], [0, 0, 0, 1, 1, 1], [0], [0]>} : vector<2x16x8xbf16>, vector<2x16x8xbf16>, vector<2x16x16xf32> -> vector<2x16x16xf32>
    "tpu.trace_stop"() : () -> ()
    %384 = arith.addf %383, %74 : vector<2x16x16xf32>
    %cst_99 = arith.constant dense<0xFF800000> : vector<2x16xf32>
    %385 = vector.multi_reduction <maximumf>, %384, %cst_99 [2] : vector<2x16x16xf32> to vector<2x16xf32>
    %386 = vector.shape_cast %385 : vector<2x16xf32> to vector<2x16x1xf32>
    %387 = vector.broadcast %386 : vector<2x16x1xf32> to vector<2x16x16xf32>
    %388 = arith.subf %384, %387 : vector<2x16x16xf32>
    %389 = math.exp %388 : vector<2x16x16xf32>
    %cst_100 = arith.constant dense<0.000000e+00> : vector<2x16xf32>
    %390 = vector.multi_reduction <add>, %389, %cst_100 [2] : vector<2x16x16xf32> to vector<2x16xf32>
    %391 = vector.shape_cast %390 : vector<2x16xf32> to vector<2x16x1xf32>
    %392 = tpu.reciprocal %391 {approx = true} : vector<2x16x1xf32> -> vector<2x16x1xf32>
    %393 = vector.broadcast %392 : vector<2x16x1xf32> to vector<2x16x16xf32>
    %394 = arith.mulf %389, %393 : vector<2x16x16xf32>
    %395 = arith.truncf %394 : vector<2x16x16xf32> to vector<2x16x16xbf16>
    "tpu.trace_start"() <{level = 10 : i32, message = "bts,bsd->btd"}> : () -> ()
    %cst_101 = arith.constant dense<0.000000e+00> : vector<2x16x8xf32>
    %396 = tpu.matmul %395, %382, %cst_101 {dimension_numbers = #tpu.dot_dimension_numbers<[2], [1], [1], [2], [0, 0, 0, 1, 1, 2], [0], [0]>} : vector<2x16x16xbf16>, vector<2x16x8xbf16>, vector<2x16x8xf32> -> vector<2x16x8xf32>
    "tpu.trace_stop"() : () -> ()
    %397 = tpu.concatenate %336, %356, %376, %396 in 2 : vector<2x16x8xf32>, vector<2x16x8xf32>, vector<2x16x8xf32>, vector<2x16x8xf32> -> vector<2x16x32xf32>
    %398 = vector.shape_cast %397 : vector<2x16x32xf32> to vector<32x32xf32>
    %399 = arith.truncf %398 : vector<32x32xf32> to vector<32x32xbf16>
    %c1_102 = arith.constant 1 : index
    %c0_103 = arith.constant 0 : index
    %c0_104 = arith.constant 0 : index
    %400 = vector.load %arg5[%c1_102, %c0_103, %c0_104] : memref<2x32x32xbf16, #tpu.memory_space<vmem>>, vector<1x32x32xbf16>
    %401 = vector.shape_cast %400 : vector<1x32x32xbf16> to vector<32x32xbf16>
    %cst_105 = arith.constant dense<0.000000e+00> : vector<32x32xf32>
    %402 = tpu.matmul %399, %401, %cst_105 {dimension_numbers = #tpu.dot_dimension_numbers<[1], [0], [0], [1], [0, 0, 1, 1], [], []>} : vector<32x32xbf16>, vector<32x32xbf16>, vector<32x32xf32> -> vector<32x32xf32>
    %403 = vector.shape_cast %276 : vector<32xf32> to vector<1x32xf32>
    %404 = vector.broadcast %403 : vector<1x32xf32> to vector<32x32xf32>
    %405 = arith.addf %402, %404 : vector<32x32xf32>
    %406 = arith.addf %268, %405 : vector<32x32xf32>
    %407 = vector.extract_strided_slice %270 {offsets = [2, 0], sizes = [1, 32], strides = [1, 1]} : vector<4x32xf32> to vector<1x32xf32>
    %408 = vector.shape_cast %407 : vector<1x32xf32> to vector<32xf32>
    %409 = vector.extract_strided_slice %270 {offsets = [3, 0], sizes = [1, 32], strides = [1, 1]} : vector<4x32xf32> to vector<1x32xf32>
    %410 = vector.shape_cast %409 : vector<1x32xf32> to vector<32xf32>
    %cst_106 = arith.constant dense<0.000000e+00> : vector<32xf32>
    %411 = vector.multi_reduction <add>, %406, %cst_106 [1] : vector<32x32xf32> to vector<32xf32>
    %412 = vector.shape_cast %411 : vector<32xf32> to vector<32x1xf32>
    %cst_107 = arith.constant 3.200000e+01 : f32
    %413 = vector.broadcast %cst_107 : f32 to vector<32x1xf32>
    %414 = arith.divf %412, %413 : vector<32x1xf32>
    %415 = vector.broadcast %414 : vector<32x1xf32> to vector<32x32xf32>
    %416 = arith.subf %406, %415 : vector<32x32xf32>
    %417 = arith.mulf %416, %416 : vector<32x32xf32>
    %cst_108 = arith.constant dense<0.000000e+00> : vector<32xf32>
    %418 = vector.multi_reduction <add>, %417, %cst_108 [1] : vector<32x32xf32> to vector<32xf32>
    %419 = vector.shape_cast %418 : vector<32xf32> to vector<32x1xf32>
    %cst_109 = arith.constant 3.200000e+01 : f32
    %420 = vector.broadcast %cst_109 : f32 to vector<32x1xf32>
    %421 = arith.divf %419, %420 : vector<32x1xf32>
    %422 = vector.broadcast %414 : vector<32x1xf32> to vector<32x32xf32>
    %423 = arith.subf %406, %422 : vector<32x32xf32>
    %cst_110 = arith.constant 9.99999974E-6 : f32
    %424 = vector.broadcast %cst_110 : f32 to vector<32x1xf32>
    %425 = arith.addf %421, %424 : vector<32x1xf32>
    %426 = math.rsqrt %425 : vector<32x1xf32>
    %427 = vector.broadcast %426 : vector<32x1xf32> to vector<32x32xf32>
    %428 = arith.mulf %423, %427 : vector<32x32xf32>
    %429 = vector.shape_cast %408 : vector<32xf32> to vector<1x32xf32>
    %430 = vector.broadcast %429 : vector<1x32xf32> to vector<32x32xf32>
    %431 = arith.mulf %428, %430 : vector<32x32xf32>
    %432 = vector.shape_cast %410 : vector<32xf32> to vector<1x32xf32>
    %433 = vector.broadcast %432 : vector<1x32xf32> to vector<32x32xf32>
    %434 = arith.addf %431, %433 : vector<32x32xf32>
    %435 = arith.truncf %434 : vector<32x32xf32> to vector<32x32xbf16>
    %c1_111 = arith.constant 1 : index
    %c0_112 = arith.constant 0 : index
    %c0_113 = arith.constant 0 : index
    %436 = vector.load %arg6[%c1_111, %c0_112, %c0_113] : memref<2x32x128xbf16, #tpu.memory_space<vmem>>, vector<1x32x128xbf16>
    %437 = vector.shape_cast %436 : vector<1x32x128xbf16> to vector<32x128xbf16>
    %cst_114 = arith.constant dense<0.000000e+00> : vector<32x128xf32>
    %438 = tpu.matmul %435, %437, %cst_114 {dimension_numbers = #tpu.dot_dimension_numbers<[1], [0], [0], [1], [0, 0, 1, 1], [], []>} : vector<32x32xbf16>, vector<32x128xbf16>, vector<32x128xf32> -> vector<32x128xf32>
    %439 = vector.shape_cast %278 : vector<128xf32> to vector<1x128xf32>
    %440 = vector.broadcast %439 : vector<1x128xf32> to vector<32x128xf32>
    %441 = arith.addf %438, %440 : vector<32x128xf32>
    %cst_115 = arith.constant 5.000000e-01 : f32
    %442 = vector.broadcast %cst_115 : f32 to vector<32x128xf32>
    %443 = arith.mulf %442, %441 : vector<32x128xf32>
    %cst_116 = arith.constant 4.471500e-02 : f32
    %444 = vector.broadcast %cst_116 : f32 to vector<32x128xf32>
    %445 = arith.mulf %444, %441 : vector<32x128xf32>
    %446 = arith.mulf %445, %441 : vector<32x128xf32>
    %447 = arith.mulf %446, %441 : vector<32x128xf32>
    %448 = arith.addf %441, %447 : vector<32x128xf32>
    %cst_117 = arith.constant 0.797884583 : f32
    %449 = vector.broadcast %cst_117 : f32 to vector<32x128xf32>
    %450 = arith.mulf %449, %448 : vector<32x128xf32>
    %451 = math.tanh %450 : vector<32x128xf32>
    %cst_118 = arith.constant 1.000000e+00 : f32
    %452 = vector.broadcast %cst_118 : f32 to vector<32x128xf32>
    %453 = arith.addf %452, %451 : vector<32x128xf32>
    %454 = arith.mulf %443, %453 : vector<32x128xf32>
    %455 = arith.truncf %454 : vector<32x128xf32> to vector<32x128xbf16>
    %c1_119 = arith.constant 1 : index
    %c0_120 = arith.constant 0 : index
    %c0_121 = arith.constant 0 : index
    %456 = vector.load %arg7[%c1_119, %c0_120, %c0_121] : memref<2x128x32xbf16, #tpu.memory_space<vmem>>, vector<1x128x32xbf16>
    %457 = vector.shape_cast %456 : vector<1x128x32xbf16> to vector<128x32xbf16>
    %cst_122 = arith.constant dense<0.000000e+00> : vector<32x32xf32>
    %458 = tpu.matmul %455, %457, %cst_122 {dimension_numbers = #tpu.dot_dimension_numbers<[1], [0], [0], [1], [0, 0, 1, 1], [], []>} : vector<32x128xbf16>, vector<128x32xbf16>, vector<32x32xf32> -> vector<32x32xf32>
    %459 = arith.addf %406, %458 : vector<32x32xf32>
    %460 = vector.shape_cast %280 : vector<32xf32> to vector<1x32xf32>
    %461 = vector.broadcast %460 : vector<1x32xf32> to vector<32x32xf32>
    %462 = arith.addf %459, %461 : vector<32x32xf32>
    %c0_123 = arith.constant 0 : index
    %c0_124 = arith.constant 0 : index
    %463 = vector.load %arg10[%c0_123, %c0_124] : memref<2x32xf32, #tpu.memory_space<vmem>>, vector<1x32xf32>
    %464 = vector.shape_cast %463 : vector<1x32xf32> to vector<32xf32>
    %c1_125 = arith.constant 1 : index
    %c0_126 = arith.constant 0 : index
    %465 = vector.load %arg10[%c1_125, %c0_126] : memref<2x32xf32, #tpu.memory_space<vmem>>, vector<1x32xf32>
    %466 = vector.shape_cast %465 : vector<1x32xf32> to vector<32xf32>
    %cst_127 = arith.constant dense<0.000000e+00> : vector<32xf32>
    %467 = vector.multi_reduction <add>, %462, %cst_127 [1] : vector<32x32xf32> to vector<32xf32>
    %468 = vector.shape_cast %467 : vector<32xf32> to vector<32x1xf32>
    %cst_128 = arith.constant 3.200000e+01 : f32
    %469 = vector.broadcast %cst_128 : f32 to vector<32x1xf32>
    %470 = arith.divf %468, %469 : vector<32x1xf32>
    %471 = vector.broadcast %470 : vector<32x1xf32> to vector<32x32xf32>
    %472 = arith.subf %462, %471 : vector<32x32xf32>
    %473 = arith.mulf %472, %472 : vector<32x32xf32>
    %cst_129 = arith.constant dense<0.000000e+00> : vector<32xf32>
    %474 = vector.multi_reduction <add>, %473, %cst_129 [1] : vector<32x32xf32> to vector<32xf32>
    %475 = vector.shape_cast %474 : vector<32xf32> to vector<32x1xf32>
    %cst_130 = arith.constant 3.200000e+01 : f32
    %476 = vector.broadcast %cst_130 : f32 to vector<32x1xf32>
    %477 = arith.divf %475, %476 : vector<32x1xf32>
    %478 = vector.broadcast %470 : vector<32x1xf32> to vector<32x32xf32>
    %479 = arith.subf %462, %478 : vector<32x32xf32>
    %cst_131 = arith.constant 9.99999974E-6 : f32
    %480 = vector.broadcast %cst_131 : f32 to vector<32x1xf32>
    %481 = arith.addf %477, %480 : vector<32x1xf32>
    %482 = math.rsqrt %481 : vector<32x1xf32>
    %483 = vector.broadcast %482 : vector<32x1xf32> to vector<32x32xf32>
    %484 = arith.mulf %479, %483 : vector<32x32xf32>
    %485 = vector.shape_cast %464 : vector<32xf32> to vector<1x32xf32>
    %486 = vector.broadcast %485 : vector<1x32xf32> to vector<32x32xf32>
    %487 = arith.mulf %484, %486 : vector<32x32xf32>
    %488 = vector.shape_cast %466 : vector<32xf32> to vector<1x32xf32>
    %489 = vector.broadcast %488 : vector<1x32xf32> to vector<32x32xf32>
    %490 = arith.addf %487, %489 : vector<32x32xf32>
    %491 = arith.truncf %490 : vector<32x32xf32> to vector<32x32xbf16>
    %c0_132 = arith.constant 0 : index
    %c0_133 = arith.constant 0 : index
    %492 = vector.load %arg11[%c0_132, %c0_133] : memref<32x128xbf16, #tpu.memory_space<vmem>>, vector<32x128xbf16>
    %cst_134 = arith.constant dense<0.000000e+00> : vector<32x128xf32>
    %493 = tpu.matmul %491, %492, %cst_134 {dimension_numbers = #tpu.dot_dimension_numbers<[1], [0], [0], [1], [0, 0, 1, 1], [], []>} : vector<32x32xbf16>, vector<32x128xbf16>, vector<32x128xf32> -> vector<32x128xf32>
    %494 = vector.shape_cast %493 : vector<32x128xf32> to vector<2x16x128xf32>
    %495 = arith.truncf %494 : vector<2x16x128xf32> to vector<2x16x128xbf16>
    %c0_135 = arith.constant 0 : index
    %c0_136 = arith.constant 0 : index
    %c0_137 = arith.constant 0 : index
    %496 = vector.load %arg12[%c0_135, %c0_136, %c0_137] : memref<2x16x128xbf16, #tpu.memory_space<vmem>>, vector<2x16x128xbf16>
    tpu.vector_store %arg12[%c0_135, %c0_136, %c0_137], %495 {strides = array<i32>} : memref<2x16x128xbf16, #tpu.memory_space<vmem>>, vector<2x16x128xbf16>,
    return
  }
  func.func @transform_0(%arg0: i32) -> (i32, i32, i32) {
    %c0_i32 = arith.constant 0 : i32
    %c0_i32_0 = arith.constant 0 : i32
    %c0_i32_1 = arith.constant 0 : i32
    return %arg0, %c0_i32, %c0_i32_0 : i32, i32, i32
  }
  func.func @transform_1(%arg0: i32) -> (i32, i32) {
    %c0_i32 = arith.constant 0 : i32
    %c0_i32_0 = arith.constant 0 : i32
    %c0_i32_1 = arith.constant 0 : i32
    return %c0_i32, %c0_i32_0 : i32, i32
  }
  func.func @transform_2(%arg0: i32) -> (i32, i32) {
    %c0_i32 = arith.constant 0 : i32
    %c0_i32_0 = arith.constant 0 : i32
    %c0_i32_1 = arith.constant 0 : i32
    return %c0_i32, %c0_i32_0 : i32, i32
  }
  func.func @transform_3(%arg0: i32) -> (i32, i32, i32) {
    %c0_i32 = arith.constant 0 : i32
    %c0_i32_0 = arith.constant 0 : i32
    %c0_i32_1 = arith.constant 0 : i32
    %c0_i32_2 = arith.constant 0 : i32
    return %c0_i32, %c0_i32_0, %c0_i32_1 : i32, i32, i32
  }
  func.func @transform_4(%arg0: i32) -> (i32, i32, i32) {
    %c0_i32 = arith.constant 0 : i32
    %c0_i32_0 = arith.constant 0 : i32
    %c0_i32_1 = arith.constant 0 : i32
    %c0_i32_2 = arith.constant 0 : i32
    return %c0_i32, %c0_i32_0, %c0_i32_1 : i32, i32, i32
  }
  func.func @transform_5(%arg0: i32) -> (i32, i32, i32) {
    %c0_i32 = arith.constant 0 : i32
    %c0_i32_0 = arith.constant 0 : i32
    %c0_i32_1 = arith.constant 0 : i32
    %c0_i32_2 = arith.constant 0 : i32
    return %c0_i32, %c0_i32_0, %c0_i32_1 : i32, i32, i32
  }
  func.func @transform_6(%arg0: i32) -> (i32, i32, i32) {
    %c0_i32 = arith.constant 0 : i32
    %c0_i32_0 = arith.constant 0 : i32
    %c0_i32_1 = arith.constant 0 : i32
    %c0_i32_2 = arith.constant 0 : i32
    return %c0_i32, %c0_i32_0, %c0_i32_1 : i32, i32, i32
  }
  func.func @transform_7(%arg0: i32) -> (i32, i32, i32) {
    %c0_i32 = arith.constant 0 : i32
    %c0_i32_0 = arith.constant 0 : i32
    %c0_i32_1 = arith.constant 0 : i32
    %c0_i32_2 = arith.constant 0 : i32
    return %c0_i32, %c0_i32_0, %c0_i32_1 : i32, i32, i32
  }
  func.func @transform_8(%arg0: i32) -> (i32, i32, i32) {
    %c0_i32 = arith.constant 0 : i32
    %c0_i32_0 = arith.constant 0 : i32
    %c0_i32_1 = arith.constant 0 : i32
    %c0_i32_2 = arith.constant 0 : i32
    return %c0_i32, %c0_i32_0, %c0_i32_1 : i32, i32, i32
  }
  func.func @transform_9(%arg0: i32) -> (i32, i32) {
    %c0_i32 = arith.constant 0 : i32
    %c0_i32_0 = arith.constant 0 : i32
    %c0_i32_1 = arith.constant 0 : i32
    return %c0_i32, %c0_i32_0 : i32, i32
  }
  func.func @transform_10(%arg0: i32) -> (i32, i32) {
    %c0_i32 = arith.constant 0 : i32
    %c0_i32_0 = arith.constant 0 : i32
    %c0_i32_1 = arith.constant 0 : i32
    return %c0_i32, %c0_i32_0 : i32, i32
  }
  func.func @transform_11(%arg0: i32) -> (i32, i32, i32) {
    %c0_i32 = arith.constant 0 : i32
    %c0_i32_0 = arith.constant 0 : i32
    %c0_i32_1 = arith.constant 0 : i32
    return %arg0, %c0_i32, %c0_i32_0 : i32, i32, i32
  }
}

</mosaic_0001>

<bundles_post_ra>
// kernel: traisformer_forward.1
= control target key start
LH: loop header
LB: loop body
LE: loop exit
PB: predicated region body
PF: predicated region fallthrough
CT: control target
= control target key end

     0   :  { %v4520_v0 = vmov 0   ;;  %v4521_v39 = vmov 1   ;;  %v4522_v54 = vmov 2   ;;  %v4523_v60 = vmov 3   ;;  %s4527_s30 = smov 96   ;;  %s4529_s12 = smov 64   ;;  %s5418_s0 = inlined_call_operand.vmem [shape: f32[2,16,4], index: 0, kind: input, shape index: {}]   ;;  %s5419_s1 = inlined_call_operand.vmem [shape: bf16[128,32], index: 1, kind: input, shape index: {}]   ;;  %s5420_s2 = inlined_call_operand.vmem [shape: f32[16,32], index: 2, kind: input, shape index: {}]   ;;  %s5421_s3 = inlined_call_operand.vmem [shape: bf16[2,32,96], index: 3, kind: input, shape index: {}]   ;;  %s5422_s8 = inlined_call_operand.vmem [shape: f32[2,4,32], index: 8, kind: input, shape index: {}]   ;;  %s5423_s7 = inlined_call_operand.vmem [shape: f32[2,4,128], index: 7, kind: input, shape index: {}]   ;;  %s5424_s4 = inlined_call_operand.vmem [shape: bf16[2,32,32], index: 4, kind: input, shape index: {}]   ;;  %s5425_s5 = inlined_call_operand.vmem [shape: bf16[2,32,128], index: 5, kind: input, shape index: {}]   ;;  %s5426_s6 = inlined_call_operand.vmem [shape: bf16[2,128,32], index: 6, kind: input, shape index: {}]   ;;  %s5427_s10 = inlined_call_operand.vmem [shape: bf16[32,128], index: 10, kind: input, shape index: {}]   ;;  %s5428_s9 = inlined_call_operand.vmem [shape: f32[2,32], index: 9, kind: input, shape index: {}]   ;;  %s5429_s11 = inlined_call_operand.vmem [shape: bf16[2,16,128], index: 11, kind: output, shape index: {}]  }
   0x1   :  { %4227 = vset.pattern.permute.xlu1 %v4520_v0  ;;  %4226 = vset.pattern.permute.xlu0 %v4520_v0  ;;  %v42_v1 = vld [vmem:[%s5418_s0 + $0x18] sm:$0xff]  ;;  %v39_v2 = vld [vmem:[%s5418_s0] sm:$0xff]  ;;  %v40_v3 = vld [vmem:[%s5418_s0 + $0x8] sm:$0xff]  ;;  %s4530_s13 = smov 88   ;;  %s4531_s14 = smov 120  }
   0x2   :  { %v48_v4 = vmul.f32 16.0, %v42_v1  ;;  %v45_v5 = vmul.f32 16.0, %v39_v2  ;;  %v109_v6 = vmul.f32 8.0, %v39_v2  ;;  %v41_v7 = vld [vmem:[%s5418_s0 + $0x10] sm:$0xff]  ;;  %v112_v8 = vmul.f32 8.0, %v42_v1  ;;  %v4294_v44 = vld [vmem:[%s5419_s1] sm:$0xff]  }
   0x3   :  { %v46_v9 = vmul.f32 16.0, %v40_v3  ;;  %v110_v10 = vmul.f32 8.0, %v40_v3  ;;  %v47_v11 = vmul.f32 16.0, %v41_v7  ;;  %v111_v15 = vmul.f32 8.0, %v41_v7  ;;  %3880 = vmatprep.subr.bf16.mxu0 %v4294_v44  ;;  %v4295_v48 = vld [vmem:[%s5419_s1 + $0x8] sm:$0xff]   ;;  %v4296_v50 = vld [vmem:[%s5419_s1 + $0x10] sm:$0xff]  }
   0x4   :  { %v4194_v12 = vtrunc.f32 %v48_v4  ;;  %v4188_v13 = vtrunc.f32 %v45_v5  ;;  %v4196_v14 = vtrunc.f32 %v109_v6  ;;  %v4202_v22 = vtrunc.f32 %v112_v8  ;;  %3881 = vmatpush3.bf16.msra.mxu0 %v4294_v44  ;;  %v4297_v55 = vld [vmem:[%s5419_s1 + $0x18] sm:$0xff]   ;;  %v4298_v59 = vld [vmem:[%s5419_s1 + $0x20] sm:$0xff]   ;;  %v4299_v63 = vld [vmem:[%s5419_s1 + $0x28] sm:$0xff]   ;;  %s4532_s15 = smov 56   ;;  %s4533_s16 = smov 80  }
   0x5   :  { %v4190_v16 = vtrunc.f32 %v46_v9  ;;  %v4198_v17 = vtrunc.f32 %v110_v10  ;;  %v4192_v18 = vtrunc.f32 %v47_v11  ;;  %v4200_v25 = vtrunc.f32 %v111_v15  ;;  %3882 = vmatprep.subr.bf16.mxu0 %v4295_v48  ;;  %v4300_v1 = vld [vmem:[%s5419_s1 + $0x30] sm:$0xff]   ;;  %v4301_v3 = vld [vmem:[%s5419_s1 + $0x38] sm:$0xff]   ;;  %s4534_s17 = smov 112   ;;  %s4535_s18 = smov 48  }
   0x6   :  { %v4195_v19 = vcvt.f32.s32 %v4194_v12  ;;  %v4189_v20 = vcvt.f32.s32 %v4188_v13  ;;  %v4197_v21 = vcvt.f32.s32 %v4196_v14  ;;  %v4203_v37 = vcvt.f32.s32 %v4202_v22  ;;  %s4536_s19 = smov 72   ;;  %s4537_s20 = smov 104  }
   0x7   :  { %v4191_v23 = vcvt.f32.s32 %v4190_v16  ;;  %v4193_v24 = vcvt.f32.s32 %v4192_v18  ;;  %v4199_v26 = vcvt.f32.s32 %v4198_v17  ;;  %v4201_v33 = vcvt.f32.s32 %v4200_v25  ;;  %s4538_s1 = smov 40   ;;  %s4539_s21 = smov 8  }
   0x8   :  { %vm59_vm0 = vcmp.gt.s32.totalorder %v4195_v19, 0  ;;  %vm53_vm1 = vcmp.gt.s32.totalorder %v4189_v20, 0  ;;  %vm117_vm6 = vcmp.gt.s32.totalorder %v4197_v21, 0  ;;  %vm123_vm13 = vcmp.gt.s32.totalorder %v4203_v37, 0  ;;  %3883 = vmatpush3.bf16.msra.mxu0 %v4295_v48  ;;  %s4540_s22 = smov 16   ;;  %s4541_s25 = smov 24  }
   0x9   :  { %v60_v27 = vsel %vm59_vm0, %v4195_v19, 0  ;;  %v54_v28 = vsel %vm53_vm1, %v4189_v20, 0  ;;  %vm55_vm2 = vcmp.gt.s32.totalorder %v4191_v23, 0  ;;  %vm57_vm3 = vcmp.gt.s32.totalorder %v4193_v24, 0  ;;  %3884 = vmatprep.subr.bf16.mxu0 %v4296_v50 }
   0xa   :  { %vm67_vm4 = vcmp.lt.s32.totalorder %v60_v27, 15  ;;  %vm61_vm5 = vcmp.lt.s32.totalorder %v54_v28, 15  ;;  %v56_v29 = vsel %vm55_vm2, %v4191_v23, 0  ;;  %v58_v32 = vsel %vm57_vm3, %v4193_v24, 0  ;;  %v300_v24 = vld [vmem:[%s5420_s2] sm:$0xff] }
   0xb   :  { %v68_v30 = vsel %vm67_vm4, %v60_v27, 15  ;;  %v62_v31 = vsel %vm61_vm5, %v54_v28, 15  ;;  %vm63_vm7 = vcmp.lt.s32.totalorder %v56_v29, 15  ;;  %vm119_vm8 = vcmp.gt.s32.totalorder %v4199_v26, 0  ;;  %v301_v27 = vld [vmem:[%s5420_s2 + $0x8] sm:$0xff] }
   0xc   :  { %79 = vperm.xlu1 %4227, %v68_v30   ;;  %70 = vperm.xlu0 %4226, %v62_v31   ;;  %v85_v34 = vadd.s32 16, %v62_v31  ;;  %v64_v35 = vsel %vm63_vm7, %v56_v29, 15  ;;  %v118_v36 = vsel %vm117_vm6, %v4197_v21, 0  ;;  %vm65_vm9 = vcmp.lt.s32.totalorder %v58_v32, 15 }
   0xd   :  { %v120_v38 = vsel %vm119_vm8, %v4199_v26, 0  ;;  %vm125_vm10 = vcmp.lt.s32.totalorder %v118_v36, 7  ;;  %vm121_vm11 = vcmp.gt.s32.totalorder %v4201_v33, 0  ;;  %v86_v40 = vadd.s32 16, %v64_v35  ;;  %3885 = vmatpush3.bf16.msra.mxu0 %v4296_v50 }
   0xe   :  { %v66_v41 = vsel %vm65_vm9, %v58_v32, 15  ;;  %vm127_vm12 = vcmp.lt.s32.totalorder %v120_v38, 7  ;;  %v88_v42 = vadd.s32 16, %v68_v30  ;;  %v126_v45 = vsel %vm125_vm10, %v118_v36, 7  ;;  %3886 = vmatprep.subr.bf16.mxu0 %v4297_v55 }
   0xf   :  { %v87_v43 = vadd.s32 16, %v66_v41  ;;  %v122_v46 = vsel %vm121_vm11, %v4201_v33, 0  ;;  %v128_v47 = vsel %vm127_vm12, %v120_v38, 7  ;;  %v124_v49 = vsel %vm123_vm13, %v4203_v37, 0 }
  0x10   :  { %4228 = vset.pattern.permute.xlu1 %v4521_v39  ;;  %73 = vperm.xlu0 %4226, %v64_v35   ;;  %vm129_vm14 = vcmp.lt.s32.totalorder %v122_v46, 7  ;;  %v134_v51 = vadd.s32 32, %v128_v47  ;;  %v133_v52 = vadd.s32 32, %v126_v45  ;;  %vm131_vm15 = vcmp.lt.s32.totalorder %v124_v49, 7 }
  0x11   :  { %90 = vperm.xlu1 %4228, %v85_v34   ;;  %v130_v53 = vsel %vm129_vm14, %v122_v46, 7  ;;  %v157_v57 = vadd.s32 40, %v126_v45  ;;  %v132_v58 = vsel %vm131_vm15, %v124_v49, 7  ;;  %3887 = vmatpush3.bf16.msra.mxu0 %v4297_v55  ;;  %v158_v0 = vadd.s32 40, %v128_v47 }
  0x12   :  { %v135_v56 = vadd.s32 32, %v130_v53  ;;  %v136_v61 = vadd.s32 32, %v132_v58  ;;  %v160_v62 = vadd.s32 40, %v132_v58  ;;  %3888 = vmatprep.subr.bf16.mxu0 %v4298_v59  ;;  %v159_v2 = vadd.s32 40, %v130_v53  ;;  %v4302_v58 = vld [vmem:[%s5421_s3] sm:$0xff]  }
  0x13   :  { %v43_v12 = vlaneseq  ;;  %v5430_v19 = vmov 0  ;;  %v4524_v22 = vmov 1.0|1.0   ;;  %3900 = vmatprep.subr.bf16.mxu1 %v4302_v58 }
  0x14   :  { %76 = vperm.xlu0 %4226, %v66_v41   ;;  %3901 = vmatpush3.bf16.msra.mxu1 %v4302_v58 }
  0x15   :  { %93 = vperm.xlu1 %4228, %v86_v40   ;;  %3889 = vmatpush3.bf16.msra.mxu0 %v4298_v59  ;;  %v4639_v15 = vand.u32 127, %v43_v12  ;;  %v4303_v59 = vld [vmem:[%s5421_s3 + $0x8] sm:$0xff]  }
  0x16   :  { %3890 = vmatprep.subr.bf16.mxu0 %v4299_v63  ;;  %3902 = vmatprep.subr.bf16.mxu1 %v4303_v59 }
  0x18   :  { %4229 = vset.pattern.permute.xlu0 %v4521_v39  ;;  %3903 = vmatpush3.bf16.msra.mxu1 %v4303_v59 }
  0x19   :  { %96 = vperm.xlu0 %4229, %v87_v43   ;;  %99 = vperm.xlu1 %4228, %v88_v42  }
  0x1a   :  { %3891 = vmatpush3.bf16.msra.mxu0 %v4299_v63 }
  0x1b   :  { %3892 = vmatprep.subr.bf16.mxu0 %v4300_v1 }
  0x1d   :  { %4231 = vset.pattern.permute.xlu0 %v4522_v54  ;;  %4230 = vset.pattern.permute.xlu1 %v4522_v54 }
  0x1e   :  { %141 = vperm.xlu0 %4231, %v134_v51   ;;  %138 = vperm.xlu1 %4230, %v133_v52  }
  0x1f   :  { %3893 = vmatpush3.bf16.msra.mxu0 %v4300_v1 }
  0x20   :  { %3894 = vmatprep.subr.bf16.mxu0 %v4301_v3 }
  0x22   :  { %4232 = vset.pattern.permute.xlu0 %v4523_v60  ;;  %144 = vperm.xlu1 %4230, %v135_v56  }
  0x23   :  { %162 = vperm.xlu0 %4232, %v157_v57   ;;  %3895 = vmatpush3.bf16.msra.mxu0 %v4301_v3 }
  0x26   :  { %147 = vperm.xlu1 %4230, %v136_v61  }
  0x27   :  { %171 = vperm.xlu0 %4232, %v160_v62  }
  0x2a   :  { %4233 = vset.pattern.permute.xlu1 %v4523_v60 }
  0x2b   :  { %165 = vperm.xlu1 %4233, %v158_v0  }
  0x2f   :  { %168 = vperm.xlu1 %4233, %v159_v2  }
  0x8b   :  { %v80_v4 = vpop.permute.xlu1 %79  ;;  %v71_v5 = vpop.permute.xlu0 %70 }
  0x8c   :  { %vm81_vm0 = vcmp.eq.s32.totalorder %v4639_v15, %v71_v5  ;;  %vm84_vm10 = vcmp.eq.s32.totalorder %v4639_v15, %v80_v4  ;;  %v4700_v4 = vshrl.u32 %v43_v12, 7 }
  0x8f   :  { %v74_v6 = vpop.permute.xlu0 %73 }
  0x90   :  { %v91_v7 = vpop.permute.xlu1 %90  ;;  %vm82_vm2 = vcmp.eq.s32.totalorder %v4639_v15, %v74_v6 }
  0x91   :  { %vm101_vm1 = vcmp.eq.s32.totalorder %v4639_v15, %v91_v7 }
  0x92   :  { %vm105_vm5 = vmor %vm81_vm0, %vm101_vm1 }
  0x93   :  { %v77_v8 = vpop.permute.xlu0 %76 }
  0x94   :  { %v94_v9 = vpop.permute.xlu1 %93  ;;  %vm83_vm7 = vcmp.eq.s32.totalorder %v4639_v15, %v77_v8 }
  0x95   :  { %vm102_vm3 = vcmp.eq.s32.totalorder %v4639_v15, %v94_v9  ;;  %v4703_v9 = vsub.s32 0, %v4700_v4 }
  0x96   :  { %vm106_vm8 = vmor %vm82_vm2, %vm102_vm3 }
  0x98   :  { %v97_v10 = vpop.permute.xlu0 %96  ;;  %v100_v11 = vpop.permute.xlu1 %99 }
  0x99   :  { %vm103_vm4 = vcmp.eq.s32.totalorder %v4639_v15, %v97_v10  ;;  %vm104_vm6 = vcmp.eq.s32.totalorder %v4639_v15, %v100_v11  ;;  %v313_v10 = vld [vmem:[%s5422_s8] sm:$0xf] }
  0x9a   :  { %vm4650_vm11 = vmor %vm83_vm7, %vm103_vm4  ;;  %v372_v11 = vrot.slane %v313_v10, %v4703_v9 }
  0x9b   :  { %v5431_v19 = vsel %vm4650_vm11, 4294967295, %v5430_v19  ;;  %vm108_vm13 = vmor %vm84_vm10, %vm104_vm6 }
  0x9d   :  { %v142_v13 = vpop.permute.xlu0 %141  ;;  %v139_v14 = vpop.permute.xlu1 %138 }
  0x9e   :  { %vm149_vm9 = vcmp.eq.s32.totalorder %v4639_v15, %v139_v14  ;;  %vm150_vm12 = vcmp.eq.s32.totalorder %v4639_v15, %v142_v13  ;;  %v4710_v13 = vsub.s32 1, %v4700_v4 }
  0x9f   :  { %vm153_vm0 = vmor %vm105_vm5, %vm149_vm9  ;;  %vm5432_vm5 = vnez %v5431_v19 }
  0xa0   :  { %vm154_vm1 = vmor %vm106_vm8, %vm150_vm12  ;;  %v380_v19 = vrot.slane %v313_v10, %v4710_v13 }
  0xa1   :  { %v145_v16 = vpop.permute.xlu1 %144 }
  0xa2   :  { %v163_v17 = vpop.permute.xlu0 %162  ;;  %vm151_vm3 = vcmp.eq.s32.totalorder %v4639_v15, %v145_v16 }
  0xa3   :  { %vm173_vm14 = vcmp.eq.s32.totalorder %v4639_v15, %v163_v17  ;;  %vm155_vm9 = vmor %vm5432_vm5, %vm151_vm3  ;;  %vm565_vm3 = vcmask 130048  }
  0xa4   :  { %vm177_vm2 = vmor %vm153_vm0, %vm173_vm14 }
  0xa5   :  { %v148_v18 = vpop.permute.xlu1 %147 }
  0xa6   :  { %vm152_vm15 = vcmp.eq.s32.totalorder %v4639_v15, %v148_v18  ;;  %v172_v20 = vpop.permute.xlu0 %171 }
  0xa7   :  { %vm156_vm4 = vmor %vm108_vm13, %vm152_vm15  ;;  %vm176_vm11 = vcmp.eq.s32.totalorder %v4639_v15, %v172_v20  ;;  %vm315_vm13 = vcmask 261120   ;;  %vm467_vm15 = vcmask 64512  }
  0xa8   :  { %vm180_vm8 = vmor %vm156_vm4, %vm176_vm11  ;;  %vm4526_vm11 = vmmov 0   ;;  %vm1488_vm4 = vcmask 195584  }
  0xaa   :  { %v166_v21 = vpop.permute.xlu1 %165 }
  0xab   :  { %vm174_vm7 = vcmp.eq.s32.totalorder %v4639_v15, %v166_v21 }
  0xac   :  { %vm178_vm6 = vmor %vm154_vm1, %vm174_vm7  ;;  %vm309_vm1 = vcmp.ge.s32.totalorder %v4700_v4, %v4639_v15 }
  0xad   :  { %vm3627_vm10 = vmpackc.low %vm178_vm6, %vm177_vm2 }
  0xae   :  { %3896 = vmatprep.mubr.msk.bf16.mxu0 %vm3627_vm10, %v4524_v22  ;;  %v169_v23 = vpop.permute.xlu1 %168 }
  0xaf   :  { %vm175_vm12 = vcmp.eq.s32.totalorder %v4639_v15, %v169_v23 }
  0xb0   :  { %vm179_vm0 = vmor %vm155_vm9, %vm175_vm12 }
  0xb1   :  { %vm3629_vm14 = vmpackc.low %vm180_vm8, %vm179_vm0 }
  0xb2   :  { %3897 = vmatmul.mubr.msk.bf16.vlgmr.msra.gmra.mrb[0].mxu0 %vm3629_vm14, %v4524_v22 }
 0x185   :  { %v3898_v25 = vpop.f32.mrb[0].mxu0 }
 0x186   :  { %v285_v26 = vpop.f32.mrb[1].mxu0  ;;  %v4677_v34 = vadd.f32 %v3898_v25, %v300_v24 }
 0x187   :  { %v4669_v28 = vadd.f32 %v300_v24, %v285_v26  ;;  %v3899_v29 = vpop.f32.mrb[2].mxu0 }
 0x188   :  { %v288_v30 = vpop.f32.mrb[3].mxu0  ;;  %v4671_v31 = vadd.f32 %v3899_v29, %v301_v27  ;;  %v322_v37 = vsel %vm315_vm13, %v4677_v34, 0.0 }
 0x189   :  { %v4673_v32 = vadd.f32 %v301_v27, %v288_v30  ;;  %v316_v33 = vsel %vm315_vm13, %v4669_v28, 0.0 }
 0x18a   :  { %317 = vadd.xlane.f32.xlu1 %v316_v33  ;;  %v325_v36 = vsel %vm315_vm13, %v4671_v31, 0.0 }
 0x18b   :  { %v319_v35 = vsel %vm315_vm13, %v4673_v32, 0.0 }
 0x18c   :  { %320 = vadd.xlane.f32.xlu0 %v319_v35 }
 0x18e   :  { %326 = vadd.xlane.f32.xlu1 %v325_v36 }
 0x190   :  { %323 = vadd.xlane.f32.xlu0 %v322_v37  ;;  %v4525_v37 = vmov 0.0  }
 0x191   :  { %3908 = vmatprep.subr.bf16.mxu1 %v4525_v37  ;;  %3938 = vmatprep.subr.bf16.mxu0 %v4525_v37 }
 0x192   :  { %3940 = vmatprep.mubr.msk.bf16.mxu0 %vm4526_vm11, %v4525_v37 }
 0x217   :  { %v318_v38 = vpop.xlane.xlu1 %317 }
 0x218   :  { %v329_v39 = vmul.f32 0.03125, %v318_v38  ;;  %v4720_v38 = vld [vmem:[%s5423_s7] sm:$0xf] }
 0x219   :  { %v321_v40 = vpop.xlane.xlu0 %320 }
 0x21a   :  { %v333_v41 = vsub.f32 %v4669_v28, %v329_v39  ;;  %v330_v42 = vmul.f32 0.03125, %v321_v40  ;;  %v394_v39 = vrot.slane %v4720_v38, %v4703_v9 }
 0x21b   :  { %v327_v43 = vpop.xlane.xlu1 %326 }
 0x21c   :  { %v334_v44 = vsub.f32 %v4673_v32, %v330_v42  ;;  %v332_v45 = vmul.f32 0.03125, %v327_v43  ;;  %v337_v46 = vmul.f32 %v333_v41, %v333_v41 }
 0x21d   :  { %v324_v47 = vpop.xlane.xlu0 %323 }
 0x21e   :  { %v336_v48 = vsub.f32 %v4671_v31, %v332_v45  ;;  %v331_v49 = vmul.f32 0.03125, %v324_v47  ;;  %v341_v50 = vsel %vm315_vm13, %v337_v46, 0.0  ;;  %v338_v51 = vmul.f32 %v334_v44, %v334_v44 }
 0x21f   :  { %342 = vadd.xlane.f32.xlu0 %v341_v50 }
 0x220   :  { %v335_v52 = vsub.f32 %v4677_v34, %v331_v49  ;;  %v344_v53 = vsel %vm315_vm13, %v338_v51, 0.0  ;;  %v340_v54 = vmul.f32 %v336_v48, %v336_v48 }
 0x221   :  { %345 = vadd.xlane.f32.xlu1 %v344_v53 }
 0x222   :  { %v339_v55 = vmul.f32 %v335_v52, %v335_v52  ;;  %v350_v56 = vsel %vm315_vm13, %v340_v54, 0.0  ;;  %v308_v54 = vadd.s32 8, %v4700_v4 }
 0x224   :  { %v347_v57 = vsel %vm315_vm13, %v339_v55, 0.0  ;;  %vm310_vm2 = vcmp.ge.s32.totalorder %v308_v54, %v4639_v15  ;;  %v4528_v55 = vmov -1e+30  }
 0x225   :  { %351 = vadd.xlane.f32.xlu1 %v350_v56  ;;  %348 = vadd.xlane.f32.xlu0 %v347_v57  ;;  %v4752_v56 = vsel %vm309_vm1, 0.0, %v4528_v55  ;;  %v4754_v57 = vsel %vm310_vm2, 0.0, %v4528_v55 }
 0x2ac   :  { %v343_v60 = vpop.xlane.xlu0 %342 }
 0x2ad   :  { %v353_v61 = vmul.f32 0.03125, %v343_v60 }
 0x2ae   :  { %v346_v62 = vpop.xlane.xlu1 %345 }
 0x2af   :  { %v357_v63 = vadd.f32 1e-05, %v353_v61  ;;  %v354_v0 = vmul.f32 0.03125, %v346_v62 }
 0x2b1   :  { %4332 = vrsqrt.f32 %v357_v63  ;;  %v358_v1 = vadd.f32 1e-05, %v354_v0 }
 0x2b2   :  { %v352_v2 = vpop.xlane.xlu1 %351  ;;  %v349_v3 = vpop.xlane.xlu0 %348 }
 0x2b3   :  { %4334 = vrsqrt.f32 %v358_v1  ;;  %v356_v5 = vmul.f32 0.03125, %v352_v2  ;;  %v355_v6 = vmul.f32 0.03125, %v349_v3 }
 0x2b5   :  { %v360_v7 = vadd.f32 1e-05, %v356_v5  ;;  %v359_v8 = vadd.f32 1e-05, %v355_v6 }
 0x2b7   :  { %4336 = vrsqrt.f32 %v360_v7 }
 0x2b8   :  { %4338 = vrsqrt.f32 %v359_v8 }
 0x2bb   :  { %v4333_v12 = vpop.eup %4332 }
 0x2bc   :  { %v365_v14 = vmul.f32 %v4333_v12, %v333_v41 }
 0x2bd   :  { %v4335_v16 = vpop.eup %4334 }
 0x2be   :  { %v366_v17 = vmul.f32 %v4335_v16, %v334_v44  ;;  %v373_v18 = vmul.f32 %v372_v11, %v365_v14 }
 0x2c0   :  { %v374_v20 = vmul.f32 %v372_v11, %v366_v17  ;;  %v381_v23 = vadd.f32 %v380_v19, %v373_v18 }
 0x2c1   :  { %v4337_v21 = vpop.eup %4336 }
 0x2c2   :  { %v4339_v22 = vpop.eup %4338  ;;  %v382_v24 = vadd.f32 %v380_v19, %v374_v20  ;;  %v368_v25 = vmul.f32 %v4337_v21, %v336_v48 }
 0x2c3   :  { %v367_v26 = vmul.f32 %v4339_v22, %v335_v52 }
 0x2c4   :  { %v385_v27 = vpack.c.bf16 %v382_v24, %v381_v23  ;;  %v376_v29 = vmul.f32 %v372_v11, %v368_v25 }
 0x2c5   :  { %v375_v30 = vmul.f32 %v372_v11, %v367_v26 }
 0x2c6   :  { %3904 = vmatprep.mubr.msk.bf16.mxu1 %vm315_vm13, %v385_v27  ;;  %v384_v33 = vadd.f32 %v380_v19, %v376_v29 }
 0x2c7   :  { %v383_v35 = vadd.f32 %v380_v19, %v375_v30 }
 0x2c9   :  { %v386_v36 = vpack.c.bf16 %v384_v33, %v383_v35 }
 0x2cb   :  { %3905 = vmatmul.mubr.msk.bf16.vlgmr.msra.gmra.mrb[0].mxu1 %vm315_vm13, %v386_v36 }
 0x2cc   :  { %3910 = vmatprep.mubr.msk.bf16.mxu1 %vm4526_vm11, %v4525_v37 }
 0x39e   :  { %v3906_v40 = vpop.f32.mrb[0].mxu1 }
 0x39f   :  { %v447_v41 = vpop.f32.mrb[1].mxu1  ;;  %v456_v43 = vadd.f32 %v3906_v40, %v394_v39 }
 0x3a0   :  { %v3907_v42 = vpop.f32.mrb[2].mxu1  ;;  %v448_v46 = vadd.f32 %v447_v41, %v394_v39 }
 0x3a1   :  { %v459_v44 = vadd.f32 %v3907_v42, %v394_v39  ;;  %v450_v45 = vpop.f32.mrb[3].mxu1 }
 0x3a2   :  { %v451_v47 = vadd.f32 %v450_v45, %v394_v39 }
 0x3a3   :  { %v4728_v48 = vpack.c.bf16 %v459_v44, %v456_v43 }
 0x3a4   :  { %v4730_v49 = vpack.c.bf16 %v451_v47, %v448_v46 }
 0x3a5   :  { %516 = vrot.lane.b32.xlu1 %v4728_v48, %s4527_s30 }
 0x3a6   :  { %465 = vrot.lane.b32.xlu0 %v4730_v49, %s4527_s30 }
 0x417   :  { %v517_v52 = vpop.permute.xlu1 %516 }
 0x418   :  { %v466_v50 = vpop.permute.xlu0 %465  ;;  %v522_v53 = vsel %vm467_vm15, %v517_v52, 0 }
 0x419   :  { %v472_v51 = vsel %vm467_vm15, %v466_v50, 0 }
 0x41a   :  { %3909 = vmatpush3.bf16.xpose.msra.mxu1 %v472_v51 }
 0x41b   :  { %3914 = vmatprep.subr.bf16.mxu1 %v4525_v37 }
 0x421   :  { %3911 = vmatmul.mubr.msk.bf16.vlgmr.msra.gmra.mrb[4].mxu1 %vm467_vm15, %v4730_v49 }
 0x422   :  { %3915 = vmatpush3.bf16.xpose.msra.mxu1 %v522_v53  ;;  %3916 = vmatprep.mubr.msk.bf16.mxu1 %vm4526_vm11, %v4525_v37 }
 0x423   :  { %3920 = vmatprep.subr.bf16.mxu1 %v4525_v37 }
 0x429   :  { %3917 = vmatmul.mubr.msk.bf16.vlgmr.msra.gmra.mrb[8].mxu1 %vm467_vm15, %v4728_v48 }
 0x42a   :  { %3922 = vmatprep.mubr.msk.bf16.mxu1 %vm4526_vm11, %v4525_v37 }
 0x4f4   :  { %v508_v58 = vpop.f32.mrb[4].mxu1 }
 0x4f5   :  { %v509_v59 = vadd.f32 %v508_v58, %v4752_v56  ;;  %v3912_v60 = vpop.f32.mrb[5].mxu1 }
 0x4f6   :  { %v511_v61 = vpop.f32.mrb[6].mxu1 }
 0x4f7   :  { %v512_v62 = vadd.f32 %v511_v61, %v4754_v57  ;;  %v3913_v63 = vpop.f32.mrb[7].mxu1  ;;  %v566_v0 = vsel %vm565_vm3, %v509_v59, -inf }
 0x4f8   :  { %567 = vmax.xlane.f32.xlu1 %v566_v0 }
 0x4f9   :  { %v569_v1 = vsel %vm565_vm3, %v512_v62, -inf }
 0x4fa   :  { %570 = vmax.xlane.f32.xlu0 %v569_v1 }
 0x4fc   :  { %v558_v15 = vpop.f32.mrb[8].mxu1 }
 0x4fd   :  { %v559_v2 = vadd.f32 %v558_v15, %v4752_v56  ;;  %v3918_v3 = vpop.f32.mrb[9].mxu1 }
 0x4fe   :  { %v561_v5 = vpop.f32.mrb[10].mxu1 }
 0x4ff   :  { %v562_v6 = vadd.f32 %v561_v5, %v4754_v57  ;;  %v3919_v7 = vpop.f32.mrb[11].mxu1  ;;  %v572_v8 = vsel %vm565_vm3, %v559_v2, -inf }
 0x500   :  { %573 = vmax.xlane.f32.xlu0 %v572_v8 }
 0x501   :  { %v575_v10 = vsel %vm565_vm3, %v562_v6, -inf }
 0x502   :  { %576 = vmax.xlane.f32.xlu1 %v575_v10 }
 0x513   :  { %659 = vrot.lane.b32.xlu1 %v4728_v48, %s4529_s12 }
 0x585   :  { %v568_v11 = vpop.xlane.xlu1 %567 }
 0x586   :  { %v578_v12 = vsub.f32 %v509_v59, %v568_v11 }
 0x587   :  { %v571_v14 = vpop.xlane.xlu0 %570 }
 0x588   :  { %v582_v16 = vmul.f32 1.442695, %v578_v12  ;;  %v579_v17 = vsub.f32 %v512_v62, %v571_v14 }
 0x58a   :  { %4340 = vpow2.f32 %v582_v16  ;;  %v584_v18 = vmul.f32 1.442695, %v579_v17 }
 0x58c   :  { %4342 = vpow2.f32 %v584_v18 }
 0x58d   :  { %v574_v29 = vpop.xlane.xlu0 %573 }
 0x58e   :  { %v580_v30 = vsub.f32 %v559_v2, %v574_v29 }
 0x58f   :  { %v577_v19 = vpop.xlane.xlu1 %576 }
 0x590   :  { %v581_v20 = vsub.f32 %v562_v6, %v577_v19  ;;  %v586_v33 = vmul.f32 1.442695, %v580_v30 }
 0x592   :  { %v588_v21 = vmul.f32 1.442695, %v581_v20 }
 0x593   :  { %v660_v39 = vpop.permute.xlu1 %659 }
 0x594   :  { %v4341_v22 = vpop.eup %4340  ;;  %4344 = vpow2.f32 %v588_v21 }
 0x595   :  { %v590_v23 = vsel %vm565_vm3, %v4341_v22, 0.0  ;;  %4346 = vpow2.f32 %v586_v33 }
 0x596   :  { %v4343_v24 = vpop.eup %4342  ;;  %591 = vadd.xlane.f32.xlu0 %v590_v23 }
 0x597   :  { %v593_v25 = vsel %vm565_vm3, %v4343_v24, 0.0 }
 0x598   :  { %594 = vadd.xlane.f32.xlu1 %v593_v25 }
 0x59e   :  { %v4345_v26 = vpop.eup %4344 }
 0x59f   :  { %v599_v27 = vsel %vm565_vm3, %v4345_v26, 0.0  ;;  %v4347_v35 = vpop.eup %4346 }
 0x5a0   :  { %600 = vadd.xlane.f32.xlu1 %v599_v27  ;;  %v596_v36 = vsel %vm565_vm3, %v4347_v35, 0.0 }
 0x5ac   :  { %612 = vrot.lane.b32.xlu0 %v4730_v49, %s4529_s12 }
 0x5b1   :  { %708 = vrot.lane.b32.xlu1 %v4730_v49, %s4530_s13 }
 0x5b5   :  { %706 = vrot.lane.b32.xlu1 %v4730_v49, %s4531_s14 }
 0x5cb   :  { %597 = vadd.xlane.f32.xlu0 %v596_v36 }
 0x5e1   :  { %759 = vrot.lane.b32.xlu0 %v4728_v48, %s4530_s13 }
 0x5e5   :  { %757 = vrot.lane.b32.xlu0 %v4728_v48, %s4531_s14 }
 0x623   :  { %v592_v40 = vpop.xlane.xlu0 %591 }
 0x624   :  { %4348 = vrcp.f32 %v592_v40 }
 0x625   :  { %v595_v41 = vpop.xlane.xlu1 %594 }
 0x626   :  { %4350 = vrcp.f32 %v595_v41 }
 0x627   :  { %v613_v42 = vpop.permute.xlu0 %612 }
 0x628   :  { %3921 = vmatpush3.bf16.msra.mxu1 %v613_v42 }
 0x629   :  { %3926 = vmatprep.subr.bf16.mxu1 %v4525_v37 }
 0x62d   :  { %v601_v50 = vpop.xlane.xlu1 %600 }
 0x62e   :  { %v4349_v43 = vpop.eup %4348  ;;  %4352 = vrcp.f32 %v601_v50 }
 0x62f   :  { %v606_v45 = vmul.f32 %v4349_v43, %v4341_v22 }
 0x630   :  { %v4351_v44 = vpop.eup %4350 }
 0x631   :  { %v607_v46 = vmul.f32 %v4351_v44, %v4343_v24  ;;  %v709_v61 = vpop.permute.xlu1 %708 }
 0x632   :  { %v714_v63 = vsel %vm467_vm15, %v709_v61, 0 }
 0x633   :  { %v610_v47 = vpack.c.bf16 %v607_v46, %v606_v45 }
 0x635   :  { %3923 = vmatmul.mubr.msk.bf16.vlgmr.msra.gmra.mrb[12].mxu1 %vm565_vm3, %v610_v47  ;;  %v707_v0 = vpop.permute.xlu1 %706 }
 0x636   :  { %3927 = vmatpush3.bf16.msra.mxu1 %v660_v39  ;;  %3928 = vmatprep.mubr.msk.bf16.mxu1 %vm4526_vm11, %v4525_v37 }
 0x637   :  { %3932 = vmatprep.subr.bf16.mxu1 %v4525_v37 }
 0x638   :  { %v4353_v54 = vpop.eup %4352 }
 0x639   :  { %v609_v58 = vmul.f32 %v4353_v54, %v4345_v26 }
 0x658   :  { %v598_v51 = vpop.xlane.xlu0 %597 }
 0x659   :  { %4354 = vrcp.f32 %v598_v51 }
 0x65c   :  { %v760_v52 = vpop.permute.xlu0 %759 }
 0x65d   :  { %v765_v53 = vsel %vm467_vm15, %v760_v52, 0 }
 0x65e   :  { %3939 = vmatpush3.bf16.xpose.msra.mxu0 %v765_v53 }
 0x65f   :  { %3950 = vmatprep.subr.bf16.mxu0 %v4525_v37 }
 0x660   :  { %v758_v60 = vpop.permute.xlu0 %757 }
 0x663   :  { %v4355_v55 = vpop.eup %4354 }
 0x664   :  { %v608_v59 = vmul.f32 %v4355_v55, %v4347_v35 }
 0x665   :  { %3941 = vmatmul.mubr.msk.bf16.vlgmr.msra.gmra.mrb[4].mxu0 %vm467_vm15, %v758_v60 }
 0x666   :  { %v611_v62 = vpack.c.bf16 %v609_v58, %v608_v59  ;;  %3952 = vmatprep.mubr.msk.bf16.mxu0 %vm4526_vm11, %v4525_v37 }
 0x668   :  { %3929 = vmatmul.mubr.msk.bf16.vlgmr.msra.gmra.mrb[16].mxu1 %vm565_vm3, %v611_v62 }
 0x669   :  { %3933 = vmatpush3.bf16.xpose.msra.mxu1 %v714_v63  ;;  %3934 = vmatprep.mubr.msk.bf16.mxu1 %vm4526_vm11, %v4525_v37 }
 0x66a   :  { %3944 = vmatprep.subr.bf16.mxu1 %v4525_v37 }
 0x670   :  { %3935 = vmatmul.mubr.msk.bf16.vlgmr.msra.gmra.mrb[20].mxu1 %vm467_vm15, %v707_v0 }
 0x671   :  { %3946 = vmatprep.mubr.msk.bf16.mxu1 %vm4526_vm11, %v4525_v37 }
 0x708   :  { %v4798_v1 = vpop.f32.mrb[12].mxu1 }
 0x709   :  { %v3924_v15 = vpop.f32.mrb[13].mxu1 }
 0x70a   :  { %v4800_v2 = vpop.f32.mrb[14].mxu1 }
 0x70b   :  { %v3925_v3 = vpop.f32.mrb[15].mxu1 }
 0x738   :  { %v801_v5 = vpop.f32.mrb[4].mxu0 }
 0x739   :  { %v3942_v6 = vpop.f32.mrb[5].mxu0  ;;  %v802_v24 = vadd.f32 %v801_v5, %v4752_v56 }
 0x73a   :  { %v804_v7 = vpop.f32.mrb[6].mxu0 }
 0x73b   :  { %v4802_v8 = vpop.f32.mrb[16].mxu1  ;;  %v3943_v10 = vpop.f32.mrb[7].mxu0  ;;  %v805_v20 = vadd.f32 %v804_v7, %v4754_v57  ;;  %v814_v27 = vsel %vm565_vm3, %v802_v24, -inf }
 0x73c   :  { %v3930_v11 = vpop.f32.mrb[17].mxu1 }
 0x73d   :  { %v4804_v12 = vpop.f32.mrb[18].mxu1  ;;  %v817_v26 = vsel %vm565_vm3, %v805_v20, -inf }
 0x73e   :  { %v3931_v14 = vpop.f32.mrb[19].mxu1 }
 0x743   :  { %v750_v16 = vpop.f32.mrb[20].mxu1 }
 0x744   :  { %v751_v17 = vadd.f32 %v750_v16, %v4752_v56  ;;  %v3936_v18 = vpop.f32.mrb[21].mxu1 }
 0x745   :  { %v753_v19 = vpop.f32.mrb[22].mxu1 }
 0x746   :  { %v754_v21 = vadd.f32 %v753_v19, %v4754_v57  ;;  %v3937_v22 = vpop.f32.mrb[23].mxu1  ;;  %v808_v23 = vsel %vm565_vm3, %v751_v17, -inf }
 0x747   :  { %809 = vmax.xlane.f32.xlu1 %v808_v23 }
 0x748   :  { %v811_v25 = vsel %vm565_vm3, %v754_v21, -inf }
 0x749   :  { %812 = vmax.xlane.f32.xlu0 %v811_v25 }
 0x74b   :  { %818 = vmax.xlane.f32.xlu1 %v817_v26 }
 0x74d   :  { %815 = vmax.xlane.f32.xlu0 %v814_v27 }
 0x7d4   :  { %v810_v29 = vpop.xlane.xlu1 %809 }
 0x7d5   :  { %v820_v47 = vsub.f32 %v751_v17, %v810_v29 }
 0x7d6   :  { %v813_v30 = vpop.xlane.xlu0 %812 }
 0x7d7   :  { %v821_v46 = vsub.f32 %v754_v21, %v813_v30  ;;  %v824_v51 = vmul.f32 1.442695, %v820_v47 }
 0x7d8   :  { %v819_v33 = vpop.xlane.xlu1 %818 }
 0x7d9   :  { %v823_v35 = vsub.f32 %v805_v20, %v819_v33  ;;  %v826_v50 = vmul.f32 1.442695, %v821_v46 }
 0x7da   :  { %v816_v36 = vpop.xlane.xlu0 %815 }
 0x7db   :  { %v830_v39 = vmul.f32 1.442695, %v823_v35  ;;  %v822_v40 = vsub.f32 %v802_v24, %v816_v36 }
 0x7dd   :  { %4356 = vpow2.f32 %v830_v39  ;;  %v828_v41 = vmul.f32 1.442695, %v822_v40 }
 0x7df   :  { %4358 = vpow2.f32 %v828_v41 }
 0x7e0   :  { %4360 = vpow2.f32 %v826_v50 }
 0x7e1   :  { %4362 = vpow2.f32 %v824_v51 }
 0x7e7   :  { %v4357_v42 = vpop.eup %4356 }
 0x7e8   :  { %v841_v43 = vsel %vm565_vm3, %v4357_v42, 0.0 }
 0x7e9   :  { %v4359_v44 = vpop.eup %4358  ;;  %842 = vadd.xlane.f32.xlu1 %v841_v43 }
 0x7ea   :  { %v838_v45 = vsel %vm565_vm3, %v4359_v44, 0.0  ;;  %v4361_v52 = vpop.eup %4360 }
 0x7eb   :  { %839 = vadd.xlane.f32.xlu0 %v838_v45  ;;  %v4363_v53 = vpop.eup %4362  ;;  %v835_v54 = vsel %vm565_vm3, %v4361_v52, 0.0 }
 0x7ec   :  { %v832_v55 = vsel %vm565_vm3, %v4363_v53, 0.0 }
 0x7fa   :  { %901 = vrot.lane.b32.xlu1 %v4728_v48, %s4532_s15 }
 0x801   :  { %854 = vrot.lane.b32.xlu0 %v4730_v49, %s4532_s15 }
 0x81e   :  { %836 = vadd.xlane.f32.xlu1 %v835_v54 }
 0x820   :  { %833 = vadd.xlane.f32.xlu0 %v832_v55 }
 0x82f   :  { %950 = vrot.lane.b32.xlu1 %v4730_v49, %s4533_s16 }
 0x833   :  { %948 = vrot.lane.b32.xlu1 %v4730_v49, %s4534_s17 }
 0x836   :  { %1001 = vrot.lane.b32.xlu0 %v4728_v48, %s4533_s16 }
 0x83a   :  { %999 = vrot.lane.b32.xlu0 %v4728_v48, %s4534_s17 }
 0x876   :  { %v843_v58 = vpop.xlane.xlu1 %842 }
 0x877   :  { %4364 = vrcp.f32 %v843_v58 }
 0x878   :  { %v840_v59 = vpop.xlane.xlu0 %839 }
 0x879   :  { %4366 = vrcp.f32 %v840_v59 }
 0x87a   :  { %v902_v60 = vpop.permute.xlu1 %901 }
 0x87b   :  { %3951 = vmatpush3.bf16.msra.mxu0 %v902_v60 }
 0x87c   :  { %v855_v61 = vpop.permute.xlu0 %854  ;;  %3962 = vmatprep.subr.bf16.mxu0 %v4525_v37 }
 0x87d   :  { %3945 = vmatpush3.bf16.msra.mxu1 %v855_v61 }
 0x87e   :  { %3956 = vmatprep.subr.bf16.mxu1 %v4525_v37 }
 0x881   :  { %v4365_v62 = vpop.eup %4364 }
 0x882   :  { %v851_v0 = vmul.f32 %v4365_v62, %v4357_v42 }
 0x883   :  { %v4367_v63 = vpop.eup %4366 }
 0x884   :  { %v850_v15 = vmul.f32 %v4367_v63, %v4359_v44 }
 0x886   :  { %v853_v3 = vpack.c.bf16 %v851_v0, %v850_v15 }
 0x888   :  { %3953 = vmatmul.mubr.msk.bf16.vlgmr.msra.gmra.mrb[8].mxu0 %vm565_vm3, %v853_v3 }
 0x889   :  { %3964 = vmatprep.mubr.msk.bf16.mxu0 %vm4526_vm11, %v4525_v37 }
 0x8ab   :  { %v837_v5 = vpop.xlane.xlu1 %836 }
 0x8ac   :  { %4368 = vrcp.f32 %v837_v5 }
 0x8ad   :  { %v834_v6 = vpop.xlane.xlu0 %833 }
 0x8ae   :  { %4370 = vrcp.f32 %v834_v6 }
 0x8af   :  { %v951_v19 = vpop.permute.xlu1 %950 }
 0x8b0   :  { %v956_v21 = vsel %vm467_vm15, %v951_v19, 0 }
 0x8b1   :  { %v1002_v7 = vpop.permute.xlu0 %1001 }
 0x8b2   :  { %v1007_v10 = vsel %vm467_vm15, %v1002_v7, 0 }
 0x8b3   :  { %3963 = vmatpush3.bf16.xpose.msra.mxu0 %v1007_v10  ;;  %v949_v22 = vpop.permute.xlu1 %948 }
 0x8b4   :  { %3974 = vmatprep.subr.bf16.mxu0 %v4525_v37 }
 0x8b5   :  { %v1000_v18 = vpop.permute.xlu0 %999 }
 0x8b6   :  { %v4369_v11 = vpop.eup %4368 }
 0x8b7   :  { %v849_v16 = vmul.f32 %v4369_v11, %v4361_v52 }
 0x8b8   :  { %v4371_v14 = vpop.eup %4370 }
 0x8b9   :  { %v848_v17 = vmul.f32 %v4371_v14, %v4363_v53 }
 0x8ba   :  { %3965 = vmatmul.mubr.msk.bf16.vlgmr.msra.gmra.mrb[12].mxu0 %vm467_vm15, %v1000_v18 }
 0x8bb   :  { %v852_v20 = vpack.c.bf16 %v849_v16, %v848_v17  ;;  %3976 = vmatprep.mubr.msk.bf16.mxu0 %vm4526_vm11, %v4525_v37 }
 0x8bd   :  { %3947 = vmatmul.mubr.msk.bf16.vlgmr.msra.gmra.mrb[24].mxu1 %vm565_vm3, %v852_v20 }
 0x8be   :  { %3957 = vmatpush3.bf16.xpose.msra.mxu1 %v956_v21  ;;  %3958 = vmatprep.mubr.msk.bf16.mxu1 %vm4526_vm11, %v4525_v37 }
 0x8bf   :  { %3968 = vmatprep.subr.bf16.mxu1 %v4525_v37 }
 0x8c5   :  { %3959 = vmatmul.mubr.msk.bf16.vlgmr.msra.gmra.mrb[28].mxu1 %vm467_vm15, %v949_v22 }
 0x8c6   :  { %3970 = vmatprep.mubr.msk.bf16.mxu1 %vm4526_vm11, %v4525_v37 }
 0x95b   :  { %v4848_v23 = vpop.f32.mrb[8].mxu0 }
 0x95c   :  { %v3954_v24 = vpop.f32.mrb[9].mxu0 }
 0x95d   :  { %v4850_v25 = vpop.f32.mrb[10].mxu0 }
 0x95e   :  { %v4239_v26 = vpack.i.bf16 %v4850_v25, %v4848_v23  ;;  %v3955_v27 = vpop.f32.mrb[11].mxu0 }
 0x98d   :  { %v1043_v29 = vpop.f32.mrb[12].mxu0 }
 0x98e   :  { %v3966_v30 = vpop.f32.mrb[13].mxu0  ;;  %v1044_v53 = vadd.f32 %v1043_v29, %v4752_v56 }
 0x98f   :  { %v1046_v33 = vpop.f32.mrb[14].mxu0 }
 0x990   :  { %v4854_v35 = vpop.f32.mrb[24].mxu1  ;;  %v3967_v36 = vpop.f32.mrb[15].mxu0  ;;  %v1047_v47 = vadd.f32 %v1046_v33, %v4754_v57  ;;  %v1056_v58 = vsel %vm565_vm3, %v1044_v53, -inf }
 0x991   :  { %v3948_v39 = vpop.f32.mrb[25].mxu1 }
 0x992   :  { %v4856_v40 = vpop.f32.mrb[26].mxu1  ;;  %v1059_v55 = vsel %vm565_vm3, %v1047_v47, -inf }
 0x993   :  { %v4234_v41 = vpack.i.bf16 %v4856_v40, %v4854_v35  ;;  %v3949_v42 = vpop.f32.mrb[27].mxu1 }
 0x998   :  { %v992_v43 = vpop.f32.mrb[28].mxu1 }
 0x999   :  { %v993_v44 = vadd.f32 %v992_v43, %v4752_v56  ;;  %v3960_v45 = vpop.f32.mrb[29].mxu1 }
 0x99a   :  { %v995_v46 = vpop.f32.mrb[30].mxu1 }
 0x99b   :  { %v996_v50 = vadd.f32 %v995_v46, %v4754_v57  ;;  %v3961_v51 = vpop.f32.mrb[31].mxu1  ;;  %v1050_v52 = vsel %vm565_vm3, %v993_v44, -inf }
 0x99c   :  { %1051 = vmax.xlane.f32.xlu1 %v1050_v52 }
 0x99d   :  { %v1053_v54 = vsel %vm565_vm3, %v996_v50, -inf }
 0x99e   :  { %1054 = vmax.xlane.f32.xlu0 %v1053_v54 }
 0x9a0   :  { %1060 = vmax.xlane.f32.xlu1 %v1059_v55 }
 0x9a2   :  { %1057 = vmax.xlane.f32.xlu0 %v1056_v58 }
 0xa29   :  { %v1052_v59 = vpop.xlane.xlu1 %1051 }
 0xa2a   :  { %v1062_v14 = vsub.f32 %v993_v44, %v1052_v59 }
 0xa2b   :  { %v1055_v60 = vpop.xlane.xlu0 %1054 }
 0xa2c   :  { %v1063_v11 = vsub.f32 %v996_v50, %v1055_v60  ;;  %v1066_v17 = vmul.f32 1.442695, %v1062_v14 }
 0xa2d   :  { %v1061_v61 = vpop.xlane.xlu1 %1060 }
 0xa2e   :  { %v1065_v62 = vsub.f32 %v1047_v47, %v1061_v61  ;;  %v1068_v16 = vmul.f32 1.442695, %v1063_v11 }
 0xa2f   :  { %v1058_v63 = vpop.xlane.xlu0 %1057 }
 0xa30   :  { %v1072_v0 = vmul.f32 1.442695, %v1065_v62  ;;  %v1064_v15 = vsub.f32 %v1044_v53, %v1058_v63 }
 0xa32   :  { %4372 = vpow2.f32 %v1072_v0  ;;  %v1070_v3 = vmul.f32 1.442695, %v1064_v15 }
 0xa34   :  { %4374 = vpow2.f32 %v1070_v3 }
 0xa35   :  { %4376 = vpow2.f32 %v1068_v16 }
 0xa36   :  { %4378 = vpow2.f32 %v1066_v17 }
 0xa3c   :  { %v4373_v5 = vpop.eup %4372 }
 0xa3d   :  { %v1083_v6 = vsel %vm565_vm3, %v4373_v5, 0.0 }
 0xa3e   :  { %v4375_v7 = vpop.eup %4374  ;;  %1084 = vadd.xlane.f32.xlu1 %v1083_v6 }
 0xa3f   :  { %v1080_v10 = vsel %vm565_vm3, %v4375_v7, 0.0  ;;  %v4377_v18 = vpop.eup %4376 }
 0xa40   :  { %1081 = vadd.xlane.f32.xlu0 %v1080_v10  ;;  %v4379_v19 = vpop.eup %4378  ;;  %v1077_v20 = vsel %vm565_vm3, %v4377_v18, 0.0 }
 0xa41   :  { %v1074_v21 = vsel %vm565_vm3, %v4379_v19, 0.0 }
 0xa4f   :  { %1143 = vrot.lane.b32.xlu1 %v4728_v48, %s4535_s18 }
 0xa56   :  { %1096 = vrot.lane.b32.xlu0 %v4730_v49, %s4535_s18 }
 0xa73   :  { %1078 = vadd.xlane.f32.xlu1 %v1077_v20 }
 0xa75   :  { %1075 = vadd.xlane.f32.xlu0 %v1074_v21 }
 0xa84   :  { %1192 = vrot.lane.b32.xlu1 %v4730_v49, %s4536_s19 }
 0xa88   :  { %1190 = vrot.lane.b32.xlu1 %v4730_v49, %s4537_s20 }
 0xa8b   :  { %1243 = vrot.lane.b32.xlu0 %v4728_v48, %s4536_s19 }
 0xa8f   :  { %1241 = vrot.lane.b32.xlu0 %v4728_v48, %s4537_s20 }
 0xacb   :  { %v1085_v22 = vpop.xlane.xlu1 %1084 }
 0xacc   :  { %4380 = vrcp.f32 %v1085_v22 }
 0xacd   :  { %v1082_v24 = vpop.xlane.xlu0 %1081 }
 0xace   :  { %4382 = vrcp.f32 %v1082_v24 }
 0xacf   :  { %v1144_v27 = vpop.permute.xlu1 %1143 }
 0xad0   :  { %3975 = vmatpush3.bf16.msra.mxu0 %v1144_v27 }
 0xad1   :  { %v1097_v29 = vpop.permute.xlu0 %1096  ;;  %3986 = vmatprep.subr.bf16.mxu0 %v4525_v37 }
 0xad2   :  { %3969 = vmatpush3.bf16.msra.mxu1 %v1097_v29 }
 0xad3   :  { %3980 = vmatprep.subr.bf16.mxu1 %v4525_v37 }
 0xad6   :  { %v4381_v30 = vpop.eup %4380 }
 0xad7   :  { %v1093_v36 = vmul.f32 %v4381_v30, %v4373_v5 }
 0xad8   :  { %v4383_v33 = vpop.eup %4382 }
 0xad9   :  { %v1092_v39 = vmul.f32 %v4383_v33, %v4375_v7 }
 0xadb   :  { %v1095_v42 = vpack.c.bf16 %v1093_v36, %v1092_v39 }
 0xadd   :  { %3977 = vmatmul.mubr.msk.bf16.vlgmr.msra.gmra.mrb[16].mxu0 %vm565_vm3, %v1095_v42 }
 0xade   :  { %3988 = vmatprep.mubr.msk.bf16.mxu0 %vm4526_vm11, %v4525_v37 }
 0xb00   :  { %v1079_v43 = vpop.xlane.xlu1 %1078 }
 0xb01   :  { %4384 = vrcp.f32 %v1079_v43 }
 0xb02   :  { %v1076_v44 = vpop.xlane.xlu0 %1075 }
 0xb03   :  { %4386 = vrcp.f32 %v1076_v44 }
 0xb04   :  { %v1193_v54 = vpop.permute.xlu1 %1192 }
 0xb05   :  { %v1198_v58 = vsel %vm467_vm15, %v1193_v54, 0 }
 0xb06   :  { %v1244_v45 = vpop.permute.xlu0 %1243 }
 0xb07   :  { %v1249_v46 = vsel %vm467_vm15, %v1244_v45, 0 }
 0xb08   :  { %3987 = vmatpush3.bf16.xpose.msra.mxu0 %v1249_v46  ;;  %v1191_v59 = vpop.permute.xlu1 %1190 }
 0xb09   :  { %3998 = vmatprep.subr.bf16.mxu0 %v4525_v37 }
 0xb0a   :  { %v1242_v53 = vpop.permute.xlu0 %1241 }
 0xb0b   :  { %v4385_v47 = vpop.eup %4384 }
 0xb0c   :  { %v1091_v51 = vmul.f32 %v4385_v47, %v4377_v18 }
 0xb0d   :  { %v4387_v50 = vpop.eup %4386 }
 0xb0e   :  { %v1090_v52 = vmul.f32 %v4387_v50, %v4379_v19 }
 0xb0f   :  { %3989 = vmatmul.mubr.msk.bf16.vlgmr.msra.gmra.mrb[20].mxu0 %vm467_vm15, %v1242_v53 }
 0xb10   :  { %v1094_v55 = vpack.c.bf16 %v1091_v51, %v1090_v52  ;;  %4000 = vmatprep.mubr.msk.bf16.mxu0 %vm4526_vm11, %v4525_v37 }
 0xb12   :  { %3971 = vmatmul.mubr.msk.bf16.vlgmr.msra.gmra.mrb[32].mxu1 %vm565_vm3, %v1094_v55 }
 0xb13   :  { %3981 = vmatpush3.bf16.xpose.msra.mxu1 %v1198_v58  ;;  %3982 = vmatprep.mubr.msk.bf16.mxu1 %vm4526_vm11, %v4525_v37 }
 0xb14   :  { %3992 = vmatprep.subr.bf16.mxu1 %v4525_v37 }
 0xb1a   :  { %3983 = vmatmul.mubr.msk.bf16.vlgmr.msra.gmra.mrb[36].mxu1 %vm467_vm15, %v1191_v59 }
 0xb1b   :  { %3994 = vmatprep.mubr.msk.bf16.mxu1 %vm4526_vm11, %v4525_v37 }
 0xbb0   :  { %v4902_v60 = vpop.f32.mrb[16].mxu0 }
 0xbb1   :  { %v3978_v61 = vpop.f32.mrb[17].mxu0 }
 0xbb2   :  { %v4904_v62 = vpop.f32.mrb[18].mxu0 }
 0xbb3   :  { %v4249_v63 = vpack.i.bf16 %v4904_v62, %v4902_v60  ;;  %v3979_v0 = vpop.f32.mrb[19].mxu0 }
 0xbe2   :  { %v1285_v15 = vpop.f32.mrb[20].mxu0 }
 0xbe3   :  { %v3990_v3 = vpop.f32.mrb[21].mxu0  ;;  %v1286_v29 = vadd.f32 %v1285_v15, %v4752_v56 }
 0xbe4   :  { %v1288_v5 = vpop.f32.mrb[22].mxu0 }
 0xbe5   :  { %v1136_v6 = vpop.f32.mrb[32].mxu1  ;;  %v3991_v7 = vpop.f32.mrb[23].mxu0  ;;  %v1289_v21 = vadd.f32 %v1288_v5, %v4754_v57  ;;  %v1298_v36 = vsel %vm565_vm3, %v1286_v29, -inf }
 0xbe6   :  { %v3972_v10 = vpop.f32.mrb[33].mxu1 }
 0xbe7   :  { %v1139_v11 = vpop.f32.mrb[34].mxu1  ;;  %v1301_v33 = vsel %vm565_vm3, %v1289_v21, -inf }
 0xbe8   :  { %v4244_v14 = vpack.i.bf16 %v1139_v11, %v1136_v6  ;;  %v3973_v16 = vpop.f32.mrb[35].mxu1 }
 0xbe9   :  { %v4304_v16 = vld [vmem:[%s5424_s4] sm:$0xff]  }
 0xbed   :  { %v1234_v17 = vpop.f32.mrb[36].mxu1 }
 0xbee   :  { %v1235_v18 = vadd.f32 %v1234_v17, %v4752_v56  ;;  %v3984_v19 = vpop.f32.mrb[37].mxu1  ;;  %v4305_v17 = vld [vmem:[%s5424_s4 + $0x8] sm:$0xff]  }
 0xbef   :  { %v1237_v20 = vpop.f32.mrb[38].mxu1 }
 0xbf0   :  { %v1238_v22 = vadd.f32 %v1237_v20, %v4754_v57  ;;  %v3985_v24 = vpop.f32.mrb[39].mxu1  ;;  %v1292_v27 = vsel %vm565_vm3, %v1235_v18, -inf }
 0xbf1   :  { %1293 = vmax.xlane.f32.xlu1 %v1292_v27 }
 0xbf2   :  { %v1295_v30 = vsel %vm565_vm3, %v1238_v22, -inf }
 0xbf3   :  { %1296 = vmax.xlane.f32.xlu0 %v1295_v30 }
 0xbf5   :  { %1302 = vmax.xlane.f32.xlu1 %v1301_v33 }
 0xbf7   :  { %1299 = vmax.xlane.f32.xlu0 %v1298_v36 }
 0xc7e   :  { %v1294_v39 = vpop.xlane.xlu1 %1293 }
 0xc7f   :  { %v1304_v45 = vsub.f32 %v1235_v18, %v1294_v39 }
 0xc80   :  { %v1297_v42 = vpop.xlane.xlu0 %1296 }
 0xc81   :  { %v1305_v43 = vsub.f32 %v1238_v22, %v1297_v42  ;;  %v1308_v53 = vmul.f32 1.442695, %v1304_v45 }
 0xc82   :  { %v1303_v44 = vpop.xlane.xlu1 %1302 }
 0xc83   :  { %v1307_v46 = vsub.f32 %v1289_v21, %v1303_v44  ;;  %v1310_v47 = vmul.f32 1.442695, %v1305_v43 }
 0xc84   :  { %v1300_v50 = vpop.xlane.xlu0 %1299 }
 0xc85   :  { %v1314_v51 = vmul.f32 1.442695, %v1307_v46  ;;  %v1306_v52 = vsub.f32 %v1286_v29, %v1300_v50 }
 0xc87   :  { %4388 = vpow2.f32 %v1314_v51  ;;  %v1312_v54 = vmul.f32 1.442695, %v1306_v52 }
 0xc88   :  { %4390 = vpow2.f32 %v1310_v47 }
 0xc89   :  { %4392 = vpow2.f32 %v1312_v54 }
 0xc8a   :  { %4394 = vpow2.f32 %v1308_v53 }
 0xc91   :  { %v4389_v55 = vpop.eup %4388 }
 0xc92   :  { %v4391_v58 = vpop.eup %4390  ;;  %v1325_v59 = vsel %vm565_vm3, %v4389_v55, 0.0 }
 0xc93   :  { %v4393_v60 = vpop.eup %4392  ;;  %1326 = vadd.xlane.f32.xlu1 %v1325_v59  ;;  %v1319_v0 = vsel %vm565_vm3, %v4391_v58, 0.0 }
 0xc94   :  { %v1322_v61 = vsel %vm565_vm3, %v4393_v60, 0.0  ;;  %v4395_v62 = vpop.eup %4394 }
 0xc95   :  { %1323 = vadd.xlane.f32.xlu0 %v1322_v61  ;;  %v1316_v15 = vsel %vm565_vm3, %v4395_v62, 0.0 }
 0xc97   :  { %1320 = vadd.xlane.f32.xlu1 %v1319_v0 }
 0xc99   :  { %1317 = vadd.xlane.f32.xlu0 %v1316_v15 }
 0xca8   :  { %1385 = vrot.lane.b32.xlu1 %v4728_v48, %s4538_s1 }
 0xcac   :  { %4235 = vrot.lane.b32.xlu1 %v4234_v41, %s4539_s21 }
 0xcaf   :  { %1338 = vrot.lane.b32.xlu0 %v4730_v49, %s4538_s1 }
 0xcb0   :  { %4245 = vrot.lane.b32.xlu1 %v4244_v14, %s4540_s22 }
 0xcb3   :  { %4240 = vrot.lane.b32.xlu0 %v4239_v26, %s4539_s21 }
 0xcb7   :  { %4250 = vrot.lane.b32.xlu0 %v4249_v63, %s4540_s22 }
 0xd20   :  { %v1327_v48 = vpop.xlane.xlu1 %1326 }
 0xd21   :  { %4396 = vrcp.f32 %v1327_v48 }
 0xd22   :  { %v1324_v3 = vpop.xlane.xlu0 %1323 }
 0xd23   :  { %4398 = vrcp.f32 %v1324_v3 }
 0xd24   :  { %v1321_v5 = vpop.xlane.xlu1 %1320 }
 0xd25   :  { %4400 = vrcp.f32 %v1321_v5 }
 0xd26   :  { %v1318_v35 = vpop.xlane.xlu0 %1317 }
 0xd27   :  { %4402 = vrcp.f32 %v1318_v35 }
 0xd28   :  { %v1386_v40 = vpop.permute.xlu1 %1385 }
 0xd29   :  { %3999 = vmatpush3.bf16.msra.mxu0 %v1386_v40 }
 0xd2a   :  { %v1339_v49 = vpop.permute.xlu0 %1338 }
 0xd2b   :  { %v4397_v41 = vpop.eup %4396  ;;  %3993 = vmatpush3.bf16.msra.mxu1 %v1339_v49 }
 0xd2c   :  { %v1335_v7 = vmul.f32 %v4397_v41, %v4389_v55  ;;  %4004 = vmatprep.subr.bf16.mxu1 %v4304_v16  ;;  %v4236_v39 = vpop.permute.xlu1 %4235 }
 0xd2d   :  { %v4399_v6 = vpop.eup %4398  ;;  %v4238_v50 = vunpack.i.h.bf16 %v4236_v39  ;;  %v4237_v51 = vunpack.i.l.bf16 %v4236_v39 }
 0xd2e   :  { %v1334_v10 = vmul.f32 %v4399_v6, %v4393_v60  ;;  %v4241_v36 = vpop.permute.xlu0 %4240 }
 0xd2f   :  { %v4401_v23 = vpop.eup %4400  ;;  %v4243_v43 = vunpack.i.h.bf16 %v4241_v36  ;;  %v4242_v44 = vunpack.i.l.bf16 %v4241_v36 }
 0xd30   :  { %v1337_v25 = vpack.c.bf16 %v1335_v7, %v1334_v10  ;;  %v1333_v63 = vmul.f32 %v4401_v23, %v4391_v58  ;;  %v4246_v47 = vpop.permute.xlu1 %4245 }
 0xd31   :  { %v4403_v26 = vpop.eup %4402  ;;  %v1483_v53 = vsel %vm467_vm15, %v4804_v12, %v4243_v43  ;;  %v1482_v54 = vsel %vm467_vm15, %v4802_v8, %v4242_v44  ;;  %v4248_v59 = vunpack.i.h.bf16 %v4246_v47  ;;  %v4247_v60 = vunpack.i.l.bf16 %v4246_v47 }
 0xd32   :  { %v1332_v11 = vmul.f32 %v4403_v26, %v4395_v62  ;;  %4001 = vmatmul.mubr.msk.bf16.vlgmr.msra.gmra.mrb[24].mxu0 %vm565_vm3, %v1337_v25  ;;  %v4251_v42 = vpop.permute.xlu0 %4250  ;;  %v1481_v12 = vsel %vm467_vm15, %v4800_v2, %v4238_v50  ;;  %v1480_v8 = vsel %vm467_vm15, %v4798_v1, %v4237_v51  ;;  %v1502_v2 = vrot.slane %v4720_v38, %v4710_v13 }
 0xd33   :  { %v4253_v45 = vunpack.i.h.bf16 %v4251_v42  ;;  %v4252_v46 = vunpack.i.l.bf16 %v4251_v42  ;;  %v1484_v40 = vsel %vm565_vm3, %v1480_v8, %v4247_v60  ;;  %v1485_v49 = vsel %vm565_vm3, %v1481_v12, %v4248_v59 }
 0xd34   :  { %v1336_v14 = vpack.c.bf16 %v1333_v63, %v1332_v11 }
 0xd35   :  { %v1486_v61 = vsel %vm565_vm3, %v1482_v54, %v4252_v46  ;;  %v1487_v62 = vsel %vm565_vm3, %v1483_v53, %v4253_v45  ;;  %v4306_v53 = vld [vmem:[%s5425_s5] sm:$0xff]   ;;  %v4307_v54 = vld [vmem:[%s5425_s5 + $0x8] sm:$0xff]  }
 0xd36   :  { %3995 = vmatmul.mubr.msk.bf16.vlgmr.msra.gmra.mrb[40].mxu1 %vm565_vm3, %v1336_v14  ;;  %4012 = vmatprep.subr.bf16.mxu0 %v4306_v53 }
 0xd37   :  { %4005 = vmatpush3.bf16.msra.mxu1 %v4304_v16  ;;  %4013 = vmatpush3.bf16.msra.mxu0 %v4306_v53 }
 0xd38   :  { %4006 = vmatprep.subr.bf16.mxu1 %v4305_v17  ;;  %4014 = vmatprep.subr.bf16.mxu0 %v4307_v54 }
 0xd3b   :  { %4007 = vmatpush3.bf16.msra.mxu1 %v4305_v17  ;;  %4015 = vmatpush3.bf16.msra.mxu0 %v4307_v54 }
 0xe05   :  { %v1425_v18 = vpop.f32.mrb[24].mxu0 }
 0xe06   :  { %v4002_v19 = vpop.f32.mrb[25].mxu0 }
 0xe07   :  { %v1428_v20 = vpop.f32.mrb[26].mxu0 }
 0xe08   :  { %v4259_v21 = vpack.i.bf16 %v1428_v20, %v1425_v18  ;;  %v4003_v22 = vpop.f32.mrb[27].mxu0 }
 0xe09   :  { %v1378_v24 = vpop.f32.mrb[40].mxu1 }
 0xe0a   :  { %4260 = vrot.lane.b32.xlu0 %v4259_v21, %s4541_s25  ;;  %v3996_v27 = vpop.f32.mrb[41].mxu1 }
 0xe0b   :  { %v1381_v29 = vpop.f32.mrb[42].mxu1 }
 0xe0c   :  { %v4254_v30 = vpack.i.bf16 %v1381_v29, %v1378_v24  ;;  %v3997_v33 = vpop.f32.mrb[43].mxu1 }
 0xe0e   :  { %4255 = vrot.lane.b32.xlu1 %v4254_v30, %s4541_s25 }
 0xe7c   :  { %v4261_v52 = vpop.permute.xlu0 %4260 }
 0xe7d   :  { %v4263_v55 = vunpack.i.h.bf16 %v4261_v52  ;;  %v4262_v58 = vunpack.i.l.bf16 %v4261_v52 }
 0xe7f   :  { %v1491_v0 = vsel %vm1488_vm4, %v1486_v61, %v4262_v58  ;;  %v1492_v15 = vsel %vm1488_vm4, %v1487_v62, %v4263_v55 }
 0xe80   :  { %v1494_v48 = vpack.c.bf16 %v1492_v15, %v1491_v0  ;;  %v4256_v3 = vpop.permute.xlu1 %4255 }
 0xe81   :  { %v4258_v5 = vunpack.i.h.bf16 %v4256_v3  ;;  %v4257_v35 = vunpack.i.l.bf16 %v4256_v3 }
 0xe83   :  { %v1490_v41 = vsel %vm1488_vm4, %v1485_v49, %v4258_v5  ;;  %v1489_v6 = vsel %vm1488_vm4, %v1484_v40, %v4257_v35  ;;  %v4999_v5 = vsub.s32 2, %v4700_v4  ;;  %v4516_v35 = vld [vmem:[%s5422_s8] sm:$0xf]  ;;  %v5006_v49 = vsub.s32 3, %v4700_v4 }
 0xe84   :  { %v1493_v7 = vpack.c.bf16 %v1490_v41, %v1489_v6 }
 0xe85   :  { %v1629_v40 = vrot.slane %v4516_v35, %v4999_v5 }
 0xe86   :  { %4008 = vmatprep.mubr.msk.bf16.mxu1 %vm315_vm13, %v1493_v7 }
 0xe87   :  { %4009 = vmatmul.mubr.msk.bf16.vlgmr.msra.gmra.mrb[44].mxu1 %vm315_vm13, %v1494_v48 }
 0xf5a   :  { %v4010_v10 = vpop.f32.mrb[44].mxu1 }
 0xf5b   :  { %v1555_v1 = vpop.f32.mrb[45].mxu1  ;;  %v1564_v11 = vadd.f32 %v4010_v10, %v1502_v2 }
 0xf5c   :  { %v1556_v23 = vadd.f32 %v1555_v1, %v1502_v2  ;;  %v4011_v25 = vpop.f32.mrb[46].mxu1  ;;  %v1637_v1 = vrot.slane %v4516_v35, %v5006_v49 }
 0xf5d   :  { %v1567_v26 = vadd.f32 %v4011_v25, %v1502_v2  ;;  %v1558_v63 = vpop.f32.mrb[47].mxu1  ;;  %v4976_v19 = vadd.f32 %v1564_v11, %v4677_v34 }
 0xf5e   :  { %v4965_v14 = vadd.f32 %v1556_v23, %v4669_v28  ;;  %v1559_v16 = vadd.f32 %v1558_v63, %v1502_v2 }
 0xf5f   :  { %v4968_v17 = vadd.f32 %v1567_v26, %v4671_v31  ;;  %v1580_v31 = vsel %vm315_vm13, %v4976_v19, 0.0 }
 0xf60   :  { %v4971_v18 = vadd.f32 %v1559_v16, %v4673_v32  ;;  %v1574_v38 = vsel %vm315_vm13, %v4965_v14, 0.0 }
 0xf61   :  { %1575 = vadd.xlane.f32.xlu1 %v1574_v38  ;;  %v1583_v28 = vsel %vm315_vm13, %v4968_v17, 0.0 }
 0xf62   :  { %v1577_v20 = vsel %vm315_vm13, %v4971_v18, 0.0 }
 0xf63   :  { %1578 = vadd.xlane.f32.xlu0 %v1577_v20 }
 0xf65   :  { %1584 = vadd.xlane.f32.xlu1 %v1583_v28 }
 0xf67   :  { %1581 = vadd.xlane.f32.xlu0 %v1580_v31 }
 0xfee   :  { %v1576_v32 = vpop.xlane.xlu1 %1575 }
 0xfef   :  { %v1586_v21 = vmul.f32 0.03125, %v1576_v32 }
 0xff0   :  { %v1579_v22 = vpop.xlane.xlu0 %1578 }
 0xff1   :  { %v1590_v24 = vsub.f32 %v4965_v14, %v1586_v21  ;;  %v1587_v27 = vmul.f32 0.03125, %v1579_v22  ;;  %v4308_v22 = vld [vmem:[%s5426_s6] sm:$0xff]  }
 0xff2   :  { %v1585_v34 = vpop.xlane.xlu1 %1584  ;;  %4020 = vmatprep.subr.bf16.mxu1 %v4308_v22 }
 0xff3   :  { %v1591_v29 = vsub.f32 %v4971_v18, %v1587_v27  ;;  %v1589_v30 = vmul.f32 0.03125, %v1585_v34  ;;  %v1594_v33 = vmul.f32 %v1590_v24, %v1590_v24  ;;  %4021 = vmatpush3.bf16.msra.mxu1 %v4308_v22  ;;  %v4310_v27 = vld [vmem:[%s5426_s6 + $0x10] sm:$0xff]   ;;  %v4311_v34 = vld [vmem:[%s5426_s6 + $0x18] sm:$0xff]  }
 0xff4   :  { %v1582_v36 = vpop.xlane.xlu0 %1581 }
 0xff5   :  { %v1593_v39 = vsub.f32 %v4968_v17, %v1589_v30  ;;  %v1588_v42 = vmul.f32 0.03125, %v1582_v36  ;;  %v1598_v43 = vsel %vm315_vm13, %v1594_v33, 0.0  ;;  %v1595_v44 = vmul.f32 %v1591_v29, %v1591_v29  ;;  %v4313_v30 = vld [vmem:[%s5426_s6 + $0x28] sm:$0xff]   ;;  %v4314_v33 = vld [vmem:[%s5426_s6 + $0x30] sm:$0xff]   ;;  %v4315_v36 = vld [vmem:[%s5426_s6 + $0x38] sm:$0xff]  }
 0xff6   :  { %1599 = vadd.xlane.f32.xlu0 %v1598_v43 }
 0xff7   :  { %v1592_v45 = vsub.f32 %v4976_v19, %v1588_v42  ;;  %v1601_v46 = vsel %vm315_vm13, %v1595_v44, 0.0  ;;  %v1597_v47 = vmul.f32 %v1593_v39, %v1593_v39 }
 0xff8   :  { %1602 = vadd.xlane.f32.xlu1 %v1601_v46 }
 0xff9   :  { %v1596_v50 = vmul.f32 %v1592_v45, %v1592_v45  ;;  %v1607_v52 = vsel %vm315_vm13, %v1597_v47, 0.0 }
 0xffb   :  { %v1604_v51 = vsel %vm315_vm13, %v1596_v50, 0.0 }
 0xffc   :  { %1605 = vadd.xlane.f32.xlu0 %v1604_v51  ;;  %1608 = vadd.xlane.f32.xlu1 %v1607_v52 }
0x1083   :  { %v1600_v55 = vpop.xlane.xlu0 %1599 }
0x1084   :  { %v1610_v58 = vmul.f32 0.03125, %v1600_v55 }
0x1085   :  { %v1603_v59 = vpop.xlane.xlu1 %1602 }
0x1086   :  { %v1614_v60 = vadd.f32 1e-05, %v1610_v58  ;;  %v1611_v61 = vmul.f32 0.03125, %v1603_v59 }
0x1088   :  { %4404 = vrsqrt.f32 %v1614_v60  ;;  %v1615_v62 = vadd.f32 1e-05, %v1611_v61 }
0x1089   :  { %v1606_v0 = vpop.xlane.xlu0 %1605  ;;  %v1609_v15 = vpop.xlane.xlu1 %1608 }
0x108a   :  { %4406 = vrsqrt.f32 %v1615_v62  ;;  %v1612_v48 = vmul.f32 0.03125, %v1606_v0  ;;  %v1613_v3 = vmul.f32 0.03125, %v1609_v15 }
0x108c   :  { %v1616_v12 = vadd.f32 1e-05, %v1612_v48  ;;  %v1617_v8 = vadd.f32 1e-05, %v1613_v3 }
0x108e   :  { %4408 = vrsqrt.f32 %v1616_v12 }
0x108f   :  { %4410 = vrsqrt.f32 %v1617_v8 }
0x1092   :  { %v4405_v41 = vpop.eup %4404 }
0x1093   :  { %v1622_v6 = vmul.f32 %v4405_v41, %v1590_v24  ;;  %v4309_v24 = vld [vmem:[%s5426_s6 + $0x8] sm:$0xff]  }
0x1094   :  { %v4407_v7 = vpop.eup %4406  ;;  %4022 = vmatprep.subr.bf16.mxu1 %v4309_v24 }
0x1095   :  { %v1623_v2 = vmul.f32 %v4407_v7, %v1591_v29  ;;  %v1630_v10 = vmul.f32 %v1629_v40, %v1622_v6  ;;  %4023 = vmatpush3.bf16.msra.mxu1 %v4309_v24  ;;  %v4312_v29 = vld [vmem:[%s5426_s6 + $0x20] sm:$0xff]  }
0x1096   :  { %4024 = vmatprep.subr.bf16.mxu1 %v4310_v27 }
0x1097   :  { %v1631_v23 = vmul.f32 %v1629_v40, %v1623_v2  ;;  %v1638_v11 = vadd.f32 %v1637_v1, %v1630_v10 }
0x1098   :  { %v4409_v25 = vpop.eup %4408 }
0x1099   :  { %v4411_v26 = vpop.eup %4410  ;;  %v1624_v63 = vmul.f32 %v4409_v25, %v1592_v45  ;;  %v1639_v16 = vadd.f32 %v1637_v1, %v1631_v23  ;;  %4025 = vmatpush3.bf16.msra.mxu1 %v4310_v27 }
0x109a   :  { %v1625_v38 = vmul.f32 %v4411_v26, %v1593_v39  ;;  %4026 = vmatprep.subr.bf16.mxu1 %v4311_v34  ;;  %v4517_v39 = vld [vmem:[%s5423_s7] sm:$0xf] }
0x109b   :  { %v1632_v20 = vmul.f32 %v1629_v40, %v1624_v63  ;;  %v1642_v28 = vpack.c.bf16 %v1639_v16, %v1638_v11  ;;  %v1651_v42 = vrot.slane %v4517_v39, %v4999_v5 }
0x109c   :  { %v1633_v31 = vmul.f32 %v1629_v40, %v1625_v38 }
0x109d   :  { %4016 = vmatprep.mubr.msk.bf16.mxu0 %vm315_vm13, %v1642_v28  ;;  %v1640_v4 = vadd.f32 %v1637_v1, %v1632_v20  ;;  %4027 = vmatpush3.bf16.msra.mxu1 %v4311_v34 }
0x109e   :  { %v1641_v32 = vadd.f32 %v1637_v1, %v1633_v31  ;;  %4028 = vmatprep.subr.bf16.mxu1 %v4312_v29 }
0x10a0   :  { %v1643_v21 = vpack.c.bf16 %v1641_v32, %v1640_v4 }
0x10a1   :  { %4029 = vmatpush3.bf16.msra.mxu1 %v4312_v29  ;;  %v1877_v29 = vrot.slane %v4517_v39, %v5006_v49 }
0x10a2   :  { %4017 = vmatmul.mubr.msk.bf16.vlgmr.msra.gmra.mrb[28].mxu0 %vm315_vm13, %v1643_v21  ;;  %4030 = vmatprep.subr.bf16.mxu1 %v4313_v30 }
0x10a5   :  { %4031 = vmatpush3.bf16.msra.mxu1 %v4313_v30 }
0x10a6   :  { %4032 = vmatprep.subr.bf16.mxu1 %v4314_v33 }
0x10a9   :  { %4033 = vmatpush3.bf16.msra.mxu1 %v4314_v33 }
0x10aa   :  { %4034 = vmatprep.subr.bf16.mxu1 %v4315_v36 }
0x10ad   :  { %4035 = vmatpush3.bf16.msra.mxu1 %v4315_v36 }
0x10ae   :  { %4066 = vmatprep.subr.bf16.mxu1 %v4525_v37 }
0x1175   :  { %v4018_v43 = vpop.f32.mrb[28].mxu0 }
0x1176   :  { %v1713_v44 = vadd.f32 %v4018_v43, %v1651_v42  ;;  %v1704_v45 = vpop.f32.mrb[29].mxu0 }
0x1177   :  { %v1705_v46 = vadd.f32 %v1704_v45, %v1651_v42  ;;  %v4019_v47 = vpop.f32.mrb[30].mxu0 }
0x1178   :  { %v1725_v50 = vmul.f32 0.044715, %v1713_v44  ;;  %v1716_v51 = vadd.f32 %v4019_v47, %v1651_v42  ;;  %v1707_v52 = vpop.f32.mrb[31].mxu0  ;;  %v1721_v11 = vmul.f32 0.5, %v1713_v44 }
0x1179   :  { %v1723_v53 = vmul.f32 0.044715, %v1705_v46  ;;  %v1708_v54 = vadd.f32 %v1707_v52, %v1651_v42  ;;  %v1719_v20 = vmul.f32 0.5, %v1705_v46 }
0x117a   :  { %v1729_v55 = vmul.f32 %v1725_v50, %v1713_v44  ;;  %v1726_v58 = vmul.f32 0.044715, %v1716_v51  ;;  %v1722_v16 = vmul.f32 0.5, %v1716_v51 }
0x117b   :  { %v1727_v59 = vmul.f32 %v1723_v53, %v1705_v46  ;;  %v1724_v60 = vmul.f32 0.044715, %v1708_v54  ;;  %v1720_v28 = vmul.f32 0.5, %v1708_v54 }
0x117c   :  { %v1733_v61 = vmul.f32 %v1729_v55, %v1713_v44  ;;  %v1730_v62 = vmul.f32 %v1726_v58, %v1716_v51 }
0x117d   :  { %v1731_v0 = vmul.f32 %v1727_v59, %v1705_v46  ;;  %v1728_v15 = vmul.f32 %v1724_v60, %v1708_v54 }
0x117e   :  { %v1737_v48 = vadd.f32 %v1733_v61, %v1713_v44  ;;  %v1734_v3 = vmul.f32 %v1730_v62, %v1716_v51 }
0x117f   :  { %v1732_v12 = vmul.f32 %v1728_v15, %v1708_v54  ;;  %v1735_v8 = vadd.f32 %v1731_v0, %v1705_v46 }
0x1180   :  { %v1741_v35 = vmul.f32 0.7978846, %v1737_v48  ;;  %v1738_v40 = vadd.f32 %v1734_v3, %v1716_v51 }
0x1181   :  { %v1736_v41 = vadd.f32 %v1732_v12, %v1708_v54  ;;  %v1739_v6 = vmul.f32 0.7978846, %v1735_v8 }
0x1182   :  { %4412 = vtanh.f32 %v1741_v35  ;;  %v1742_v7 = vmul.f32 0.7978846, %v1738_v40 }
0x1183   :  { %v1740_v2 = vmul.f32 0.7978846, %v1736_v41  ;;  %4414 = vtanh.f32 %v1739_v6 }
0x1184   :  { %4416 = vtanh.f32 %v1742_v7  ;;  %v4316_v7 = vld [vmem:[%s5421_s3 + $0x10] sm:$0xff]  }
0x1185   :  { %4418 = vtanh.f32 %v1740_v2  ;;  %4040 = vmatprep.subr.bf16.mxu0 %v4316_v7  ;;  %v4317_v2 = vld [vmem:[%s5421_s3 + $0x18] sm:$0xff]  }
0x1186   :  { %4041 = vmatpush3.bf16.msra.mxu0 %v4316_v7 }
0x1187   :  { %4042 = vmatprep.subr.bf16.mxu0 %v4317_v2 }
0x118a   :  { %4043 = vmatpush3.bf16.msra.mxu0 %v4317_v2 }
0x118b   :  { %4048 = vmatprep.subr.bf16.mxu0 %v4525_v37 }
0x118c   :  { %v4413_v10 = vpop.eup %4412 }
0x118d   :  { %v4415_v1 = vpop.eup %4414  ;;  %v1749_v23 = vadd.f32 1.0, %v4413_v10 }
0x118e   :  { %v4417_v25 = vpop.eup %4416  ;;  %v1747_v26 = vadd.f32 1.0, %v4415_v1 }
0x118f   :  { %v4419_v63 = vpop.eup %4418  ;;  %v1750_v38 = vadd.f32 1.0, %v4417_v25  ;;  %v1753_v4 = vmul.f32 %v1749_v23, %v1721_v11 }
0x1190   :  { %v1748_v31 = vadd.f32 1.0, %v4419_v63  ;;  %v1751_v21 = vmul.f32 %v1747_v26, %v1719_v20 }
0x1191   :  { %v1754_v32 = vmul.f32 %v1750_v38, %v1722_v16 }
0x1192   :  { %v1752_v22 = vmul.f32 %v1748_v31, %v1720_v28 }
0x1193   :  { %v1756_v24 = vpack.c.bf16 %v1754_v32, %v1753_v4  ;;  %v3667_v4 = vld [vmem:[%s5422_s8 + $0x4] sm:$0xf] }
0x1194   :  { %v1755_v27 = vpack.c.bf16 %v1752_v22, %v1751_v21  ;;  %v1941_v32 = vrot.slane %v3667_v4, %v4703_v9 }
0x1196   :  { %4036 = vmatprep.mubr.bf16.mxu1 %v1755_v27 }
0x1197   :  { %4037 = vmatmul.mubr.bf16.vlgmr.msra.gmra.mrb[48].mxu1 %v1756_v24 }
0x1198   :  { %4068 = vmatprep.mubr.msk.bf16.mxu1 %vm4526_vm11, %v4525_v37 }
0x126a   :  { %v4038_v34 = vpop.f32.mrb[48].mxu1 }
0x126b   :  { %v1855_v30 = vpop.f32.mrb[49].mxu1  ;;  %v1872_v33 = vadd.f32 %v4038_v34, %v4976_v19 }
0x126c   :  { %v1870_v36 = vadd.f32 %v1855_v30, %v4965_v14  ;;  %v4039_v42 = vpop.f32.mrb[50].mxu1 }
0x126d   :  { %v1858_v43 = vpop.f32.mrb[51].mxu1  ;;  %v1873_v45 = vadd.f32 %v4039_v42, %v4968_v17  ;;  %v5049_v47 = vadd.f32 %v1877_v29, %v1872_v33 }
0x126e   :  { %v5045_v44 = vadd.f32 %v1877_v29, %v1870_v36  ;;  %v1871_v46 = vadd.f32 %v1858_v43, %v4971_v18 }
0x126f   :  { %v5055_v51 = vadd.f32 %v1877_v29, %v1873_v45  ;;  %v1892_v19 = vsel %vm315_vm13, %v5049_v47, 0.0 }
0x1270   :  { %v5051_v50 = vadd.f32 %v1877_v29, %v1871_v46  ;;  %v1886_v39 = vsel %vm315_vm13, %v5045_v44, 0.0  ;;  %v1949_v29 = vrot.slane %v3667_v4, %v4710_v13 }
0x1271   :  { %1887 = vadd.xlane.f32.xlu0 %v1886_v39  ;;  %v1895_v17 = vsel %vm315_vm13, %v5055_v51, 0.0 }
0x1272   :  { %v1889_v14 = vsel %vm315_vm13, %v5051_v50, 0.0 }
0x1273   :  { %1890 = vadd.xlane.f32.xlu1 %v1889_v14 }
0x1275   :  { %1893 = vadd.xlane.f32.xlu0 %v1892_v19 }
0x1277   :  { %1896 = vadd.xlane.f32.xlu1 %v1895_v17 }
0x12fe   :  { %v1888_v18 = vpop.xlane.xlu0 %1887 }
0x12ff   :  { %v1898_v52 = vmul.f32 0.03125, %v1888_v18 }
0x1300   :  { %v1891_v53 = vpop.xlane.xlu1 %1890 }
0x1301   :  { %v1902_v54 = vsub.f32 %v5045_v44, %v1898_v52  ;;  %v1899_v55 = vmul.f32 0.03125, %v1891_v53  ;;  %v5090_v53 = vld [vmem:[%s5423_s7 + $0x4] sm:$0xf] }
0x1302   :  { %v1894_v58 = vpop.xlane.xlu0 %1893 }
0x1303   :  { %v1903_v59 = vsub.f32 %v5051_v50, %v1899_v55  ;;  %v1900_v60 = vmul.f32 0.03125, %v1894_v58  ;;  %v1906_v61 = vmul.f32 %v1902_v54, %v1902_v54 }
0x1304   :  { %v1897_v62 = vpop.xlane.xlu1 %1896 }
0x1305   :  { %v1904_v0 = vsub.f32 %v5049_v47, %v1900_v60  ;;  %v1901_v15 = vmul.f32 0.03125, %v1897_v62  ;;  %v1910_v48 = vsel %vm315_vm13, %v1906_v61, 0.0  ;;  %v1907_v3 = vmul.f32 %v1903_v59, %v1903_v59 }
0x1306   :  { %1911 = vadd.xlane.f32.xlu0 %v1910_v48 }
0x1307   :  { %v1905_v12 = vsub.f32 %v5055_v51, %v1901_v15  ;;  %v1913_v8 = vsel %vm315_vm13, %v1907_v3, 0.0  ;;  %v1908_v35 = vmul.f32 %v1904_v0, %v1904_v0 }
0x1308   :  { %1914 = vadd.xlane.f32.xlu1 %v1913_v8 }
0x1309   :  { %v1916_v40 = vsel %vm315_vm13, %v1908_v35, 0.0  ;;  %v1909_v41 = vmul.f32 %v1905_v12, %v1905_v12 }
0x130a   :  { %1917 = vadd.xlane.f32.xlu0 %v1916_v40 }
0x130b   :  { %v1919_v6 = vsel %vm315_vm13, %v1909_v41, 0.0 }
0x130c   :  { %1920 = vadd.xlane.f32.xlu1 %v1919_v6 }
0x1393   :  { %v1912_v10 = vpop.xlane.xlu0 %1911 }
0x1394   :  { %v1922_v1 = vmul.f32 0.03125, %v1912_v10 }
0x1395   :  { %v1915_v23 = vpop.xlane.xlu1 %1914 }
0x1396   :  { %v1926_v25 = vadd.f32 1e-05, %v1922_v1  ;;  %v1923_v26 = vmul.f32 0.03125, %v1915_v23 }
0x1397   :  { %v1918_v63 = vpop.xlane.xlu0 %1917 }
0x1398   :  { %4420 = vrsqrt.f32 %v1926_v25  ;;  %v1927_v11 = vadd.f32 1e-05, %v1923_v26  ;;  %v1924_v16 = vmul.f32 0.03125, %v1918_v63 }
0x1399   :  { %v1921_v38 = vpop.xlane.xlu1 %1920 }
0x139a   :  { %4422 = vrsqrt.f32 %v1927_v11  ;;  %v1928_v20 = vadd.f32 1e-05, %v1924_v16  ;;  %v1925_v28 = vmul.f32 0.03125, %v1921_v38 }
0x139c   :  { %4424 = vrsqrt.f32 %v1928_v20  ;;  %v1929_v31 = vadd.f32 1e-05, %v1925_v28 }
0x139e   :  { %4426 = vrsqrt.f32 %v1929_v31 }
0x13a2   :  { %v4421_v21 = vpop.eup %4420 }
0x13a3   :  { %v1934_v22 = vmul.f32 %v4421_v21, %v1902_v54  ;;  %v1964_v54 = vrot.slane %v5090_v53, %v4703_v9 }
0x13a4   :  { %v4423_v24 = vpop.eup %4422 }
0x13a5   :  { %v1935_v27 = vmul.f32 %v4423_v24, %v1903_v59  ;;  %v1942_v34 = vmul.f32 %v1941_v32, %v1934_v22 }
0x13a6   :  { %v4425_v30 = vpop.eup %4424 }
0x13a7   :  { %v1936_v33 = vmul.f32 %v4425_v30, %v1904_v0  ;;  %v1943_v36 = vmul.f32 %v1941_v32, %v1935_v27  ;;  %v1950_v46 = vadd.f32 %v1949_v29, %v1942_v34 }
0x13a8   :  { %v4427_v42 = vpop.eup %4426 }
0x13a9   :  { %v1944_v43 = vmul.f32 %v1941_v32, %v1936_v33  ;;  %v1937_v45 = vmul.f32 %v4427_v42, %v1905_v12  ;;  %v1951_v39 = vadd.f32 %v1949_v29, %v1943_v36 }
0x13ab   :  { %v1945_v14 = vmul.f32 %v1941_v32, %v1937_v45  ;;  %v1954_v19 = vpack.c.bf16 %v1951_v39, %v1950_v46  ;;  %v1952_v17 = vadd.f32 %v1949_v29, %v1944_v43 }
0x13ad   :  { %4044 = vmatprep.mubr.msk.bf16.mxu0 %vm315_vm13, %v1954_v19  ;;  %v1953_v18 = vadd.f32 %v1949_v29, %v1945_v14 }
0x13af   :  { %v1955_v52 = vpack.c.bf16 %v1953_v18, %v1952_v17 }
0x13b1   :  { %4045 = vmatmul.mubr.msk.bf16.vlgmr.msra.gmra.mrb[32].mxu0 %vm315_vm13, %v1955_v52 }
0x13b2   :  { %4050 = vmatprep.mubr.msk.bf16.mxu0 %vm4526_vm11, %v4525_v37 }
0x1484   :  { %v4046_v55 = vpop.f32.mrb[32].mxu0 }
0x1485   :  { %v2017_v58 = vpop.f32.mrb[33].mxu0  ;;  %v2026_v60 = vadd.f32 %v4046_v55, %v1964_v54 }
0x1486   :  { %v4047_v59 = vpop.f32.mrb[34].mxu0  ;;  %v2018_v0 = vadd.f32 %v2017_v58, %v1964_v54 }
0x1487   :  { %v2029_v61 = vadd.f32 %v4047_v59, %v1964_v54  ;;  %v2020_v62 = vpop.f32.mrb[35].mxu0 }
0x1488   :  { %v2021_v15 = vadd.f32 %v2020_v62, %v1964_v54 }
0x1489   :  { %v5094_v48 = vpack.c.bf16 %v2029_v61, %v2026_v60 }
0x148a   :  { %v5096_v3 = vpack.c.bf16 %v2021_v15, %v2018_v0 }
0x148b   :  { %2085 = vrot.lane.b32.xlu1 %v5094_v48, %s4527_s30 }
0x148c   :  { %2035 = vrot.lane.b32.xlu0 %v5096_v3, %s4527_s30 }
0x14fd   :  { %v2086_v8 = vpop.permute.xlu1 %2085 }
0x14fe   :  { %v2036_v12 = vpop.permute.xlu0 %2035  ;;  %v2091_v35 = vsel %vm467_vm15, %v2086_v8, 0 }
0x14ff   :  { %v2041_v9 = vsel %vm467_vm15, %v2036_v12, 0 }
0x1500   :  { %4049 = vmatpush3.bf16.xpose.msra.mxu0 %v2041_v9 }
0x1501   :  { %4054 = vmatprep.subr.bf16.mxu0 %v4525_v37 }
0x1507   :  { %4051 = vmatmul.mubr.msk.bf16.vlgmr.msra.gmra.mrb[36].mxu0 %vm467_vm15, %v5096_v3 }
0x1508   :  { %4055 = vmatpush3.bf16.xpose.msra.mxu0 %v2091_v35  ;;  %4056 = vmatprep.mubr.msk.bf16.mxu0 %vm4526_vm11, %v4525_v37 }
0x1509   :  { %4060 = vmatprep.subr.bf16.mxu0 %v4525_v37 }
0x150f   :  { %4057 = vmatmul.mubr.msk.bf16.vlgmr.msra.gmra.mrb[40].mxu0 %vm467_vm15, %v5094_v48 }
0x1510   :  { %4062 = vmatprep.mubr.msk.bf16.mxu0 %vm4526_vm11, %v4525_v37 }
0x15da   :  { %v2077_v40 = vpop.f32.mrb[36].mxu0 }
0x15db   :  { %v2078_v41 = vadd.f32 %v2077_v40, %v4752_v56  ;;  %v4052_v6 = vpop.f32.mrb[37].mxu0 }
0x15dc   :  { %v2080_v7 = vpop.f32.mrb[38].mxu0 }
0x15dd   :  { %v2081_v2 = vadd.f32 %v2080_v7, %v4754_v57  ;;  %v4053_v10 = vpop.f32.mrb[39].mxu0  ;;  %v2134_v1 = vsel %vm565_vm3, %v2078_v41, -inf }
0x15de   :  { %2135 = vmax.xlane.f32.xlu1 %v2134_v1 }
0x15df   :  { %v2137_v23 = vsel %vm565_vm3, %v2081_v2, -inf }
0x15e0   :  { %2138 = vmax.xlane.f32.xlu0 %v2137_v23 }
0x15e2   :  { %v2127_v25 = vpop.f32.mrb[40].mxu0 }
0x15e3   :  { %v2128_v26 = vadd.f32 %v2127_v25, %v4752_v56  ;;  %v4058_v63 = vpop.f32.mrb[41].mxu0 }
0x15e4   :  { %v2130_v11 = vpop.f32.mrb[42].mxu0 }
0x15e5   :  { %v2131_v16 = vadd.f32 %v2130_v11, %v4754_v57  ;;  %v4059_v38 = vpop.f32.mrb[43].mxu0  ;;  %v2140_v20 = vsel %vm565_vm3, %v2128_v26, -inf }
0x15e6   :  { %2141 = vmax.xlane.f32.xlu0 %v2140_v20 }
0x15e7   :  { %v2143_v28 = vsel %vm565_vm3, %v2131_v16, -inf }
0x15e8   :  { %2144 = vmax.xlane.f32.xlu1 %v2143_v28 }
0x15f9   :  { %2227 = vrot.lane.b32.xlu1 %v5094_v48, %s4529_s12 }
0x15fc   :  { %2180 = vrot.lane.b32.xlu0 %v5096_v3, %s4529_s12 }
0x15fd   :  { %2276 = vrot.lane.b32.xlu1 %v5096_v3, %s4530_s13 }
0x166b   :  { %v2136_v31 = vpop.xlane.xlu1 %2135 }
0x166c   :  { %v2146_v4 = vsub.f32 %v2078_v41, %v2136_v31 }
0x166d   :  { %v2139_v32 = vpop.xlane.xlu0 %2138 }
0x166e   :  { %v2150_v21 = vmul.f32 1.442695, %v2146_v4  ;;  %v2147_v22 = vsub.f32 %v2081_v2, %v2139_v32 }
0x1670   :  { %4428 = vpow2.f32 %v2150_v21  ;;  %v2152_v24 = vmul.f32 1.442695, %v2147_v22 }
0x1672   :  { %4430 = vpow2.f32 %v2152_v24 }
0x1673   :  { %v2142_v27 = vpop.xlane.xlu0 %2141 }
0x1674   :  { %v2148_v34 = vsub.f32 %v2128_v26, %v2142_v27 }
0x1675   :  { %v2145_v29 = vpop.xlane.xlu1 %2144 }
0x1676   :  { %v2154_v30 = vmul.f32 1.442695, %v2148_v34  ;;  %v2149_v33 = vsub.f32 %v2131_v16, %v2145_v29 }
0x1677   :  { %v2181_v36 = vpop.permute.xlu0 %2180 }
0x1678   :  { %4432 = vpow2.f32 %v2154_v30  ;;  %v2156_v42 = vmul.f32 1.442695, %v2149_v33  ;;  %4061 = vmatpush3.bf16.msra.mxu0 %v2181_v36 }
0x1679   :  { %v2228_v43 = vpop.permute.xlu1 %2227  ;;  %4072 = vmatprep.subr.bf16.mxu0 %v4525_v37 }
0x167a   :  { %v4429_v45 = vpop.eup %4428  ;;  %4434 = vpow2.f32 %v2156_v42  ;;  %4067 = vmatpush3.bf16.msra.mxu1 %v2228_v43 }
0x167b   :  { %v2158_v46 = vsel %vm565_vm3, %v4429_v45, 0.0  ;;  %4078 = vmatprep.subr.bf16.mxu1 %v4525_v37 }
0x167c   :  { %v4431_v39 = vpop.eup %4430  ;;  %2159 = vadd.xlane.f32.xlu0 %v2158_v46 }
0x167d   :  { %v2161_v14 = vsel %vm565_vm3, %v4431_v39, 0.0  ;;  %v2277_v54 = vpop.permute.xlu1 %2276 }
0x167e   :  { %2162 = vadd.xlane.f32.xlu1 %v2161_v14  ;;  %v2282_v9 = vsel %vm467_vm15, %v2277_v54, 0 }
0x1682   :  { %v4433_v19 = vpop.eup %4432 }
0x1683   :  { %v2164_v17 = vsel %vm565_vm3, %v4433_v19, 0.0 }
0x1684   :  { %v4435_v18 = vpop.eup %4434  ;;  %2165 = vadd.xlane.f32.xlu0 %v2164_v17 }
0x1685   :  { %v2167_v52 = vsel %vm565_vm3, %v4435_v18, 0.0 }
0x1686   :  { %2168 = vadd.xlane.f32.xlu1 %v2167_v52 }
0x1697   :  { %2274 = vrot.lane.b32.xlu1 %v5096_v3, %s4531_s14 }
0x169a   :  { %2327 = vrot.lane.b32.xlu0 %v5094_v48, %s4530_s13 }
0x169e   :  { %2325 = vrot.lane.b32.xlu0 %v5094_v48, %s4531_s14 }
0x1709   :  { %v2160_v55 = vpop.xlane.xlu0 %2159 }
0x170a   :  { %4436 = vrcp.f32 %v2160_v55 }
0x170b   :  { %v2163_v58 = vpop.xlane.xlu1 %2162 }
0x170c   :  { %4438 = vrcp.f32 %v2163_v58 }
0x1711   :  { %v2166_v59 = vpop.xlane.xlu0 %2165 }
0x1712   :  { %4440 = vrcp.f32 %v2166_v59 }
0x1713   :  { %v2169_v60 = vpop.xlane.xlu1 %2168 }
0x1714   :  { %v4437_v61 = vpop.eup %4436  ;;  %4442 = vrcp.f32 %v2169_v60 }
0x1715   :  { %v2174_v0 = vmul.f32 %v4437_v61, %v4429_v45  ;;  %v2328_v6 = vpop.permute.xlu0 %2327 }
0x1716   :  { %v4439_v62 = vpop.eup %4438  ;;  %v2333_v10 = vsel %vm467_vm15, %v2328_v6, 0 }
0x1717   :  { %v2175_v15 = vmul.f32 %v4439_v62, %v4431_v39  ;;  %v2275_v2 = vpop.permute.xlu1 %2274 }
0x1719   :  { %v2178_v12 = vpack.c.bf16 %v2175_v15, %v2174_v0  ;;  %v2326_v1 = vpop.permute.xlu0 %2325 }
0x171b   :  { %4063 = vmatmul.mubr.msk.bf16.vlgmr.msra.gmra.mrb[44].mxu0 %vm565_vm3, %v2178_v12 }
0x171c   :  { %v4441_v8 = vpop.eup %4440  ;;  %4073 = vmatpush3.bf16.xpose.msra.mxu0 %v2282_v9  ;;  %4074 = vmatprep.mubr.msk.bf16.mxu0 %vm4526_vm11, %v4525_v37 }
0x171d   :  { %4084 = vmatprep.subr.bf16.mxu0 %v4525_v37  ;;  %v2176_v40 = vmul.f32 %v4441_v8, %v4433_v19 }
0x171e   :  { %v4443_v35 = vpop.eup %4442 }
0x171f   :  { %v2177_v41 = vmul.f32 %v4443_v35, %v4435_v18 }
0x1721   :  { %v2179_v7 = vpack.c.bf16 %v2177_v41, %v2176_v40 }
0x1723   :  { %4069 = vmatmul.mubr.msk.bf16.vlgmr.msra.gmra.mrb[52].mxu1 %vm565_vm3, %v2179_v7  ;;  %4075 = vmatmul.mubr.msk.bf16.vlgmr.msra.gmra.mrb[48].mxu0 %vm467_vm15, %v2275_v2 }
0x1724   :  { %4079 = vmatpush3.bf16.xpose.msra.mxu1 %v2333_v10  ;;  %4080 = vmatprep.mubr.msk.bf16.mxu1 %vm4526_vm11, %v4525_v37 }
0x1725   :  { %4090 = vmatprep.subr.bf16.mxu1 %v4525_v37  ;;  %4086 = vmatprep.mubr.msk.bf16.mxu0 %vm4526_vm11, %v4525_v37 }
0x172b   :  { %4081 = vmatmul.mubr.msk.bf16.vlgmr.msra.gmra.mrb[56].mxu1 %vm467_vm15, %v2326_v1 }
0x172c   :  { %4092 = vmatprep.mubr.msk.bf16.mxu1 %vm4526_vm11, %v4525_v37 }
0x17ee   :  { %v5156_v23 = vpop.f32.mrb[44].mxu0 }
0x17ef   :  { %v4064_v25 = vpop.f32.mrb[45].mxu0 }
0x17f0   :  { %v5158_v26 = vpop.f32.mrb[46].mxu0 }
0x17f1   :  { %v4065_v63 = vpop.f32.mrb[47].mxu0 }
0x17f6   :  { %v5160_v11 = vpop.f32.mrb[52].mxu1  ;;  %v2318_v16 = vpop.f32.mrb[48].mxu0 }
0x17f7   :  { %v2319_v38 = vadd.f32 %v2318_v16, %v4752_v56  ;;  %v4070_v20 = vpop.f32.mrb[53].mxu1  ;;  %v4076_v28 = vpop.f32.mrb[49].mxu0 }
0x17f8   :  { %v5163_v31 = vpop.f32.mrb[54].mxu1  ;;  %v2321_v4 = vpop.f32.mrb[50].mxu0 }
0x17f9   :  { %v2322_v32 = vadd.f32 %v2321_v4, %v4754_v57  ;;  %v4071_v21 = vpop.f32.mrb[55].mxu1  ;;  %v4077_v22 = vpop.f32.mrb[51].mxu0  ;;  %v2376_v24 = vsel %vm565_vm3, %v2319_v38, -inf }
0x17fa   :  { %2377 = vmax.xlane.f32.xlu1 %v2376_v24 }
0x17fb   :  { %v2379_v27 = vsel %vm565_vm3, %v2322_v32, -inf }
0x17fc   :  { %2380 = vmax.xlane.f32.xlu0 %v2379_v27 }
0x17fe   :  { %v2369_v34 = vpop.f32.mrb[56].mxu1 }
0x17ff   :  { %v2370_v29 = vadd.f32 %v2369_v34, %v4752_v56  ;;  %v4082_v30 = vpop.f32.mrb[57].mxu1 }
0x1800   :  { %v2372_v33 = vpop.f32.mrb[58].mxu1 }
0x1801   :  { %v2373_v36 = vadd.f32 %v2372_v33, %v4754_v57  ;;  %v4083_v42 = vpop.f32.mrb[59].mxu1  ;;  %v2382_v43 = vsel %vm565_vm3, %v2370_v29, -inf }
0x1802   :  { %2383 = vmax.xlane.f32.xlu0 %v2382_v43 }
0x1803   :  { %v2385_v45 = vsel %vm565_vm3, %v2373_v36, -inf }
0x1804   :  { %2386 = vmax.xlane.f32.xlu1 %v2385_v45 }
0x1815   :  { %2469 = vrot.lane.b32.xlu1 %v5094_v48, %s4532_s15 }
0x1818   :  { %2422 = vrot.lane.b32.xlu0 %v5096_v3, %s4532_s15 }
0x1819   :  { %2518 = vrot.lane.b32.xlu1 %v5096_v3, %s4533_s16 }
0x1887   :  { %v2378_v46 = vpop.xlane.xlu1 %2377 }
0x1888   :  { %v2388_v39 = vsub.f32 %v2319_v38, %v2378_v46 }
0x1889   :  { %v2381_v14 = vpop.xlane.xlu0 %2380 }
0x188a   :  { %v2392_v19 = vmul.f32 1.442695, %v2388_v39  ;;  %v2389_v17 = vsub.f32 %v2322_v32, %v2381_v14 }
0x188c   :  { %4444 = vpow2.f32 %v2392_v19  ;;  %v2394_v18 = vmul.f32 1.442695, %v2389_v17 }
0x188e   :  { %4446 = vpow2.f32 %v2394_v18 }
0x188f   :  { %v2384_v52 = vpop.xlane.xlu0 %2383 }
0x1890   :  { %v2390_v54 = vsub.f32 %v2370_v29, %v2384_v52 }
0x1891   :  { %v2387_v55 = vpop.xlane.xlu1 %2386 }
0x1892   :  { %v2396_v58 = vmul.f32 1.442695, %v2390_v54  ;;  %v2391_v59 = vsub.f32 %v2373_v36, %v2387_v55 }
0x1893   :  { %v2423_v60 = vpop.permute.xlu0 %2422 }
0x1894   :  { %4448 = vpow2.f32 %v2396_v58  ;;  %v2398_v61 = vmul.f32 1.442695, %v2391_v59  ;;  %4085 = vmatpush3.bf16.msra.mxu0 %v2423_v60 }
0x1895   :  { %v2470_v62 = vpop.permute.xlu1 %2469  ;;  %4096 = vmatprep.subr.bf16.mxu0 %v4525_v37 }
0x1896   :  { %v4445_v0 = vpop.eup %4444  ;;  %4450 = vpow2.f32 %v2398_v61  ;;  %4091 = vmatpush3.bf16.msra.mxu1 %v2470_v62 }
0x1897   :  { %v2400_v15 = vsel %vm565_vm3, %v4445_v0, 0.0  ;;  %4102 = vmatprep.subr.bf16.mxu1 %v4525_v37 }
0x1898   :  { %v4447_v12 = vpop.eup %4446  ;;  %2401 = vadd.xlane.f32.xlu0 %v2400_v15 }
0x1899   :  { %v2403_v9 = vsel %vm565_vm3, %v4447_v12, 0.0  ;;  %v2519_v6 = vpop.permute.xlu1 %2518 }
0x189a   :  { %2404 = vadd.xlane.f32.xlu1 %v2403_v9  ;;  %v2524_v28 = vsel %vm467_vm15, %v2519_v6, 0 }
0x189e   :  { %v4449_v8 = vpop.eup %4448 }
0x189f   :  { %v2406_v35 = vsel %vm565_vm3, %v4449_v8, 0.0 }
0x18a0   :  { %v4451_v40 = vpop.eup %4450  ;;  %2407 = vadd.xlane.f32.xlu0 %v2406_v35 }
0x18a1   :  { %v2409_v41 = vsel %vm565_vm3, %v4451_v40, 0.0 }
0x18a2   :  { %2410 = vadd.xlane.f32.xlu1 %v2409_v41 }
0x18b3   :  { %2516 = vrot.lane.b32.xlu1 %v5096_v3, %s4534_s17 }
0x18b6   :  { %2569 = vrot.lane.b32.xlu0 %v5094_v48, %s4533_s16 }
0x18ba   :  { %2567 = vrot.lane.b32.xlu0 %v5094_v48, %s4534_s17 }
0x1925   :  { %v2402_v7 = vpop.xlane.xlu0 %2401 }
0x1926   :  { %4452 = vrcp.f32 %v2402_v7 }
0x1927   :  { %v2405_v2 = vpop.xlane.xlu1 %2404 }
0x1928   :  { %4454 = vrcp.f32 %v2405_v2 }
0x192d   :  { %v2408_v10 = vpop.xlane.xlu0 %2407 }
0x192e   :  { %4456 = vrcp.f32 %v2408_v10 }
0x192f   :  { %v2411_v1 = vpop.xlane.xlu1 %2410 }
0x1930   :  { %v4453_v25 = vpop.eup %4452  ;;  %4458 = vrcp.f32 %v2411_v1 }
0x1931   :  { %v2416_v16 = vmul.f32 %v4453_v25, %v4445_v0  ;;  %v2570_v24 = vpop.permute.xlu0 %2569 }
0x1932   :  { %v4455_v63 = vpop.eup %4454  ;;  %v2575_v29 = vsel %vm467_vm15, %v2570_v24, 0 }
0x1933   :  { %v2417_v38 = vmul.f32 %v4455_v63, %v4447_v12  ;;  %v2517_v34 = vpop.permute.xlu1 %2516 }
0x1935   :  { %v2420_v20 = vpack.c.bf16 %v2417_v38, %v2416_v16  ;;  %v2568_v30 = vpop.permute.xlu0 %2567 }
0x1937   :  { %4087 = vmatmul.mubr.msk.bf16.vlgmr.msra.gmra.mrb[52].mxu0 %vm565_vm3, %v2420_v20 }
0x1938   :  { %v4457_v4 = vpop.eup %4456  ;;  %4097 = vmatpush3.bf16.xpose.msra.mxu0 %v2524_v28  ;;  %4098 = vmatprep.mubr.msk.bf16.mxu0 %vm4526_vm11, %v4525_v37 }
0x1939   :  { %4108 = vmatprep.subr.bf16.mxu0 %v4525_v37  ;;  %v2418_v21 = vmul.f32 %v4457_v4, %v4449_v8 }
0x193a   :  { %v4459_v32 = vpop.eup %4458 }
0x193b   :  { %v2419_v22 = vmul.f32 %v4459_v32, %v4451_v40 }
0x193d   :  { %v2421_v27 = vpack.c.bf16 %v2419_v22, %v2418_v21 }
0x193f   :  { %4093 = vmatmul.mubr.msk.bf16.vlgmr.msra.gmra.mrb[60].mxu1 %vm565_vm3, %v2421_v27  ;;  %4099 = vmatmul.mubr.msk.bf16.vlgmr.msra.gmra.mrb[56].mxu0 %vm467_vm15, %v2517_v34 }
0x1940   :  { %4103 = vmatpush3.bf16.xpose.msra.mxu1 %v2575_v29  ;;  %4104 = vmatprep.mubr.msk.bf16.mxu1 %vm4526_vm11, %v4525_v37 }
0x1941   :  { %4114 = vmatprep.subr.bf16.mxu1 %v4525_v37  ;;  %4110 = vmatprep.mubr.msk.bf16.mxu0 %vm4526_vm11, %v4525_v37 }
0x1947   :  { %4105 = vmatmul.mubr.msk.bf16.vlgmr.msra.gmra.mrb[64].mxu1 %vm467_vm15, %v2568_v30 }
0x1948   :  { %4116 = vmatprep.mubr.msk.bf16.mxu1 %vm4526_vm11, %v4525_v37 }
0x1a0a   :  { %v5206_v33 = vpop.f32.mrb[52].mxu0 }
0x1a0b   :  { %v4088_v36 = vpop.f32.mrb[53].mxu0 }
0x1a0c   :  { %v5208_v42 = vpop.f32.mrb[54].mxu0 }
0x1a0d   :  { %v4264_v43 = vpack.i.bf16 %v5208_v42, %v5206_v33  ;;  %v4089_v45 = vpop.f32.mrb[55].mxu0 }
0x1a12   :  { %v5212_v46 = vpop.f32.mrb[60].mxu1  ;;  %v2560_v39 = vpop.f32.mrb[56].mxu0 }
0x1a13   :  { %v2561_v14 = vadd.f32 %v2560_v39, %v4752_v56  ;;  %v4094_v19 = vpop.f32.mrb[61].mxu1  ;;  %v4100_v17 = vpop.f32.mrb[57].mxu0 }
0x1a14   :  { %v5215_v18 = vpop.f32.mrb[62].mxu1  ;;  %v2563_v52 = vpop.f32.mrb[58].mxu0 }
0x1a15   :  { %v4269_v54 = vpack.i.bf16 %v5215_v18, %v5212_v46  ;;  %v2564_v55 = vadd.f32 %v2563_v52, %v4754_v57  ;;  %v4095_v58 = vpop.f32.mrb[63].mxu1  ;;  %v4101_v59 = vpop.f32.mrb[59].mxu0  ;;  %v2618_v60 = vsel %vm565_vm3, %v2561_v14, -inf }
0x1a16   :  { %2619 = vmax.xlane.f32.xlu1 %v2618_v60 }
0x1a17   :  { %v2621_v61 = vsel %vm565_vm3, %v2564_v55, -inf }
0x1a18   :  { %2622 = vmax.xlane.f32.xlu0 %v2621_v61 }
0x1a1a   :  { %v2611_v62 = vpop.f32.mrb[64].mxu1 }
0x1a1b   :  { %v2612_v0 = vadd.f32 %v2611_v62, %v4752_v56  ;;  %v4106_v15 = vpop.f32.mrb[65].mxu1 }
0x1a1c   :  { %v2614_v12 = vpop.f32.mrb[66].mxu1 }
0x1a1d   :  { %v2615_v9 = vadd.f32 %v2614_v12, %v4754_v57  ;;  %v4107_v8 = vpop.f32.mrb[67].mxu1  ;;  %v2624_v35 = vsel %vm565_vm3, %v2612_v0, -inf }
0x1a1e   :  { %2625 = vmax.xlane.f32.xlu0 %v2624_v35 }
0x1a1f   :  { %v2627_v40 = vsel %vm565_vm3, %v2615_v9, -inf }
0x1a20   :  { %2628 = vmax.xlane.f32.xlu1 %v2627_v40 }
0x1a31   :  { %2711 = vrot.lane.b32.xlu1 %v5094_v48, %s4535_s18 }
0x1a34   :  { %2664 = vrot.lane.b32.xlu0 %v5096_v3, %s4535_s18 }
0x1a35   :  { %2760 = vrot.lane.b32.xlu1 %v5096_v3, %s4536_s19 }
0x1aa3   :  { %v2620_v41 = vpop.xlane.xlu1 %2619 }
0x1aa4   :  { %v2630_v6 = vsub.f32 %v2561_v14, %v2620_v41 }
0x1aa5   :  { %v2623_v7 = vpop.xlane.xlu0 %2622 }
0x1aa6   :  { %v2634_v2 = vmul.f32 1.442695, %v2630_v6  ;;  %v2631_v10 = vsub.f32 %v2564_v55, %v2623_v7 }
0x1aa8   :  { %4460 = vpow2.f32 %v2634_v2  ;;  %v2636_v1 = vmul.f32 1.442695, %v2631_v10 }
0x1aaa   :  { %4462 = vpow2.f32 %v2636_v1 }
0x1aab   :  { %v2626_v25 = vpop.xlane.xlu0 %2625 }
0x1aac   :  { %v2632_v63 = vsub.f32 %v2612_v0, %v2626_v25 }
0x1aad   :  { %v2629_v16 = vpop.xlane.xlu1 %2628 }
0x1aae   :  { %v2638_v38 = vmul.f32 1.442695, %v2632_v63  ;;  %v2633_v20 = vsub.f32 %v2615_v9, %v2629_v16 }
0x1aaf   :  { %v2665_v28 = vpop.permute.xlu0 %2664 }
0x1ab0   :  { %4464 = vpow2.f32 %v2638_v38  ;;  %v2640_v4 = vmul.f32 1.442695, %v2633_v20  ;;  %4109 = vmatpush3.bf16.msra.mxu0 %v2665_v28 }
0x1ab1   :  { %v2712_v32 = vpop.permute.xlu1 %2711  ;;  %4120 = vmatprep.subr.bf16.mxu0 %v4525_v37 }
0x1ab2   :  { %v4461_v21 = vpop.eup %4460  ;;  %4466 = vpow2.f32 %v2640_v4  ;;  %4115 = vmatpush3.bf16.msra.mxu1 %v2712_v32 }
0x1ab3   :  { %v2642_v22 = vsel %vm565_vm3, %v4461_v21, 0.0  ;;  %4126 = vmatprep.subr.bf16.mxu1 %v4525_v37 }
0x1ab4   :  { %v4463_v24 = vpop.eup %4462  ;;  %2643 = vadd.xlane.f32.xlu0 %v2642_v22 }
0x1ab5   :  { %v2645_v27 = vsel %vm565_vm3, %v4463_v24, 0.0  ;;  %v2761_v45 = vpop.permute.xlu1 %2760 }
0x1ab6   :  { %2646 = vadd.xlane.f32.xlu1 %v2645_v27  ;;  %v2766_v61 = vsel %vm467_vm15, %v2761_v45, 0 }
0x1aba   :  { %v4465_v34 = vpop.eup %4464 }
0x1abb   :  { %v2648_v29 = vsel %vm565_vm3, %v4465_v34, 0.0 }
0x1abc   :  { %v4467_v30 = vpop.eup %4466  ;;  %2649 = vadd.xlane.f32.xlu0 %v2648_v29 }
0x1abd   :  { %v2651_v36 = vsel %vm565_vm3, %v4467_v30, 0.0 }
0x1abe   :  { %2652 = vadd.xlane.f32.xlu1 %v2651_v36 }
0x1acf   :  { %2758 = vrot.lane.b32.xlu1 %v5096_v3, %s4537_s20 }
0x1ad2   :  { %2811 = vrot.lane.b32.xlu0 %v5094_v48, %s4536_s19 }
0x1ad6   :  { %2809 = vrot.lane.b32.xlu0 %v5094_v48, %s4537_s20 }
0x1b41   :  { %v2644_v39 = vpop.xlane.xlu0 %2643 }
0x1b42   :  { %4468 = vrcp.f32 %v2644_v39 }
0x1b43   :  { %v2647_v14 = vpop.xlane.xlu1 %2646 }
0x1b44   :  { %4470 = vrcp.f32 %v2647_v14 }
0x1b49   :  { %v2650_v19 = vpop.xlane.xlu0 %2649 }
0x1b4a   :  { %4472 = vrcp.f32 %v2650_v19 }
0x1b4b   :  { %v2653_v17 = vpop.xlane.xlu1 %2652 }
0x1b4c   :  { %v4469_v52 = vpop.eup %4468  ;;  %4474 = vrcp.f32 %v2653_v17 }
0x1b4d   :  { %v2658_v58 = vmul.f32 %v4469_v52, %v4461_v21  ;;  %v2812_v9 = vpop.permute.xlu0 %2811 }
0x1b4e   :  { %v4471_v55 = vpop.eup %4470  ;;  %v2817_v40 = vsel %vm467_vm15, %v2812_v9, 0 }
0x1b4f   :  { %v2659_v59 = vmul.f32 %v4471_v55, %v4463_v24  ;;  %v2759_v35 = vpop.permute.xlu1 %2758 }
0x1b51   :  { %v2662_v60 = vpack.c.bf16 %v2659_v59, %v2658_v58  ;;  %v2810_v41 = vpop.permute.xlu0 %2809 }
0x1b53   :  { %4111 = vmatmul.mubr.msk.bf16.vlgmr.msra.gmra.mrb[60].mxu0 %vm565_vm3, %v2662_v60 }
0x1b54   :  { %v4473_v62 = vpop.eup %4472  ;;  %4121 = vmatpush3.bf16.xpose.msra.mxu0 %v2766_v61  ;;  %4122 = vmatprep.mubr.msk.bf16.mxu0 %vm4526_vm11, %v4525_v37 }
0x1b55   :  { %4132 = vmatprep.subr.bf16.mxu0 %v4525_v37  ;;  %v2660_v15 = vmul.f32 %v4473_v62, %v4465_v34 }
0x1b56   :  { %v4475_v0 = vpop.eup %4474 }
0x1b57   :  { %v2661_v12 = vmul.f32 %v4475_v0, %v4467_v30 }
0x1b59   :  { %v2663_v8 = vpack.c.bf16 %v2661_v12, %v2660_v15 }
0x1b5b   :  { %4117 = vmatmul.mubr.msk.bf16.vlgmr.msra.gmra.mrb[68].mxu1 %vm565_vm3, %v2663_v8  ;;  %4123 = vmatmul.mubr.msk.bf16.vlgmr.msra.gmra.mrb[64].mxu0 %vm467_vm15, %v2759_v35 }
0x1b5c   :  { %4127 = vmatpush3.bf16.xpose.msra.mxu1 %v2817_v40  ;;  %4128 = vmatprep.mubr.msk.bf16.mxu1 %vm4526_vm11, %v4525_v37 }
0x1b5d   :  { %4138 = vmatprep.subr.bf16.mxu1 %v4525_v37  ;;  %4134 = vmatprep.mubr.msk.bf16.mxu0 %vm4526_vm11, %v4525_v37 }
0x1b63   :  { %4129 = vmatmul.mubr.msk.bf16.vlgmr.msra.gmra.mrb[72].mxu1 %vm467_vm15, %v2810_v41 }
0x1b64   :  { %4140 = vmatprep.mubr.msk.bf16.mxu1 %vm4526_vm11, %v4525_v37 }
0x1c26   :  { %v2704_v6 = vpop.f32.mrb[60].mxu0 }
0x1c27   :  { %v4112_v7 = vpop.f32.mrb[61].mxu0 }
0x1c28   :  { %v2707_v2 = vpop.f32.mrb[62].mxu0 }
0x1c29   :  { %v4274_v10 = vpack.i.bf16 %v2707_v2, %v2704_v6  ;;  %v4113_v1 = vpop.f32.mrb[63].mxu0 }
0x1c2e   :  { %v2751_v25 = vpop.f32.mrb[68].mxu1  ;;  %v2802_v63 = vpop.f32.mrb[64].mxu0 }
0x1c2f   :  { %v2803_v16 = vadd.f32 %v2802_v63, %v4752_v56  ;;  %v4118_v38 = vpop.f32.mrb[69].mxu1  ;;  %v4124_v20 = vpop.f32.mrb[65].mxu0 }
0x1c30   :  { %v2754_v28 = vpop.f32.mrb[70].mxu1  ;;  %v2805_v4 = vpop.f32.mrb[66].mxu0 }
0x1c31   :  { %v4279_v32 = vpack.i.bf16 %v2754_v28, %v2751_v25  ;;  %v2806_v21 = vadd.f32 %v2805_v4, %v4754_v57  ;;  %v4119_v22 = vpop.f32.mrb[71].mxu1  ;;  %v4125_v24 = vpop.f32.mrb[67].mxu0  ;;  %v2860_v37 = vsel %vm565_vm3, %v2803_v16, -inf  ;;  %v4318_v28 = vld [vmem:[%s5424_s4 + $0x10] sm:$0xff]  }
0x1c32   :  { %2861 = vmax.xlane.f32.xlu1 %v2860_v37 }
0x1c33   :  { %v2863_v27 = vsel %vm565_vm3, %v2806_v21, -inf }
0x1c34   :  { %2864 = vmax.xlane.f32.xlu0 %v2863_v27 }
0x1c36   :  { %v2853_v34 = vpop.f32.mrb[72].mxu1 }
0x1c37   :  { %v2854_v29 = vadd.f32 %v2853_v34, %v4752_v56  ;;  %v4130_v30 = vpop.f32.mrb[73].mxu1 }
0x1c38   :  { %v2856_v36 = vpop.f32.mrb[74].mxu1 }
0x1c39   :  { %v2857_v45 = vadd.f32 %v2856_v36, %v4754_v57  ;;  %v4131_v39 = vpop.f32.mrb[75].mxu1  ;;  %v2866_v14 = vsel %vm565_vm3, %v2854_v29, -inf }
0x1c3a   :  { %2867 = vmax.xlane.f32.xlu0 %v2866_v14 }
0x1c3b   :  { %v2869_v19 = vsel %vm565_vm3, %v2857_v45, -inf }
0x1c3c   :  { %2870 = vmax.xlane.f32.xlu1 %v2869_v19 }
0x1cbf   :  { %v2862_v17 = vpop.xlane.xlu1 %2861 }
0x1cc0   :  { %v2872_v52 = vsub.f32 %v2803_v16, %v2862_v17 }
0x1cc1   :  { %v2865_v55 = vpop.xlane.xlu0 %2864 }
0x1cc2   :  { %v2876_v58 = vmul.f32 1.442695, %v2872_v52  ;;  %v2873_v59 = vsub.f32 %v2806_v21, %v2865_v55 }
0x1cc4   :  { %4476 = vpow2.f32 %v2876_v58  ;;  %v2878_v60 = vmul.f32 1.442695, %v2873_v59 }
0x1cc6   :  { %4478 = vpow2.f32 %v2878_v60 }
0x1cc7   :  { %v2868_v56 = vpop.xlane.xlu0 %2867 }
0x1cc8   :  { %v2874_v61 = vsub.f32 %v2854_v29, %v2868_v56 }
0x1cc9   :  { %v2871_v62 = vpop.xlane.xlu1 %2870 }
0x1cca   :  { %v2880_v0 = vmul.f32 1.442695, %v2874_v61  ;;  %v2875_v57 = vsub.f32 %v2857_v45, %v2871_v62 }
0x1ccc   :  { %4480 = vpow2.f32 %v2880_v0  ;;  %v2882_v15 = vmul.f32 1.442695, %v2875_v57 }
0x1cce   :  { %v4477_v12 = vpop.eup %4476  ;;  %4482 = vpow2.f32 %v2882_v15 }
0x1ccf   :  { %v2884_v9 = vsel %vm565_vm3, %v4477_v12, 0.0 }
0x1cd0   :  { %v4479_v8 = vpop.eup %4478  ;;  %2885 = vadd.xlane.f32.xlu0 %v2884_v9 }
0x1cd1   :  { %v2887_v35 = vsel %vm565_vm3, %v4479_v8, 0.0 }
0x1cd2   :  { %2888 = vadd.xlane.f32.xlu1 %v2887_v35 }
0x1cd6   :  { %v4481_v40 = vpop.eup %4480 }
0x1cd7   :  { %v2890_v41 = vsel %vm565_vm3, %v4481_v40, 0.0 }
0x1cd8   :  { %v4483_v6 = vpop.eup %4482  ;;  %2891 = vadd.xlane.f32.xlu0 %v2890_v41 }
0x1cd9   :  { %v2893_v7 = vsel %vm565_vm3, %v4483_v6, 0.0 }
0x1cda   :  { %2894 = vadd.xlane.f32.xlu1 %v2893_v7 }
0x1ceb   :  { %2953 = vrot.lane.b32.xlu1 %v5094_v48, %s4538_s1 }
0x1cee   :  { %2906 = vrot.lane.b32.xlu0 %v5096_v3, %s4538_s1 }
0x1cef   :  { %4265 = vrot.lane.b32.xlu1 %v4264_v43, %s4539_s21 }
0x1cf2   :  { %4270 = vrot.lane.b32.xlu0 %v4269_v54, %s4539_s21 }
0x1cf3   :  { %4275 = vrot.lane.b32.xlu1 %v4274_v10, %s4540_s22 }
0x1cf6   :  { %4280 = vrot.lane.b32.xlu0 %v4279_v32, %s4540_s22  ;;  %v4319_v32 = vld [vmem:[%s5424_s4 + $0x18] sm:$0xff]  }
0x1d5d   :  { %v2886_v2 = vpop.xlane.xlu0 %2885 }
0x1d5e   :  { %4484 = vrcp.f32 %v2886_v2 }
0x1d5f   :  { %v2889_v48 = vpop.xlane.xlu1 %2888 }
0x1d60   :  { %4486 = vrcp.f32 %v2889_v48 }
0x1d65   :  { %v2892_v1 = vpop.xlane.xlu0 %2891 }
0x1d66   :  { %4488 = vrcp.f32 %v2892_v1 }
0x1d67   :  { %v2895_v3 = vpop.xlane.xlu1 %2894 }
0x1d68   :  { %v4485_v25 = vpop.eup %4484  ;;  %4490 = vrcp.f32 %v2895_v3 }
0x1d69   :  { %v2907_v33 = vpop.permute.xlu0 %2906  ;;  %v2900_v43 = vmul.f32 %v4485_v25, %v4477_v12 }
0x1d6a   :  { %v4487_v42 = vpop.eup %4486  ;;  %4133 = vmatpush3.bf16.msra.mxu0 %v2907_v33 }
0x1d6b   :  { %v2901_v63 = vmul.f32 %v4487_v42, %v4479_v8  ;;  %v2954_v46 = vpop.permute.xlu1 %2953  ;;  %4144 = vmatprep.subr.bf16.mxu0 %v4318_v28  ;;  %v3070_v42 = vrot.slane %v5090_v53, %v4710_v13 }
0x1d6c   :  { %4139 = vmatpush3.bf16.msra.mxu1 %v2954_v46 }
0x1d6d   :  { %v2904_v18 = vpack.c.bf16 %v2901_v63, %v2900_v43  ;;  %v4271_v14 = vpop.permute.xlu0 %4270 }
0x1d6e   :  { %v4273_v8 = vunpack.i.h.bf16 %v4271_v14  ;;  %v4272_v35 = vunpack.i.l.bf16 %v4271_v14 }
0x1d6f   :  { %4135 = vmatmul.mubr.msk.bf16.vlgmr.msra.gmra.mrb[68].mxu0 %vm565_vm3, %v2904_v18  ;;  %v4266_v45 = vpop.permute.xlu1 %4265 }
0x1d70   :  { %v4489_v54 = vpop.eup %4488  ;;  %4145 = vmatpush3.bf16.msra.mxu0 %v4318_v28  ;;  %v4268_v19 = vunpack.i.h.bf16 %v4266_v45  ;;  %v4267_v17 = vunpack.i.l.bf16 %v4266_v45 }
0x1d71   :  { %v2902_v16 = vmul.f32 %v4489_v54, %v4481_v40  ;;  %4146 = vmatprep.subr.bf16.mxu0 %v4319_v32  ;;  %v4281_v57 = vpop.permute.xlu0 %4280 }
0x1d72   :  { %v4491_v10 = vpop.eup %4490  ;;  %v3049_v59 = vsel %vm467_vm15, %v5158_v26, %v4268_v19  ;;  %v3048_v60 = vsel %vm467_vm15, %v5156_v23, %v4267_v17  ;;  %v4283_v40 = vunpack.i.h.bf16 %v4281_v57  ;;  %v4282_v41 = vunpack.i.l.bf16 %v4281_v57 }
0x1d73   :  { %v2903_v38 = vmul.f32 %v4491_v10, %v4483_v6  ;;  %v4276_v39 = vpop.permute.xlu1 %4275  ;;  %v3051_v23 = vsel %vm467_vm15, %v5163_v31, %v4273_v8  ;;  %v3050_v6 = vsel %vm467_vm15, %v5160_v11, %v4272_v35 }
0x1d74   :  { %4147 = vmatpush3.bf16.msra.mxu0 %v4319_v32  ;;  %v4278_v52 = vunpack.i.h.bf16 %v4276_v39  ;;  %v4277_v55 = vunpack.i.l.bf16 %v4276_v39  ;;  %v3054_v48 = vsel %vm565_vm3, %v3050_v6, %v4282_v41  ;;  %v3055_v1 = vsel %vm565_vm3, %v3051_v23, %v4283_v40  ;;  %v4518_v41 = vld [vmem:[%s5422_s8 + $0x4] sm:$0xf] }
0x1d75   :  { %v2905_v20 = vpack.c.bf16 %v2903_v38, %v2902_v16 }
0x1d76   :  { %v3052_v62 = vsel %vm565_vm3, %v3048_v60, %v4277_v55  ;;  %v3053_v0 = vsel %vm565_vm3, %v3049_v59, %v4278_v52  ;;  %v4321_v59 = vld [vmem:[%s5425_s5 + $0x18] sm:$0xff]  }
0x1d77   :  { %4141 = vmatmul.mubr.msk.bf16.vlgmr.msra.gmra.mrb[76].mxu1 %vm565_vm3, %v2905_v20 }
0x1e42   :  { %v2946_v4 = vpop.f32.mrb[68].mxu0 }
0x1e43   :  { %v4136_v21 = vpop.f32.mrb[69].mxu0 }
0x1e44   :  { %v2949_v22 = vpop.f32.mrb[70].mxu0 }
0x1e45   :  { %v4284_v24 = vpack.i.bf16 %v2949_v22, %v2946_v4  ;;  %v4137_v37 = vpop.f32.mrb[71].mxu0 }
0x1e47   :  { %4285 = vrot.lane.b32.xlu1 %v4284_v24, %s4541_s25 }
0x1e4a   :  { %v2993_v27 = vpop.f32.mrb[76].mxu1 }
0x1e4b   :  { %v4142_v34 = vpop.f32.mrb[77].mxu1 }
0x1e4c   :  { %v2996_v29 = vpop.f32.mrb[78].mxu1 }
0x1e4d   :  { %v4289_v30 = vpack.i.bf16 %v2996_v29, %v2993_v27  ;;  %v4143_v36 = vpop.f32.mrb[79].mxu1 }
0x1e4f   :  { %4290 = vrot.lane.b32.xlu0 %v4289_v30, %s4541_s25 }
0x1eb9   :  { %v4286_v58 = vpop.permute.xlu1 %4285 }
0x1eba   :  { %v4288_v56 = vunpack.i.h.bf16 %v4286_v58  ;;  %v4287_v61 = vunpack.i.l.bf16 %v4286_v58  ;;  %v4320_v58 = vld [vmem:[%s5425_s5 + $0x10] sm:$0xff]  }
0x1ebb   :  { %4152 = vmatprep.subr.bf16.mxu1 %v4320_v58 }
0x1ebc   :  { %v3057_v15 = vsel %vm1488_vm4, %v3053_v0, %v4288_v56  ;;  %v3056_v12 = vsel %vm1488_vm4, %v3052_v62, %v4287_v61  ;;  %4153 = vmatpush3.bf16.msra.mxu1 %v4320_v58 }
0x1ebd   :  { %v3060_v9 = vpack.c.bf16 %v3057_v15, %v3056_v12  ;;  %4154 = vmatprep.subr.bf16.mxu1 %v4321_v59 }
0x1ebf   :  { %4148 = vmatprep.mubr.msk.bf16.mxu0 %vm315_vm13, %v3060_v9 }
0x1ec0   :  { %4155 = vmatpush3.bf16.msra.mxu1 %v4321_v59 }
0x1ec1   :  { %v4291_v26 = vpop.permute.xlu0 %4290 }
0x1ec2   :  { %v4293_v7 = vunpack.i.h.bf16 %v4291_v26  ;;  %v4292_v2 = vunpack.i.l.bf16 %v4291_v26  ;;  %v3197_v26 = vrot.slane %v4518_v41, %v4999_v5 }
0x1ec4   :  { %v3058_v3 = vsel %vm1488_vm4, %v3054_v48, %v4292_v2  ;;  %v3059_v25 = vsel %vm1488_vm4, %v3055_v1, %v4293_v7  ;;  %v3205_v1 = vrot.slane %v4518_v41, %v5006_v49 }
0x1ec5   :  { %v3061_v33 = vpack.c.bf16 %v3059_v25, %v3058_v3 }
0x1ec7   :  { %4149 = vmatmul.mubr.msk.bf16.vlgmr.msra.gmra.mrb[72].mxu0 %vm315_vm13, %v3061_v33 }
0x1f9a   :  { %v4150_v31 = vpop.f32.mrb[72].mxu0 }
0x1f9b   :  { %v3123_v43 = vpop.f32.mrb[73].mxu0  ;;  %v3132_v54 = vadd.f32 %v4150_v31, %v3070_v42 }
0x1f9c   :  { %v3124_v63 = vadd.f32 %v3123_v43, %v3070_v42  ;;  %v4151_v11 = vpop.f32.mrb[74].mxu0 }
0x1f9d   :  { %v3135_v46 = vadd.f32 %v4151_v11, %v3070_v42  ;;  %v3126_v18 = vpop.f32.mrb[75].mxu0  ;;  %v5328_v53 = vadd.f32 %v3132_v54, %v5049_v47 }
0x1f9e   :  { %v5317_v10 = vadd.f32 %v3124_v63, %v5045_v44  ;;  %v3127_v16 = vadd.f32 %v3126_v18, %v3070_v42 }
0x1f9f   :  { %v5320_v38 = vadd.f32 %v3135_v46, %v5055_v51  ;;  %v3148_v51 = vsel %vm315_vm13, %v5328_v53, 0.0 }
0x1fa0   :  { %v5323_v20 = vadd.f32 %v3127_v16, %v5051_v50  ;;  %v3142_v13 = vsel %vm315_vm13, %v5317_v10, 0.0 }
0x1fa1   :  { %3143 = vadd.xlane.f32.xlu1 %v3142_v13  ;;  %v3151_v44 = vsel %vm315_vm13, %v5320_v38, 0.0 }
0x1fa2   :  { %v3145_v28 = vsel %vm315_vm13, %v5323_v20, 0.0 }
0x1fa3   :  { %3146 = vadd.xlane.f32.xlu0 %v3145_v28  ;;  %v4322_v28 = vld [vmem:[%s5426_s6 + $0x40] sm:$0xff]  }
0x1fa4   :  { %4160 = vmatprep.subr.bf16.mxu0 %v4322_v28 }
0x1fa5   :  { %3152 = vadd.xlane.f32.xlu1 %v3151_v44  ;;  %4161 = vmatpush3.bf16.msra.mxu0 %v4322_v28  ;;  %v4323_v44 = vld [vmem:[%s5426_s6 + $0x48] sm:$0xff]  }
0x1fa6   :  { %4162 = vmatprep.subr.bf16.mxu0 %v4323_v44 }
0x1fa7   :  { %3149 = vadd.xlane.f32.xlu0 %v3148_v51  ;;  %v4324_v51 = vld [vmem:[%s5426_s6 + $0x50] sm:$0xff]  }
0x1fa9   :  { %4163 = vmatpush3.bf16.msra.mxu0 %v4323_v44 }
0x1faa   :  { %4164 = vmatprep.subr.bf16.mxu0 %v4324_v51 }
0x1fad   :  { %4165 = vmatpush3.bf16.msra.mxu0 %v4324_v51 }
0x202e   :  { %v3144_v50 = vpop.xlane.xlu1 %3143 }
0x202f   :  { %v3154_v4 = vmul.f32 0.03125, %v3144_v50  ;;  %v4325_v50 = vld [vmem:[%s5426_s6 + $0x58] sm:$0xff]  }
0x2030   :  { %v3147_v32 = vpop.xlane.xlu0 %3146  ;;  %4166 = vmatprep.subr.bf16.mxu0 %v4325_v50 }
0x2031   :  { %v3158_v21 = vsub.f32 %v5317_v10, %v3154_v4  ;;  %v3155_v22 = vmul.f32 0.03125, %v3147_v32  ;;  %4167 = vmatpush3.bf16.msra.mxu0 %v4325_v50  ;;  %v4326_v4 = vld [vmem:[%s5426_s6 + $0x60] sm:$0xff]   ;;  %v4327_v32 = vld [vmem:[%s5426_s6 + $0x68] sm:$0xff]  }
0x2032   :  { %v3153_v47 = vpop.xlane.xlu1 %3152  ;;  %4168 = vmatprep.subr.bf16.mxu0 %v4326_v4 }
0x2033   :  { %v3159_v24 = vsub.f32 %v5323_v20, %v3155_v22  ;;  %v3157_v37 = vmul.f32 0.03125, %v3153_v47  ;;  %v3162_v27 = vmul.f32 %v3158_v21, %v3158_v21  ;;  %v4329_v22 = vld [vmem:[%s5426_s6 + $0x78] sm:$0xff]   ;;  %v4519_v47 = vld [vmem:[%s5423_s7 + $0x4] sm:$0xf] }
0x2034   :  { %v3150_v34 = vpop.xlane.xlu0 %3149 }
0x2035   :  { %v3161_v29 = vsub.f32 %v5320_v38, %v3157_v37  ;;  %v3156_v30 = vmul.f32 0.03125, %v3150_v34  ;;  %v3166_v36 = vsel %vm315_vm13, %v3162_v27, 0.0  ;;  %v3163_v45 = vmul.f32 %v3159_v24, %v3159_v24  ;;  %4169 = vmatpush3.bf16.msra.mxu0 %v4326_v4 }
0x2036   :  { %3167 = vadd.xlane.f32.xlu0 %v3166_v36  ;;  %4170 = vmatprep.subr.bf16.mxu0 %v4327_v32 }
0x2037   :  { %v3160_v39 = vsub.f32 %v5328_v53, %v3156_v30  ;;  %v3169_v14 = vsel %vm315_vm13, %v3163_v45, 0.0  ;;  %v3165_v19 = vmul.f32 %v3161_v29, %v3161_v29 }
0x2038   :  { %3170 = vadd.xlane.f32.xlu1 %v3169_v14 }
0x2039   :  { %v3164_v17 = vmul.f32 %v3160_v39, %v3160_v39  ;;  %v3175_v55 = vsel %vm315_vm13, %v3165_v19, 0.0  ;;  %4171 = vmatpush3.bf16.msra.mxu0 %v4327_v32 }
0x203b   :  { %v3172_v52 = vsel %vm315_vm13, %v3164_v17, 0.0 }
0x203c   :  { %3173 = vadd.xlane.f32.xlu0 %v3172_v52  ;;  %3176 = vadd.xlane.f32.xlu1 %v3175_v55 }
0x20c3   :  { %v3168_v60 = vpop.xlane.xlu0 %3167 }
0x20c4   :  { %v3178_v56 = vmul.f32 0.03125, %v3168_v60 }
0x20c5   :  { %v3171_v61 = vpop.xlane.xlu1 %3170 }
0x20c6   :  { %v3182_v62 = vadd.f32 1e-05, %v3178_v56  ;;  %v3179_v0 = vmul.f32 0.03125, %v3171_v61 }
0x20c8   :  { %4492 = vrsqrt.f32 %v3182_v62  ;;  %v3183_v57 = vadd.f32 1e-05, %v3179_v0 }
0x20c9   :  { %v3174_v15 = vpop.xlane.xlu0 %3173  ;;  %v3177_v12 = vpop.xlane.xlu1 %3176 }
0x20ca   :  { %4494 = vrsqrt.f32 %v3183_v57  ;;  %v3180_v9 = vmul.f32 0.03125, %v3174_v15  ;;  %v3181_v8 = vmul.f32 0.03125, %v3177_v12 }
0x20cc   :  { %v3184_v35 = vadd.f32 1e-05, %v3180_v9  ;;  %v3185_v40 = vadd.f32 1e-05, %v3181_v8 }
0x20ce   :  { %4496 = vrsqrt.f32 %v3184_v35 }
0x20cf   :  { %4498 = vrsqrt.f32 %v3185_v40 }
0x20d2   :  { %v4493_v23 = vpop.eup %4492 }
0x20d3   :  { %v3190_v6 = vmul.f32 %v4493_v23, %v3158_v21  ;;  %v4328_v21 = vld [vmem:[%s5426_s6 + $0x70] sm:$0xff]  }
0x20d4   :  { %v4495_v7 = vpop.eup %4494  ;;  %4172 = vmatprep.subr.bf16.mxu0 %v4328_v21 }
0x20d5   :  { %v3191_v2 = vmul.f32 %v4495_v7, %v3159_v24  ;;  %v3198_v48 = vmul.f32 %v3197_v26, %v3190_v6  ;;  %4173 = vmatpush3.bf16.msra.mxu0 %v4328_v21  ;;  %v3220_v24 = vrot.slane %v4519_v47, %v4999_v5 }
0x20d6   :  { %4174 = vmatprep.subr.bf16.mxu0 %v4329_v22 }
0x20d7   :  { %v3199_v3 = vmul.f32 %v3197_v26, %v3191_v2  ;;  %v3206_v31 = vadd.f32 %v3205_v1, %v3198_v48 }
0x20d8   :  { %v4497_v25 = vpop.eup %4496 }
0x20d9   :  { %v4499_v33 = vpop.eup %4498  ;;  %v3192_v42 = vmul.f32 %v4497_v25, %v3160_v39  ;;  %v3207_v43 = vadd.f32 %v3205_v1, %v3199_v3  ;;  %4175 = vmatpush3.bf16.msra.mxu0 %v4329_v22 }
0x20da   :  { %v3193_v63 = vmul.f32 %v4499_v33, %v3161_v29 }
0x20db   :  { %v3200_v11 = vmul.f32 %v3197_v26, %v3192_v42  ;;  %v3210_v46 = vpack.c.bf16 %v3207_v43, %v3206_v31 }
0x20dc   :  { %v3201_v18 = vmul.f32 %v3197_v26, %v3193_v63 }
0x20dd   :  { %4156 = vmatprep.mubr.msk.bf16.mxu1 %vm315_vm13, %v3210_v46  ;;  %v3208_v54 = vadd.f32 %v3205_v1, %v3200_v11 }
0x20de   :  { %v3209_v16 = vadd.f32 %v3205_v1, %v3201_v18 }
0x20e0   :  { %v3211_v13 = vpack.c.bf16 %v3209_v16, %v3208_v54  ;;  %v3447_v16 = vrot.slane %v4519_v47, %v5006_v49 }
0x20e2   :  { %4157 = vmatmul.mubr.msk.bf16.vlgmr.msra.gmra.mrb[80].mxu1 %vm315_vm13, %v3211_v13 }
0x21b5   :  { %v4158_v37 = vpop.f32.mrb[80].mxu1 }
0x21b6   :  { %v3282_v27 = vadd.f32 %v4158_v37, %v3220_v24  ;;  %v3273_v34 = vpop.f32.mrb[81].mxu1 }
0x21b7   :  { %v3274_v29 = vadd.f32 %v3273_v34, %v3220_v24  ;;  %v4159_v30 = vpop.f32.mrb[82].mxu1 }
0x21b8   :  { %v3294_v36 = vmul.f32 0.044715, %v3282_v27  ;;  %v3285_v45 = vadd.f32 %v4159_v30, %v3220_v24  ;;  %v3276_v39 = vpop.f32.mrb[83].mxu1  ;;  %v3290_v48 = vmul.f32 0.5, %v3282_v27 }
0x21b9   :  { %v3292_v14 = vmul.f32 0.044715, %v3274_v29  ;;  %v3277_v19 = vadd.f32 %v3276_v39, %v3220_v24  ;;  %v3288_v25 = vmul.f32 0.5, %v3274_v29 }
0x21ba   :  { %v3298_v17 = vmul.f32 %v3294_v36, %v3282_v27  ;;  %v3295_v52 = vmul.f32 0.044715, %v3285_v45  ;;  %v3291_v1 = vmul.f32 0.5, %v3285_v45 }
0x21bb   :  { %v3296_v55 = vmul.f32 %v3292_v14, %v3274_v29  ;;  %v3293_v58 = vmul.f32 0.044715, %v3277_v19  ;;  %v3289_v33 = vmul.f32 0.5, %v3277_v19 }
0x21bc   :  { %v3302_v59 = vmul.f32 %v3298_v17, %v3282_v27  ;;  %v3299_v60 = vmul.f32 %v3295_v52, %v3285_v45 }
0x21bd   :  { %v3300_v56 = vmul.f32 %v3296_v55, %v3274_v29  ;;  %v3297_v61 = vmul.f32 %v3293_v58, %v3277_v19 }
0x21be   :  { %v3306_v62 = vadd.f32 %v3302_v59, %v3282_v27  ;;  %v3303_v5 = vmul.f32 %v3299_v60, %v3285_v45 }
0x21bf   :  { %v3301_v0 = vmul.f32 %v3297_v61, %v3277_v19  ;;  %v3304_v57 = vadd.f32 %v3300_v56, %v3274_v29 }
0x21c0   :  { %v3310_v15 = vmul.f32 0.7978846, %v3306_v62  ;;  %v3307_v12 = vadd.f32 %v3303_v5, %v3285_v45  ;;  %v4330_v5 = vld [vmem:[%s5427_s10] sm:$0xff]  }
0x21c1   :  { %v3305_v9 = vadd.f32 %v3301_v0, %v3277_v19  ;;  %v3308_v8 = vmul.f32 0.7978846, %v3304_v57  ;;  %4180 = vmatprep.subr.bf16.mxu1 %v4330_v5  ;;  %v4331_v0 = vld [vmem:[%s5427_s10 + $0x8] sm:$0xff]  }
0x21c2   :  { %4500 = vtanh.f32 %v3310_v15  ;;  %v3311_v35 = vmul.f32 0.7978846, %v3307_v12  ;;  %4181 = vmatpush3.bf16.msra.mxu1 %v4330_v5 }
0x21c3   :  { %v3309_v40 = vmul.f32 0.7978846, %v3305_v9  ;;  %4502 = vtanh.f32 %v3308_v8  ;;  %4182 = vmatprep.subr.bf16.mxu1 %v4331_v0 }
0x21c4   :  { %4504 = vtanh.f32 %v3311_v35 }
0x21c5   :  { %4506 = vtanh.f32 %v3309_v40 }
0x21c6   :  { %4183 = vmatpush3.bf16.msra.mxu1 %v4331_v0 }
0x21cc   :  { %v4501_v41 = vpop.eup %4500 }
0x21cd   :  { %v4503_v26 = vpop.eup %4502  ;;  %v3318_v23 = vadd.f32 1.0, %v4501_v41 }
0x21ce   :  { %v4505_v6 = vpop.eup %4504  ;;  %v3316_v7 = vadd.f32 1.0, %v4503_v26 }
0x21cf   :  { %v4507_v2 = vpop.eup %4506  ;;  %v3319_v3 = vadd.f32 1.0, %v4505_v6  ;;  %v3322_v31 = vmul.f32 %v3318_v23, %v3290_v48  ;;  %v3733_v48 = vld [vmem:[%s5428_s9] ss:$0 sm:$0xff] }
0x21d0   :  { %v3317_v42 = vadd.f32 1.0, %v4507_v2  ;;  %v3320_v63 = vmul.f32 %v3316_v7, %v3288_v25 }
0x21d1   :  { %v3323_v43 = vmul.f32 %v3319_v3, %v3291_v1 }
0x21d2   :  { %v3321_v11 = vmul.f32 %v3317_v42, %v3289_v33 }
0x21d3   :  { %v3325_v46 = vpack.c.bf16 %v3323_v43, %v3322_v31  ;;  %v3734_v31 = vld [vmem:[%s5428_s9 + $0x1] ss:$0 sm:$0xff] }
0x21d4   :  { %v3324_v18 = vpack.c.bf16 %v3321_v11, %v3320_v63 }
0x21d6   :  { %4176 = vmatprep.mubr.bf16.mxu0 %v3324_v18 }
0x21d7   :  { %4177 = vmatmul.mubr.bf16.vlgmr.msra.gmra.mrb[76].mxu0 %v3325_v46 }
0x22aa   :  { %v4178_v54 = vpop.f32.mrb[76].mxu0 }
0x22ab   :  { %v3425_v13 = vpop.f32.mrb[77].mxu0  ;;  %v3442_v28 = vadd.f32 %v4178_v54, %v5328_v53 }
0x22ac   :  { %v3440_v44 = vadd.f32 %v3425_v13, %v5317_v10  ;;  %v4179_v51 = vpop.f32.mrb[78].mxu0 }
0x22ad   :  { %v3428_v50 = vpop.f32.mrb[79].mxu0  ;;  %v3443_v32 = vadd.f32 %v4179_v51, %v5320_v38  ;;  %v3450_v22 = vadd.f32 %v3447_v16, %v3442_v28 }
0x22ae   :  { %v3448_v4 = vadd.f32 %v3447_v16, %v3440_v44  ;;  %v3441_v21 = vadd.f32 %v3428_v50, %v5323_v20 }
0x22af   :  { %v3451_v27 = vadd.f32 %v3447_v16, %v3443_v32  ;;  %v3460_v53 = vsel %vm315_vm13, %v3450_v22, 0.0 }
0x22b0   :  { %v3449_v24 = vadd.f32 %v3447_v16, %v3441_v21  ;;  %v3454_v37 = vsel %vm315_vm13, %v3448_v4, 0.0 }
0x22b1   :  { %3455 = vadd.xlane.f32.xlu0 %v3454_v37  ;;  %v3463_v10 = vsel %vm315_vm13, %v3451_v27, 0.0 }
0x22b2   :  { %v3457_v49 = vsel %vm315_vm13, %v3449_v24, 0.0 }
0x22b3   :  { %3458 = vadd.xlane.f32.xlu1 %v3457_v49 }
0x22b5   :  { %3461 = vadd.xlane.f32.xlu0 %v3460_v53 }
0x22b7   :  { %3464 = vadd.xlane.f32.xlu1 %v3463_v10 }
0x233e   :  { %v3456_v47 = vpop.xlane.xlu0 %3455 }
0x233f   :  { %v3466_v34 = vmul.f32 0.03125, %v3456_v47 }
0x2340   :  { %v3459_v38 = vpop.xlane.xlu1 %3458 }
0x2341   :  { %v3470_v29 = vsub.f32 %v3448_v4, %v3466_v34  ;;  %v3467_v20 = vmul.f32 0.03125, %v3459_v38 }
0x2342   :  { %v3462_v30 = vpop.xlane.xlu0 %3461 }
0x2343   :  { %v3471_v36 = vsub.f32 %v3449_v24, %v3467_v20  ;;  %v3468_v45 = vmul.f32 0.03125, %v3462_v30  ;;  %v3474_v39 = vmul.f32 %v3470_v29, %v3470_v29 }
0x2344   :  { %v3465_v14 = vpop.xlane.xlu1 %3464 }
0x2345   :  { %v3472_v19 = vsub.f32 %v3450_v22, %v3468_v45  ;;  %v3469_v17 = vmul.f32 0.03125, %v3465_v14  ;;  %v3478_v52 = vsel %vm315_vm13, %v3474_v39, 0.0  ;;  %v3475_v55 = vmul.f32 %v3471_v36, %v3471_v36 }
0x2346   :  { %3479 = vadd.xlane.f32.xlu0 %v3478_v52 }
0x2347   :  { %v3473_v58 = vsub.f32 %v3451_v27, %v3469_v17  ;;  %v3481_v59 = vsel %vm315_vm13, %v3475_v55, 0.0  ;;  %v3476_v60 = vmul.f32 %v3472_v19, %v3472_v19 }
0x2348   :  { %3482 = vadd.xlane.f32.xlu1 %v3481_v59 }
0x2349   :  { %v3484_v56 = vsel %vm315_vm13, %v3476_v60, 0.0  ;;  %v3477_v61 = vmul.f32 %v3473_v58, %v3473_v58 }
0x234a   :  { %3485 = vadd.xlane.f32.xlu0 %v3484_v56 }
0x234b   :  { %v3487_v62 = vsel %vm315_vm13, %v3477_v61, 0.0 }
0x234c   :  { %3488 = vadd.xlane.f32.xlu1 %v3487_v62 }
0x23d3   :  { %v3480_v57 = vpop.xlane.xlu0 %3479 }
0x23d4   :  { %v3490_v15 = vmul.f32 0.03125, %v3480_v57 }
0x23d5   :  { %v3483_v12 = vpop.xlane.xlu1 %3482 }
0x23d6   :  { %v3494_v9 = vadd.f32 1e-05, %v3490_v15  ;;  %v3491_v8 = vmul.f32 0.03125, %v3483_v12 }
0x23d7   :  { %v3486_v35 = vpop.xlane.xlu0 %3485 }
0x23d8   :  { %4508 = vrsqrt.f32 %v3494_v9  ;;  %v3495_v40 = vadd.f32 1e-05, %v3491_v8  ;;  %v3492_v41 = vmul.f32 0.03125, %v3486_v35 }
0x23d9   :  { %v3489_v26 = vpop.xlane.xlu1 %3488 }
0x23da   :  { %4510 = vrsqrt.f32 %v3495_v40  ;;  %v3496_v23 = vadd.f32 1e-05, %v3492_v41  ;;  %v3493_v6 = vmul.f32 0.03125, %v3489_v26 }
0x23dc   :  { %4512 = vrsqrt.f32 %v3496_v23  ;;  %v3497_v7 = vadd.f32 1e-05, %v3493_v6 }
0x23de   :  { %4514 = vrsqrt.f32 %v3497_v7 }
0x23e2   :  { %v4509_v2 = vpop.eup %4508 }
0x23e3   :  { %v3502_v1 = vmul.f32 %v4509_v2, %v3470_v29 }
0x23e4   :  { %v4511_v3 = vpop.eup %4510 }
0x23e5   :  { %v3503_v25 = vmul.f32 %v4511_v3, %v3471_v36  ;;  %v3510_v33 = vmul.f32 %v3733_v48, %v3502_v1 }
0x23e6   :  { %v4513_v42 = vpop.eup %4512 }
0x23e7   :  { %v3504_v43 = vmul.f32 %v4513_v42, %v3472_v19  ;;  %v3511_v63 = vmul.f32 %v3733_v48, %v3503_v25  ;;  %v3518_v54 = vadd.f32 %v3734_v31, %v3510_v33 }
0x23e8   :  { %v4515_v11 = vpop.eup %4514 }
0x23e9   :  { %v3512_v46 = vmul.f32 %v3733_v48, %v3504_v43  ;;  %v3505_v18 = vmul.f32 %v4515_v11, %v3473_v58  ;;  %v3519_v16 = vadd.f32 %v3734_v31, %v3511_v63 }
0x23eb   :  { %v3513_v13 = vmul.f32 %v3733_v48, %v3505_v18  ;;  %v3522_v28 = vpack.c.bf16 %v3519_v16, %v3518_v54  ;;  %v3520_v44 = vadd.f32 %v3734_v31, %v3512_v46 }
0x23ed   :  { %4184 = vmatprep.mubr.msk.bf16.mxu1 %vm315_vm13, %v3522_v28  ;;  %v3521_v51 = vadd.f32 %v3734_v31, %v3513_v13 }
0x23ef   :  { %v3523_v50 = vpack.c.bf16 %v3521_v51, %v3520_v44 }
0x23f1   :  { %4185 = vmatmul.mubr.msk.bf16.vlgmr.msra.gmra.mrb[84].mxu1 %vm315_vm13, %v3523_v50 }
0x24c4   :  { %v4186_v4 = vpop.f32.mrb[84].mxu1 }
0x24c5   :  { %v3580_v32 = vpop.f32.mrb[85].mxu1 }
0x24c6   :  { %v4187_v21 = vpop.f32.mrb[86].mxu1 }
0x24c7   :  { %v3755_v22 = vpack.c.bf16 %v4187_v21, %v4186_v4  ;;  %v3583_v24 = vpop.f32.mrb[87].mxu1 }
0x24c8   :  { %v3750_v37 = vpack.c.bf16 %v3583_v24, %v3580_v32 }
0x24c9   :  { %3757 = vst [vmem:[%s5429_s11 + $0x8] sm:$0xff] %v3755_v22  }
0x24ca   :  { %3751 = vst [vmem:[%s5429_s11] sm:$0xff] %v3750_v37  }

</bundles_post_ra>
